<compile_context>
chip_gen: v7x
topology: tpu7x:2x2x1
jax: 0.10.0
libtpu: 0.0.40
codegen_flags: <defaults>
</compile_context>

<pallas_src>
import functools

import numpy as np
import jax
import jax.numpy as jnp
from jax.experimental import pallas as pl
from jax.experimental.pallas import tpu as pltpu


# ----------------------------------------------------------------------------
# Pallas kernel: fused (weights @ patches) matmul with activation epilogue
# ----------------------------------------------------------------------------
def _fused_conv_mm_kernel(*refs, pre_leaky, post, scale, has_res):
    # refs = (w_ref, p_ref, [r_ref], o_ref)
    #   w_ref: (Cout, K)   p_ref: (K, TM)   r_ref: (Cout, TM)   o_ref: (Cout, TM)
    if has_res:
        w_ref, p_ref, r_ref, o_ref = refs
    else:
        w_ref, p_ref, o_ref = refs
        r_ref = None

    p = p_ref[...]
    if pre_leaky:                                   # leaky(pad(x)) == pad(leaky(x))
        p = jnp.where(p >= 0, p, 0.2 * p)

    acc = jnp.dot(w_ref[...], p, preferred_element_type=jnp.float32)

    if r_ref is not None:                           # fused residual add
        acc = acc + r_ref[...]
    if post == "leaky":
        acc = jnp.where(acc >= 0, acc, 0.2 * acc)
    elif post == "softsign":
        acc = acc / (1.0 + jnp.abs(acc))
    if scale is not None:                           # fused range_flow scaling
        acc = acc * scale

    o_ref[...] = acc


_TM_MAX = 2048  # lane-tile of the spatial axis; only kicks in at production sizes


def _fused_matmul(w, p, residual=None, *, pre_leaky=False, post=None, scale=None):
    """out = post(w @ pre(p) [+ residual]) * scale.  w:(Cout,K) p:(K,M) -> (Cout,M)."""
    Cout, K = w.shape
    M = p.shape[1]

    if M <= _TM_MAX:
        tm, grid = M, (1,)
    else:
        tm, grid = _TM_MAX, (pl.cdiv(M, _TM_MAX),)

    kern = functools.partial(_fused_conv_mm_kernel, pre_leaky=pre_leaky, post=post,
                             scale=scale, has_res=residual is not None)

    in_specs = [pl.BlockSpec((Cout, K), lambda i: (0, 0)),
                pl.BlockSpec((K, tm), lambda i: (0, i))]
    args = [w, p]
    if residual is not None:
        in_specs.append(pl.BlockSpec((Cout, tm), lambda i: (0, i)))
        args.append(residual)

    return pl.pallas_call(
        kern,
        out_shape=jax.ShapeDtypeStruct((Cout, M), jnp.float32),
        grid=grid,
        in_specs=in_specs,
        out_specs=pl.BlockSpec((Cout, tm), lambda i: (0, i)),
        compiler_params=pltpu.CompilerParams(dimension_semantics=("parallel",)),
    )(*args)


# ----------------------------------------------------------------------------
# Conv wrappers (im2col construction is glue; matmul + epilogue are Pallas)
# ----------------------------------------------------------------------------
def _im2col_cf(x_cf, stride=1):
    """x_cf: (C, D, H, W) -> (27*C, Do*Ho*Wo) patch matrix (channels-first rows).

    Row ordering of axis 0 is (kd, kh, kw, cin); for stride=2 only the strided
    output locations are extracted (kernel=3, padding=1 semantics)."""
    C, D, H, W = x_cf.shape
    xp = jnp.pad(x_cf, ((0, 0), (1, 1), (1, 1), (1, 1)))
    Do = (D - 1) // stride + 1
    Ho = (H - 1) // stride + 1
    Wo = (W - 1) // stride + 1
    slabs = []
    for kd in range(3):
        for kh in range(3):
            for kw in range(3):
                s = jax.lax.slice(
                    xp,
                    (0, kd, kh, kw),
                    (C,
                     kd + stride * (Do - 1) + 1,
                     kh + stride * (Ho - 1) + 1,
                     kw + stride * (Wo - 1) + 1),
                    (1, stride, stride, stride))
                slabs.append(s.reshape(C, Do * Ho * Wo))
    return jnp.concatenate(slabs, axis=0), (Do, Ho, Wo)


def conv3d_k3(x_cf, w2, *, stride=1, pre_leaky=False, post=None,
              residual=None, scale=None):
    """Conv3d kernel=3, padding=1, bias=False, with fused epilogue.

    x_cf: (Cin, D, H, W);  w2: (Cout, 27*Cin) (row order (kd,kh,kw,cin));
    residual: optional (Cout, D, H, W) added before `post`."""
    patches, (Do, Ho, Wo) = _im2col_cf(x_cf, stride)
    res2d = None if residual is None else residual.reshape(residual.shape[0], -1)
    out = _fused_matmul(w2, patches, res2d, pre_leaky=pre_leaky, post=post,
                        scale=scale)
    return out.reshape(w2.shape[0], Do, Ho, Wo)


def conv_transpose3d_2x(x_cf, w8t):
    """ConvTranspose3d kernel=2, stride=2, bias=False as a single matmul.

    x_cf: (Cin, D, H, W);  w8t: (8*Cout, Cin), row order (kd,kh,kw,cout)."""
    Cin, D, H, W = x_cf.shape
    Cout = w8t.shape[0] // 8
    y = _fused_matmul(w8t, x_cf.reshape(Cin, D * H * W))       # (8*Cout, M)
    y = y.reshape(2, 2, 2, Cout, D, H, W)
    y = jnp.transpose(y, (3, 4, 0, 5, 1, 6, 2)).reshape(Cout, 2 * D, 2 * H, 2 * W)
    return y


# ----------------------------------------------------------------------------
# Module blocks (activations fused into the conv kernels)
# ----------------------------------------------------------------------------
def resblock_seq(x_cf, wpair):
    # leaky -> conv1 -> leaky -> conv2 -> (+x) -> leaky, in 2 fused pallas_calls.
    h = conv3d_k3(x_cf, wpair[0], pre_leaky=True)
    return conv3d_k3(h, wpair[1], pre_leaky=True, residual=x_cf, post="leaky")


def output_head(x_cf, wa, wb, range_flow):
    h = conv3d_k3(x_cf, wa, post="leaky")
    return conv3d_k3(h, wb, post="softsign", scale=range_flow)


def model1_stub(params, x1, y1, range_flow):
    # TODO(synk): model1 is an externally supplied lvl-1 module (not defined in
    # the reference); stand-in = one fused Pallas conv + softsign velocity field.
    cat = jnp.concatenate([x1[0], y1[0]], axis=0)            # (2, D, H, W)
    field1 = conv3d_k3(cat, params['model1_w'], post="softsign",
                       scale=range_flow)[None]               # (1, 3, D, H, W)
    return field1, -field1, x1, y1, x1, y1


# ----------------------------------------------------------------------------
# Plain-JAX glue: grid generation, warping, upsampling
# ----------------------------------------------------------------------------
def generate_grid_unit(imgshape):
    x = (np.arange(imgshape[0]) - ((imgshape[0] - 1) / 2)) / (imgshape[0] - 1) * 2
    y = (np.arange(imgshape[1]) - ((imgshape[1] - 1) / 2)) / (imgshape[1] - 1) * 2
    z = (np.arange(imgshape[2]) - ((imgshape[2] - 1) / 2)) / (imgshape[2] - 1) * 2
    grid = np.rollaxis(np.array(np.meshgrid(z, y, x)), 0, 4)
    grid = np.swapaxes(grid, 0, 2)
    grid = np.swapaxes(grid, 1, 2)
    return grid.astype(np.float32)   # (D, H, W, 3)


# TODO(synk): grid_sample is a data-dependent gather with no clean Pallas TPU
# equivalent; it is implemented in plain JAX (exact PyTorch border/bilinear math).
def grid_sample_3d(x, grid, align_corners=True):
    _, C, D, H, W = x.shape
    gx, gy, gz = grid[0, ..., 0], grid[0, ..., 1], grid[0, ..., 2]

    def unnorm(g, size):
        size = float(size)
        if align_corners:
            return (g + 1.0) * 0.5 * (size - 1.0)
        return ((g + 1.0) * size - 1.0) * 0.5

    ix = jnp.clip(unnorm(gx, W), 0.0, W - 1.0)   # border padding
    iy = jnp.clip(unnorm(gy, H), 0.0, H - 1.0)
    iz = jnp.clip(unnorm(gz, D), 0.0, D - 1.0)

    vol = x[0]                                    # (C, D, H, W)
    x0 = jnp.floor(ix).astype(jnp.int32)
    y0 = jnp.floor(iy).astype(jnp.int32)
    z0 = jnp.floor(iz).astype(jnp.int32)
    x1 = jnp.clip(x0 + 1, 0, W - 1)
    y1 = jnp.clip(y0 + 1, 0, H - 1)
    z1 = jnp.clip(z0 + 1, 0, D - 1)
    x0 = jnp.clip(x0, 0, W - 1)
    y0 = jnp.clip(y0, 0, H - 1)
    z0 = jnp.clip(z0, 0, D - 1)
    wx = ix - x0.astype(jnp.float32)
    wy = iy - y0.astype(jnp.float32)
    wz = iz - z0.astype(jnp.float32)

    def g(zz, yy, xx):
        return vol[:, zz, yy, xx]                 # (C, Do, Ho, Wo)

    out = (g(z0, y0, x0) * (1 - wz) * (1 - wy) * (1 - wx)
           + g(z0, y0, x1) * (1 - wz) * (1 - wy) * wx
           + g(z0, y1, x0) * (1 - wz) * wy * (1 - wx)
           + g(z0, y1, x1) * (1 - wz) * wy * wx
           + g(z1, y0, x0) * wz * (1 - wy) * (1 - wx)
           + g(z1, y0, x1) * wz * (1 - wy) * wx
           + g(z1, y1, x0) * wz * wy * (1 - wx)
           + g(z1, y1, x1) * wz * wy * wx)
    return out[None]


def transform_unit(x, flow_perm, sample_grid):
    # SpatialTransform_unit
    return grid_sample_3d(x, sample_grid + flow_perm, align_corners=True)


def spatial_transform_in(x, flow_perm, sample_grid):
    # SpatialTransform (reproduces the reference code's slicing exactly)
    g = sample_grid + flow_perm
    sz = g.shape  # (1, D, H, W, 3)
    g = g.at[0, 0].set((g[0, 0] - (sz[4] - 1) / 2.0) / sz[4] * 2.0)
    g = g.at[0, 1].set((g[0, 1] - (sz[3] - 1) / 2.0) / sz[3] * 2.0)
    g = g.at[0, 2].set((g[0, 2] - (sz[2] - 1) / 2.0) / sz[2] * 2.0)
    return grid_sample_3d(x, g, align_corners=False)


def diffeomorphic_transform(velocity, sample_grid, range_flow, time_step=7):
    flow = velocity / (2.0 ** time_step)
    for _ in range(time_step):
        grid = sample_grid + jnp.transpose(flow, (0, 2, 3, 4, 1)) * range_flow
        flow = flow + grid_sample_3d(flow, grid, align_corners=True)
    return flow


def upsample_trilinear_2x(x):
    # torch.nn.Upsample(scale_factor=2, mode='trilinear'), align_corners=False
    def interp_axis(v, axis):
        in_size = v.shape[axis]
        out_size = in_size * 2
        s = (jnp.arange(out_size, dtype=jnp.float32) + 0.5) * 0.5 - 0.5
        s = jnp.maximum(s, 0.0)
        i0 = jnp.floor(s).astype(jnp.int32)
        i1 = jnp.minimum(i0 + 1, in_size - 1)
        w = s - i0.astype(jnp.float32)
        a = jnp.take(v, i0, axis=axis)
        b = jnp.take(v, i1, axis=axis)
        shp = [1] * v.ndim
        shp[axis] = out_size
        w = w.reshape(shp)
        return a * (1.0 - w) + b * w

    y = interp_axis(x, 2)
    y = interp_axis(y, 3)
    y = interp_axis(y, 4)
    return y


# ----------------------------------------------------------------------------
# Full forward pass of WavletMono_unit_add_lvl2 (is_train=True)
# ----------------------------------------------------------------------------
def wavlet_forward(params, grid_1, grid_2, x1, y1, x2_lll, y2_lll, x2_hhh, y2_hhh,
                   range_flow=0.4):
    del grid_1  # only used inside model1 (stubbed)
    field1, field1_in, warped_x1, fixed1, mov1, warped_x1_in = model1_stub(
        params, x1, y1, range_flow)

    field1_up = upsample_trilinear_2x(field1)                     # (1,3,D2,H2,W2)
    f1up_perm = jnp.transpose(field1_up, (0, 2, 3, 4, 1))

    warped_x2_lll_input = transform_unit(x2_lll, f1up_perm, grid_2)
    cat_lll = jnp.concatenate(
        [warped_x2_lll_input[0], y2_lll[0], field1_up[0]], axis=0)  # (5, D,H,W)
    fixed2_lll = cat_lll[1:2][None]
    mov2 = x2_lll
    fea_input2_lll = conv3d_k3(cat_lll, params['imgInput2'])        # (c2, D,H,W)

    warped_x2_hhh_input = transform_unit(x2_hhh, f1up_perm, grid_2)
    cat_hhh = jnp.concatenate([warped_x2_hhh_input[0], y2_hhh[0]], axis=0)
    fixed2_hhh = cat_hhh[1:2][None]
    fea_input2_hhh = conv3d_k3(cat_hhh, params['imgInput1'])        # (c2, D,H,W)

    fea_block2 = resblock_seq(
        jnp.concatenate([fea_input2_lll, fea_input2_hhh], axis=0), params['resblock2'])
    fea_down2 = conv3d_k3(fea_block2, params['down_conv2'], stride=2)
    fea_block32 = resblock_seq(fea_down2, params['resblock3'])
    fea_down32 = conv3d_k3(fea_block32, params['down_conv3'], stride=2)
    fea_block42 = resblock_seq(fea_down32, params['resblock4'])
    fea_block52 = resblock_seq(fea_block42, params['resblock5'])
    fea_up12 = conv_transpose3d_2x(fea_block52, params['up1'])
    fea_block62 = resblock_seq(fea_up12, params['resblock6'])
    fea_up22 = conv_transpose3d_2x(fea_block62, params['up2'])
    skip1 = conv3d_k3(fea_block2, params['skip'])

    field2_v = output_head(jnp.concatenate([skip1, fea_up22], axis=0),
                           params['out_a'], params['out_b'], range_flow)[None]

    f2v_perm = jnp.transpose(field2_v, (0, 2, 3, 4, 1))
    w1_ = transform_unit(field1_up[:, 0:1], f2v_perm, grid_2)
    w2_ = transform_unit(field1_up[:, 1:2], f2v_perm, grid_2)
    w3_ = transform_unit(field1_up[:, 2:3], f2v_perm, grid_2)
    field1_up_warp = jnp.concatenate([w1_, w2_, w3_], axis=1)
    field2_v = field2_v + field1_up_warp

    field2 = diffeomorphic_transform(field2_v, grid_2, range_flow, time_step=7)
    field2_in = spatial_transform_in(
        -field2_v, jnp.transpose(field2_v, (0, 2, 3, 4, 1)), grid_2)

    f2_perm = jnp.transpose(field2, (0, 2, 3, 4, 1))
    warped_x2_lll = transform_unit(x2_lll, f2_perm, grid_2)
    warped_x2_hhh = transform_unit(x2_hhh, f2_perm, grid_2)
    warped_x2_in = transform_unit(
        y2_lll, jnp.transpose(field2_in, (0, 2, 3, 4, 1)), grid_2)

    return (field1, field2, field2_in, warped_x1, warped_x2_lll, warped_x2_hhh,
            fixed1, fixed2_lll, fixed2_hhh, mov1, mov2, warped_x2_lll_input,
            warped_x2_in)


# ----------------------------------------------------------------------------
# Deterministic parameter init (bias=False everywhere), stored pre-reshaped
# ----------------------------------------------------------------------------
def init_params(key, in_channel=2, start_channel=2):
    keys = iter(jax.random.split(key, 32))

    def conv_w(cin, cout):
        # (Cout, 27*Cin); axis-1 order (kd,kh,kw,cin)
        # == torch (Cout,Cin,3,3,3).transpose(0,2,3,4,1).reshape(Cout, 27*Cin)
        std = 1.0 / np.sqrt(27.0 * cin)
        return jax.random.normal(next(keys), (cout, 27 * cin), jnp.float32) * std

    def convT_w(cin, cout):
        # (8*Cout, Cin); axis-0 order (kd,kh,kw,cout)
        # == torch (Cin,Cout,2,2,2).transpose(2,3,4,1,0).reshape(8*Cout, Cin)
        std = 1.0 / np.sqrt(8.0 * cin)
        return jax.random.normal(next(keys), (8 * cout, cin), jnp.float32) * std

    c2, c4, c8 = 2 * start_channel, 4 * start_channel, 8 * start_channel
    p = {
        'model1_w': conv_w(2, 3),
        'imgInput1': conv_w(in_channel, c2),
        'imgInput2': conv_w(in_channel + 3, c2),
        'down_conv2': conv_w(c4, c4),
        'down_conv3': conv_w(c4, c4),
        'down_conv4': conv_w(c4, c4),   # defined in module, unused in forward
        'up1': convT_w(c4, c4),
        'up2': convT_w(c4, c4),
        'up3': convT_w(c4, c4),         # defined in module, unused in forward
        'skip': conv_w(c4, c4),
        'out_a': conv_w(c8, c4),
        'out_b': conv_w(c4, 3),
    }
    for name in ['resblock2', 'resblock3', 'resblock4', 'resblock5',
                 'resblock6', 'resblock7']:
        p[name] = (conv_w(c4, c4), conv_w(c4, c4))
    return p


# ----------------------------------------------------------------------------
if __name__ == "__main__":
    in_channel, start_channel, range_flow = 2, 2, 0.4
    imgshape1, imgshape2 = (4, 4, 4), (8, 8, 8)

    params = init_params(jax.random.PRNGKey(42), in_channel, start_channel)
    grid_1 = jnp.asarray(generate_grid_unit(imgshape1))[None]   # (1,4,4,4,3)
    grid_2 = jnp.asarray(generate_grid_unit(imgshape2))[None]   # (1,8,8,8,3)

    ks = jax.random.split(jax.random.PRNGKey(0), 6)
    x1 = jax.random.normal(ks[0], (1, 1) + imgshape1, jnp.float32)
    y1 = jax.random.normal(ks[1], (1, 1) + imgshape1, jnp.float32)
    x2_lll = jax.random.normal(ks[2], (1, 1) + imgshape2, jnp.float32)
    y2_lll = jax.random.normal(ks[3], (1, 1) + imgshape2, jnp.float32)
    x2_hhh = jax.random.normal(ks[4], (1, 1) + imgshape2, jnp.float32)
    y2_hhh = jax.random.normal(ks[5], (1, 1) + imgshape2, jnp.float32)

    fwd = jax.jit(functools.partial(wavlet_forward, range_flow=range_flow))
    outs = fwd(params, grid_1, grid_2, x1, y1, x2_lll, y2_lll, x2_hhh, y2_hhh)
    jax.block_until_ready(outs)
    assert outs[1].shape == (1, 3) + imgshape2      # field2
    assert outs[4].shape == (1, 1) + imgshape2      # warped_x2_lll
    print("KERNEL_OK")
</pallas_src>

<mosaic_0001>
module attributes {stable_mosaic.version = 11 : i64} {
  func.func @_fused_conv_mm_kernel(%arg0: i32, %arg1: memref<3x54xf32, #tpu.memory_space<vmem>>, %arg2: memref<54x64xf32, #tpu.memory_space<vmem>>, %arg3: memref<3x64xf32, #tpu.memory_space<vmem>>) attributes {dimension_semantics = [#tpu.dimension_semantics<parallel>], iteration_bounds = array<i64: 1>, scalar_prefetch = 0 : i64, scratch_operands = 0 : i64, tpu.core_type = #tpu.core_type<tc>, window_params = [{pipeline_mode = #tpu.pipeline_mode<synchronous>, transform_indices = @transform_0, window_bounds = array<i64: 3, 54>}, {transform_indices = @transform_1, window_bounds = array<i64: 54, 64>}, {transform_indices = @transform_2, window_bounds = array<i64: 3, 64>}]} {
    %c0 = arith.constant 0 : index
    %c0_0 = arith.constant 0 : index
    %0 = vector.load %arg2[%c0, %c0_0] : memref<54x64xf32, #tpu.memory_space<vmem>>, vector<54x64xf32>
    %c0_1 = arith.constant 0 : index
    %c0_2 = arith.constant 0 : index
    %1 = vector.load %arg1[%c0_1, %c0_2] : memref<3x54xf32, #tpu.memory_space<vmem>>, vector<3x54xf32>
    %cst = arith.constant dense<0.000000e+00> : vector<3x64xf32>
    %2 = tpu.matmul %1, %0, %cst {dimension_numbers = #tpu.dot_dimension_numbers<[1], [0], [0], [1], [0, 0, 1, 1], [], []>} : vector<3x54xf32>, vector<54x64xf32>, vector<3x64xf32> -> vector<3x64xf32>
    %3 = math.absf %2 : vector<3x64xf32>
    %cst_3 = arith.constant 1.000000e+00 : f32
    %4 = vector.broadcast %cst_3 : f32 to vector<3x64xf32>
    %5 = arith.addf %4, %3 : vector<3x64xf32>
    %6 = arith.divf %2, %5 : vector<3x64xf32>
    %cst_4 = arith.constant 4.000000e-01 : f32
    %7 = vector.broadcast %cst_4 : f32 to vector<3x64xf32>
    %8 = arith.mulf %6, %7 : vector<3x64xf32>
    %c0_5 = arith.constant 0 : index
    %c0_6 = arith.constant 0 : index
    %9 = vector.load %arg3[%c0_5, %c0_6] : memref<3x64xf32, #tpu.memory_space<vmem>>, vector<3x64xf32>
    tpu.vector_store %arg3[%c0_5, %c0_6], %8 {strides = array<i32>} : memref<3x64xf32, #tpu.memory_space<vmem>>, vector<3x64xf32>,
    return
  }
  func.func @transform_0(%arg0: i32) -> (i32, i32) {
    %c0_i32 = arith.constant 0 : i32
    %c0_i32_0 = arith.constant 0 : i32
    %c0_i32_1 = arith.constant 0 : i32
    return %c0_i32, %c0_i32_0 : i32, i32
  }
  func.func @transform_1(%arg0: i32) -> (i32, i32) {
    %c0_i32 = arith.constant 0 : i32
    %c0_i32_0 = arith.constant 0 : i32
    return %c0_i32, %arg0 : i32, i32
  }
  func.func @transform_2(%arg0: i32) -> (i32, i32) {
    %c0_i32 = arith.constant 0 : i32
    %c0_i32_0 = arith.constant 0 : i32
    return %c0_i32, %arg0 : i32, i32
  }
}

module attributes {stable_mosaic.version = 11 : i64} {
  func.func @_fused_conv_mm_kernel(%arg0: i32, %arg1: memref<4x54xf32, #tpu.memory_space<vmem>>, %arg2: memref<54x512xf32, #tpu.memory_space<vmem>>, %arg3: memref<4x512xf32, #tpu.memory_space<vmem>>) attributes {dimension_semantics = [#tpu.dimension_semantics<parallel>], iteration_bounds = array<i64: 1>, scalar_prefetch = 0 : i64, scratch_operands = 0 : i64, tpu.core_type = #tpu.core_type<tc>, window_params = [{pipeline_mode = #tpu.pipeline_mode<synchronous>, transform_indices = @transform_0, window_bounds = array<i64: 4, 54>}, {transform_indices = @transform_1, window_bounds = array<i64: 54, 512>}, {transform_indices = @transform_2, window_bounds = array<i64: 4, 512>}]} {
    %c0 = arith.constant 0 : index
    %c0_0 = arith.constant 0 : index
    %0 = vector.load %arg2[%c0, %c0_0] : memref<54x512xf32, #tpu.memory_space<vmem>>, vector<54x512xf32>
    %c0_1 = arith.constant 0 : index
    %c0_2 = arith.constant 0 : index
    %1 = vector.load %arg1[%c0_1, %c0_2] : memref<4x54xf32, #tpu.memory_space<vmem>>, vector<4x54xf32>
    %cst = arith.constant dense<0.000000e+00> : vector<4x512xf32>
    %2 = tpu.matmul %1, %0, %cst {dimension_numbers = #tpu.dot_dimension_numbers<[1], [0], [0], [1], [0, 0, 1, 1], [], []>} : vector<4x54xf32>, vector<54x512xf32>, vector<4x512xf32> -> vector<4x512xf32>
    %c0_3 = arith.constant 0 : index
    %c0_4 = arith.constant 0 : index
    %3 = vector.load %arg3[%c0_3, %c0_4] : memref<4x512xf32, #tpu.memory_space<vmem>>, vector<4x512xf32>
    tpu.vector_store %arg3[%c0_3, %c0_4], %2 {strides = array<i32>} : memref<4x512xf32, #tpu.memory_space<vmem>>, vector<4x512xf32>,
    return
  }
  func.func @transform_0(%arg0: i32) -> (i32, i32) {
    %c0_i32 = arith.constant 0 : i32
    %c0_i32_0 = arith.constant 0 : i32
    %c0_i32_1 = arith.constant 0 : i32
    return %c0_i32, %c0_i32_0 : i32, i32
  }
  func.func @transform_1(%arg0: i32) -> (i32, i32) {
    %c0_i32 = arith.constant 0 : i32
    %c0_i32_0 = arith.constant 0 : i32
    return %c0_i32, %arg0 : i32, i32
  }
  func.func @transform_2(%arg0: i32) -> (i32, i32) {
    %c0_i32 = arith.constant 0 : i32
    %c0_i32_0 = arith.constant 0 : i32
    return %c0_i32, %arg0 : i32, i32
  }
}

module attributes {stable_mosaic.version = 11 : i64} {
  func.func @_fused_conv_mm_kernel(%arg0: i32, %arg1: memref<4x135xf32, #tpu.memory_space<vmem>>, %arg2: memref<135x512xf32, #tpu.memory_space<vmem>>, %arg3: memref<4x512xf32, #tpu.memory_space<vmem>>) attributes {dimension_semantics = [#tpu.dimension_semantics<parallel>], iteration_bounds = array<i64: 1>, scalar_prefetch = 0 : i64, scratch_operands = 0 : i64, tpu.core_type = #tpu.core_type<tc>, window_params = [{pipeline_mode = #tpu.pipeline_mode<synchronous>, transform_indices = @transform_0, window_bounds = array<i64: 4, 135>}, {transform_indices = @transform_1, window_bounds = array<i64: 135, 512>}, {transform_indices = @transform_2, window_bounds = array<i64: 4, 512>}]} {
    %c0 = arith.constant 0 : index
    %c0_0 = arith.constant 0 : index
    %0 = vector.load %arg2[%c0, %c0_0] : memref<135x512xf32, #tpu.memory_space<vmem>>, vector<135x512xf32>
    %c0_1 = arith.constant 0 : index
    %c0_2 = arith.constant 0 : index
    %1 = vector.load %arg1[%c0_1, %c0_2] : memref<4x135xf32, #tpu.memory_space<vmem>>, vector<4x135xf32>
    %cst = arith.constant dense<0.000000e+00> : vector<4x512xf32>
    %2 = tpu.matmul %1, %0, %cst {dimension_numbers = #tpu.dot_dimension_numbers<[1], [0], [0], [1], [0, 0, 1, 1], [], []>} : vector<4x135xf32>, vector<135x512xf32>, vector<4x512xf32> -> vector<4x512xf32>
    %c0_3 = arith.constant 0 : index
    %c0_4 = arith.constant 0 : index
    %3 = vector.load %arg3[%c0_3, %c0_4] : memref<4x512xf32, #tpu.memory_space<vmem>>, vector<4x512xf32>
    tpu.vector_store %arg3[%c0_3, %c0_4], %2 {strides = array<i32>} : memref<4x512xf32, #tpu.memory_space<vmem>>, vector<4x512xf32>,
    return
  }
  func.func @transform_0(%arg0: i32) -> (i32, i32) {
    %c0_i32 = arith.constant 0 : i32
    %c0_i32_0 = arith.constant 0 : i32
    %c0_i32_1 = arith.constant 0 : i32
    return %c0_i32, %c0_i32_0 : i32, i32
  }
  func.func @transform_1(%arg0: i32) -> (i32, i32) {
    %c0_i32 = arith.constant 0 : i32
    %c0_i32_0 = arith.constant 0 : i32
    return %c0_i32, %arg0 : i32, i32
  }
  func.func @transform_2(%arg0: i32) -> (i32, i32) {
    %c0_i32 = arith.constant 0 : i32
    %c0_i32_0 = arith.constant 0 : i32
    return %c0_i32, %arg0 : i32, i32
  }
}

module attributes {stable_mosaic.version = 11 : i64} {
  func.func @_fused_conv_mm_kernel(%arg0: i32, %arg1: memref<8x216xf32, #tpu.memory_space<vmem>>, %arg2: memref<216x512xf32, #tpu.memory_space<vmem>>, %arg3: memref<8x512xf32, #tpu.memory_space<vmem>>) attributes {dimension_semantics = [#tpu.dimension_semantics<parallel>], iteration_bounds = array<i64: 1>, scalar_prefetch = 0 : i64, scratch_operands = 0 : i64, tpu.core_type = #tpu.core_type<tc>, window_params = [{pipeline_mode = #tpu.pipeline_mode<synchronous>, transform_indices = @transform_0, window_bounds = array<i64: 8, 216>}, {transform_indices = @transform_1, window_bounds = array<i64: 216, 512>}, {transform_indices = @transform_2, window_bounds = array<i64: 8, 512>}]} {
    %c0 = arith.constant 0 : index
    %c0_0 = arith.constant 0 : index
    %0 = vector.load %arg2[%c0, %c0_0] : memref<216x512xf32, #tpu.memory_space<vmem>>, vector<216x512xf32>
    %cst = arith.constant 0.000000e+00 : f32
    %1 = vector.broadcast %cst : f32 to vector<216x512xf32>
    %2 = arith.cmpf oge, %0, %1 : vector<216x512xf32>
    %cst_1 = arith.constant 2.000000e-01 : f32
    %3 = vector.broadcast %cst_1 : f32 to vector<216x512xf32>
    %4 = arith.mulf %3, %0 : vector<216x512xf32>
    %5 = arith.select %2, %0, %4 : vector<216x512xi1>, vector<216x512xf32>
    %c0_2 = arith.constant 0 : index
    %c0_3 = arith.constant 0 : index
    %6 = vector.load %arg1[%c0_2, %c0_3] : memref<8x216xf32, #tpu.memory_space<vmem>>, vector<8x216xf32>
    %cst_4 = arith.constant dense<0.000000e+00> : vector<8x512xf32>
    %7 = tpu.matmul %6, %5, %cst_4 {dimension_numbers = #tpu.dot_dimension_numbers<[1], [0], [0], [1], [0, 0, 1, 1], [], []>} : vector<8x216xf32>, vector<216x512xf32>, vector<8x512xf32> -> vector<8x512xf32>
    %c0_5 = arith.constant 0 : index
    %c0_6 = arith.constant 0 : index
    %8 = vector.load %arg3[%c0_5, %c0_6] : memref<8x512xf32, #tpu.memory_space<vmem>>, vector<8x512xf32>
    tpu.vector_store %arg3[%c0_5, %c0_6], %7 {strides = array<i32>} : memref<8x512xf32, #tpu.memory_space<vmem>>, vector<8x512xf32>,
    return
  }
  func.func @transform_0(%arg0: i32) -> (i32, i32) {
    %c0_i32 = arith.constant 0 : i32
    %c0_i32_0 = arith.constant 0 : i32
    %c0_i32_1 = arith.constant 0 : i32
    return %c0_i32, %c0_i32_0 : i32, i32
  }
  func.func @transform_1(%arg0: i32) -> (i32, i32) {
    %c0_i32 = arith.constant 0 : i32
    %c0_i32_0 = arith.constant 0 : i32
    return %c0_i32, %arg0 : i32, i32
  }
  func.func @transform_2(%arg0: i32) -> (i32, i32) {
    %c0_i32 = arith.constant 0 : i32
    %c0_i32_0 = arith.constant 0 : i32
    return %c0_i32, %arg0 : i32, i32
  }
}

module attributes {stable_mosaic.version = 11 : i64} {
  func.func @_fused_conv_mm_kernel(%arg0: i32, %arg1: memref<8x216xf32, #tpu.memory_space<vmem>>, %arg2: memref<216x512xf32, #tpu.memory_space<vmem>>, %arg3: memref<8x512xf32, #tpu.memory_space<vmem>>, %arg4: memref<8x512xf32, #tpu.memory_space<vmem>>) attributes {dimension_semantics = [#tpu.dimension_semantics<parallel>], iteration_bounds = array<i64: 1>, scalar_prefetch = 0 : i64, scratch_operands = 0 : i64, tpu.core_type = #tpu.core_type<tc>, window_params = [{pipeline_mode = #tpu.pipeline_mode<synchronous>, transform_indices = @transform_0, window_bounds = array<i64: 8, 216>}, {transform_indices = @transform_1, window_bounds = array<i64: 216, 512>}, {transform_indices = @transform_2, window_bounds = array<i64: 8, 512>}, {transform_indices = @transform_3, window_bounds = array<i64: 8, 512>}]} {
    %c0 = arith.constant 0 : index
    %c0_0 = arith.constant 0 : index
    %0 = vector.load %arg2[%c0, %c0_0] : memref<216x512xf32, #tpu.memory_space<vmem>>, vector<216x512xf32>
    %cst = arith.constant 0.000000e+00 : f32
    %1 = vector.broadcast %cst : f32 to vector<216x512xf32>
    %2 = arith.cmpf oge, %0, %1 : vector<216x512xf32>
    %cst_1 = arith.constant 2.000000e-01 : f32
    %3 = vector.broadcast %cst_1 : f32 to vector<216x512xf32>
    %4 = arith.mulf %3, %0 : vector<216x512xf32>
    %5 = arith.select %2, %0, %4 : vector<216x512xi1>, vector<216x512xf32>
    %c0_2 = arith.constant 0 : index
    %c0_3 = arith.constant 0 : index
    %6 = vector.load %arg1[%c0_2, %c0_3] : memref<8x216xf32, #tpu.memory_space<vmem>>, vector<8x216xf32>
    %cst_4 = arith.constant dense<0.000000e+00> : vector<8x512xf32>
    %7 = tpu.matmul %6, %5, %cst_4 {dimension_numbers = #tpu.dot_dimension_numbers<[1], [0], [0], [1], [0, 0, 1, 1], [], []>} : vector<8x216xf32>, vector<216x512xf32>, vector<8x512xf32> -> vector<8x512xf32>
    %c0_5 = arith.constant 0 : index
    %c0_6 = arith.constant 0 : index
    %8 = vector.load %arg3[%c0_5, %c0_6] : memref<8x512xf32, #tpu.memory_space<vmem>>, vector<8x512xf32>
    %9 = arith.addf %7, %8 : vector<8x512xf32>
    %cst_7 = arith.constant 0.000000e+00 : f32
    %10 = vector.broadcast %cst_7 : f32 to vector<8x512xf32>
    %11 = arith.cmpf oge, %9, %10 : vector<8x512xf32>
    %cst_8 = arith.constant 2.000000e-01 : f32
    %12 = vector.broadcast %cst_8 : f32 to vector<8x512xf32>
    %13 = arith.mulf %12, %9 : vector<8x512xf32>
    %14 = arith.select %11, %9, %13 : vector<8x512xi1>, vector<8x512xf32>
    %c0_9 = arith.constant 0 : index
    %c0_10 = arith.constant 0 : index
    %15 = vector.load %arg4[%c0_9, %c0_10] : memref<8x512xf32, #tpu.memory_space<vmem>>, vector<8x512xf32>
    tpu.vector_store %arg4[%c0_9, %c0_10], %14 {strides = array<i32>} : memref<8x512xf32, #tpu.memory_space<vmem>>, vector<8x512xf32>,
    return
  }
  func.func @transform_0(%arg0: i32) -> (i32, i32) {
    %c0_i32 = arith.constant 0 : i32
    %c0_i32_0 = arith.constant 0 : i32
    %c0_i32_1 = arith.constant 0 : i32
    return %c0_i32, %c0_i32_0 : i32, i32
  }
  func.func @transform_1(%arg0: i32) -> (i32, i32) {
    %c0_i32 = arith.constant 0 : i32
    %c0_i32_0 = arith.constant 0 : i32
    return %c0_i32, %arg0 : i32, i32
  }
  func.func @transform_2(%arg0: i32) -> (i32, i32) {
    %c0_i32 = arith.constant 0 : i32
    %c0_i32_0 = arith.constant 0 : i32
    return %c0_i32, %arg0 : i32, i32
  }
  func.func @transform_3(%arg0: i32) -> (i32, i32) {
    %c0_i32 = arith.constant 0 : i32
    %c0_i32_0 = arith.constant 0 : i32
    return %c0_i32, %arg0 : i32, i32
  }
}

module attributes {stable_mosaic.version = 11 : i64} {
  func.func @_fused_conv_mm_kernel(%arg0: i32, %arg1: memref<8x216xf32, #tpu.memory_space<vmem>>, %arg2: memref<216x64xf32, #tpu.memory_space<vmem>>, %arg3: memref<8x64xf32, #tpu.memory_space<vmem>>) attributes {dimension_semantics = [#tpu.dimension_semantics<parallel>], iteration_bounds = array<i64: 1>, scalar_prefetch = 0 : i64, scratch_operands = 0 : i64, tpu.core_type = #tpu.core_type<tc>, window_params = [{pipeline_mode = #tpu.pipeline_mode<synchronous>, transform_indices = @transform_0, window_bounds = array<i64: 8, 216>}, {transform_indices = @transform_1, window_bounds = array<i64: 216, 64>}, {transform_indices = @transform_2, window_bounds = array<i64: 8, 64>}]} {
    %c0 = arith.constant 0 : index
    %c0_0 = arith.constant 0 : index
    %0 = vector.load %arg2[%c0, %c0_0] : memref<216x64xf32, #tpu.memory_space<vmem>>, vector<216x64xf32>
    %c0_1 = arith.constant 0 : index
    %c0_2 = arith.constant 0 : index
    %1 = vector.load %arg1[%c0_1, %c0_2] : memref<8x216xf32, #tpu.memory_space<vmem>>, vector<8x216xf32>
    %cst = arith.constant dense<0.000000e+00> : vector<8x64xf32>
    %2 = tpu.matmul %1, %0, %cst {dimension_numbers = #tpu.dot_dimension_numbers<[1], [0], [0], [1], [0, 0, 1, 1], [], []>} : vector<8x216xf32>, vector<216x64xf32>, vector<8x64xf32> -> vector<8x64xf32>
    %c0_3 = arith.constant 0 : index
    %c0_4 = arith.constant 0 : index
    %3 = vector.load %arg3[%c0_3, %c0_4] : memref<8x64xf32, #tpu.memory_space<vmem>>, vector<8x64xf32>
    tpu.vector_store %arg3[%c0_3, %c0_4], %2 {strides = array<i32>} : memref<8x64xf32, #tpu.memory_space<vmem>>, vector<8x64xf32>,
    return
  }
  func.func @transform_0(%arg0: i32) -> (i32, i32) {
    %c0_i32 = arith.constant 0 : i32
    %c0_i32_0 = arith.constant 0 : i32
    %c0_i32_1 = arith.constant 0 : i32
    return %c0_i32, %c0_i32_0 : i32, i32
  }
  func.func @transform_1(%arg0: i32) -> (i32, i32) {
    %c0_i32 = arith.constant 0 : i32
    %c0_i32_0 = arith.constant 0 : i32
    return %c0_i32, %arg0 : i32, i32
  }
  func.func @transform_2(%arg0: i32) -> (i32, i32) {
    %c0_i32 = arith.constant 0 : i32
    %c0_i32_0 = arith.constant 0 : i32
    return %c0_i32, %arg0 : i32, i32
  }
}

module attributes {stable_mosaic.version = 11 : i64} {
  func.func @_fused_conv_mm_kernel(%arg0: i32, %arg1: memref<8x216xf32, #tpu.memory_space<vmem>>, %arg2: memref<216x64xf32, #tpu.memory_space<vmem>>, %arg3: memref<8x64xf32, #tpu.memory_space<vmem>>) attributes {dimension_semantics = [#tpu.dimension_semantics<parallel>], iteration_bounds = array<i64: 1>, scalar_prefetch = 0 : i64, scratch_operands = 0 : i64, tpu.core_type = #tpu.core_type<tc>, window_params = [{pipeline_mode = #tpu.pipeline_mode<synchronous>, transform_indices = @transform_0, window_bounds = array<i64: 8, 216>}, {transform_indices = @transform_1, window_bounds = array<i64: 216, 64>}, {transform_indices = @transform_2, window_bounds = array<i64: 8, 64>}]} {
    %c0 = arith.constant 0 : index
    %c0_0 = arith.constant 0 : index
    %0 = vector.load %arg2[%c0, %c0_0] : memref<216x64xf32, #tpu.memory_space<vmem>>, vector<216x64xf32>
    %cst = arith.constant 0.000000e+00 : f32
    %1 = vector.broadcast %cst : f32 to vector<216x64xf32>
    %2 = arith.cmpf oge, %0, %1 : vector<216x64xf32>
    %cst_1 = arith.constant 2.000000e-01 : f32
    %3 = vector.broadcast %cst_1 : f32 to vector<216x64xf32>
    %4 = arith.mulf %3, %0 : vector<216x64xf32>
    %5 = arith.select %2, %0, %4 : vector<216x64xi1>, vector<216x64xf32>
    %c0_2 = arith.constant 0 : index
    %c0_3 = arith.constant 0 : index
    %6 = vector.load %arg1[%c0_2, %c0_3] : memref<8x216xf32, #tpu.memory_space<vmem>>, vector<8x216xf32>
    %cst_4 = arith.constant dense<0.000000e+00> : vector<8x64xf32>
    %7 = tpu.matmul %6, %5, %cst_4 {dimension_numbers = #tpu.dot_dimension_numbers<[1], [0], [0], [1], [0, 0, 1, 1], [], []>} : vector<8x216xf32>, vector<216x64xf32>, vector<8x64xf32> -> vector<8x64xf32>
    %c0_5 = arith.constant 0 : index
    %c0_6 = arith.constant 0 : index
    %8 = vector.load %arg3[%c0_5, %c0_6] : memref<8x64xf32, #tpu.memory_space<vmem>>, vector<8x64xf32>
    tpu.vector_store %arg3[%c0_5, %c0_6], %7 {strides = array<i32>} : memref<8x64xf32, #tpu.memory_space<vmem>>, vector<8x64xf32>,
    return
  }
  func.func @transform_0(%arg0: i32) -> (i32, i32) {
    %c0_i32 = arith.constant 0 : i32
    %c0_i32_0 = arith.constant 0 : i32
    %c0_i32_1 = arith.constant 0 : i32
    return %c0_i32, %c0_i32_0 : i32, i32
  }
  func.func @transform_1(%arg0: i32) -> (i32, i32) {
    %c0_i32 = arith.constant 0 : i32
    %c0_i32_0 = arith.constant 0 : i32
    return %c0_i32, %arg0 : i32, i32
  }
  func.func @transform_2(%arg0: i32) -> (i32, i32) {
    %c0_i32 = arith.constant 0 : i32
    %c0_i32_0 = arith.constant 0 : i32
    return %c0_i32, %arg0 : i32, i32
  }
}

module attributes {stable_mosaic.version = 11 : i64} {
  func.func @_fused_conv_mm_kernel(%arg0: i32, %arg1: memref<8x216xf32, #tpu.memory_space<vmem>>, %arg2: memref<216x64xf32, #tpu.memory_space<vmem>>, %arg3: memref<8x64xf32, #tpu.memory_space<vmem>>, %arg4: memref<8x64xf32, #tpu.memory_space<vmem>>) attributes {dimension_semantics = [#tpu.dimension_semantics<parallel>], iteration_bounds = array<i64: 1>, scalar_prefetch = 0 : i64, scratch_operands = 0 : i64, tpu.core_type = #tpu.core_type<tc>, window_params = [{pipeline_mode = #tpu.pipeline_mode<synchronous>, transform_indices = @transform_0, window_bounds = array<i64: 8, 216>}, {transform_indices = @transform_1, window_bounds = array<i64: 216, 64>}, {transform_indices = @transform_2, window_bounds = array<i64: 8, 64>}, {transform_indices = @transform_3, window_bounds = array<i64: 8, 64>}]} {
    %c0 = arith.constant 0 : index
    %c0_0 = arith.constant 0 : index
    %0 = vector.load %arg2[%c0, %c0_0] : memref<216x64xf32, #tpu.memory_space<vmem>>, vector<216x64xf32>
    %cst = arith.constant 0.000000e+00 : f32
    %1 = vector.broadcast %cst : f32 to vector<216x64xf32>
    %2 = arith.cmpf oge, %0, %1 : vector<216x64xf32>
    %cst_1 = arith.constant 2.000000e-01 : f32
    %3 = vector.broadcast %cst_1 : f32 to vector<216x64xf32>
    %4 = arith.mulf %3, %0 : vector<216x64xf32>
    %5 = arith.select %2, %0, %4 : vector<216x64xi1>, vector<216x64xf32>
    %c0_2 = arith.constant 0 : index
    %c0_3 = arith.constant 0 : index
    %6 = vector.load %arg1[%c0_2, %c0_3] : memref<8x216xf32, #tpu.memory_space<vmem>>, vector<8x216xf32>
    %cst_4 = arith.constant dense<0.000000e+00> : vector<8x64xf32>
    %7 = tpu.matmul %6, %5, %cst_4 {dimension_numbers = #tpu.dot_dimension_numbers<[1], [0], [0], [1], [0, 0, 1, 1], [], []>} : vector<8x216xf32>, vector<216x64xf32>, vector<8x64xf32> -> vector<8x64xf32>
    %c0_5 = arith.constant 0 : index
    %c0_6 = arith.constant 0 : index
    %8 = vector.load %arg3[%c0_5, %c0_6] : memref<8x64xf32, #tpu.memory_space<vmem>>, vector<8x64xf32>
    %9 = arith.addf %7, %8 : vector<8x64xf32>
    %cst_7 = arith.constant 0.000000e+00 : f32
    %10 = vector.broadcast %cst_7 : f32 to vector<8x64xf32>
    %11 = arith.cmpf oge, %9, %10 : vector<8x64xf32>
    %cst_8 = arith.constant 2.000000e-01 : f32
    %12 = vector.broadcast %cst_8 : f32 to vector<8x64xf32>
    %13 = arith.mulf %12, %9 : vector<8x64xf32>
    %14 = arith.select %11, %9, %13 : vector<8x64xi1>, vector<8x64xf32>
    %c0_9 = arith.constant 0 : index
    %c0_10 = arith.constant 0 : index
    %15 = vector.load %arg4[%c0_9, %c0_10] : memref<8x64xf32, #tpu.memory_space<vmem>>, vector<8x64xf32>
    tpu.vector_store %arg4[%c0_9, %c0_10], %14 {strides = array<i32>} : memref<8x64xf32, #tpu.memory_space<vmem>>, vector<8x64xf32>,
    return
  }
  func.func @transform_0(%arg0: i32) -> (i32, i32) {
    %c0_i32 = arith.constant 0 : i32
    %c0_i32_0 = arith.constant 0 : i32
    %c0_i32_1 = arith.constant 0 : i32
    return %c0_i32, %c0_i32_0 : i32, i32
  }
  func.func @transform_1(%arg0: i32) -> (i32, i32) {
    %c0_i32 = arith.constant 0 : i32
    %c0_i32_0 = arith.constant 0 : i32
    return %c0_i32, %arg0 : i32, i32
  }
  func.func @transform_2(%arg0: i32) -> (i32, i32) {
    %c0_i32 = arith.constant 0 : i32
    %c0_i32_0 = arith.constant 0 : i32
    return %c0_i32, %arg0 : i32, i32
  }
  func.func @transform_3(%arg0: i32) -> (i32, i32) {
    %c0_i32 = arith.constant 0 : i32
    %c0_i32_0 = arith.constant 0 : i32
    return %c0_i32, %arg0 : i32, i32
  }
}

module attributes {stable_mosaic.version = 11 : i64} {
  func.func @_fused_conv_mm_kernel(%arg0: i32, %arg1: memref<8x216xf32, #tpu.memory_space<vmem>>, %arg2: memref<216x8xf32, #tpu.memory_space<vmem>>, %arg3: memref<8x8xf32, #tpu.memory_space<vmem>>) attributes {dimension_semantics = [#tpu.dimension_semantics<parallel>], iteration_bounds = array<i64: 1>, scalar_prefetch = 0 : i64, scratch_operands = 0 : i64, tpu.core_type = #tpu.core_type<tc>, window_params = [{pipeline_mode = #tpu.pipeline_mode<synchronous>, transform_indices = @transform_0, window_bounds = array<i64: 8, 216>}, {transform_indices = @transform_1, window_bounds = array<i64: 216, 8>}, {transform_indices = @transform_2, window_bounds = array<i64: 8, 8>}]} {
    %c0 = arith.constant 0 : index
    %c0_0 = arith.constant 0 : index
    %0 = vector.load %arg2[%c0, %c0_0] : memref<216x8xf32, #tpu.memory_space<vmem>>, vector<216x8xf32>
    %c0_1 = arith.constant 0 : index
    %c0_2 = arith.constant 0 : index
    %1 = vector.load %arg1[%c0_1, %c0_2] : memref<8x216xf32, #tpu.memory_space<vmem>>, vector<8x216xf32>
    %cst = arith.constant dense<0.000000e+00> : vector<8x8xf32>
    %2 = tpu.matmul %1, %0, %cst {dimension_numbers = #tpu.dot_dimension_numbers<[1], [0], [0], [1], [0, 0, 1, 1], [], []>} : vector<8x216xf32>, vector<216x8xf32>, vector<8x8xf32> -> vector<8x8xf32>
    %c0_3 = arith.constant 0 : index
    %c0_4 = arith.constant 0 : index
    %3 = vector.load %arg3[%c0_3, %c0_4] : memref<8x8xf32, #tpu.memory_space<vmem>>, vector<8x8xf32>
    tpu.vector_store %arg3[%c0_3, %c0_4], %2 {strides = array<i32>} : memref<8x8xf32, #tpu.memory_space<vmem>>, vector<8x8xf32>,
    return
  }
  func.func @transform_0(%arg0: i32) -> (i32, i32) {
    %c0_i32 = arith.constant 0 : i32
    %c0_i32_0 = arith.constant 0 : i32
    %c0_i32_1 = arith.constant 0 : i32
    return %c0_i32, %c0_i32_0 : i32, i32
  }
  func.func @transform_1(%arg0: i32) -> (i32, i32) {
    %c0_i32 = arith.constant 0 : i32
    %c0_i32_0 = arith.constant 0 : i32
    return %c0_i32, %arg0 : i32, i32
  }
  func.func @transform_2(%arg0: i32) -> (i32, i32) {
    %c0_i32 = arith.constant 0 : i32
    %c0_i32_0 = arith.constant 0 : i32
    return %c0_i32, %arg0 : i32, i32
  }
}

module attributes {stable_mosaic.version = 11 : i64} {
  func.func @_fused_conv_mm_kernel(%arg0: i32, %arg1: memref<8x216xf32, #tpu.memory_space<vmem>>, %arg2: memref<216x8xf32, #tpu.memory_space<vmem>>, %arg3: memref<8x8xf32, #tpu.memory_space<vmem>>) attributes {dimension_semantics = [#tpu.dimension_semantics<parallel>], iteration_bounds = array<i64: 1>, scalar_prefetch = 0 : i64, scratch_operands = 0 : i64, tpu.core_type = #tpu.core_type<tc>, window_params = [{pipeline_mode = #tpu.pipeline_mode<synchronous>, transform_indices = @transform_0, window_bounds = array<i64: 8, 216>}, {transform_indices = @transform_1, window_bounds = array<i64: 216, 8>}, {transform_indices = @transform_2, window_bounds = array<i64: 8, 8>}]} {
    %c0 = arith.constant 0 : index
    %c0_0 = arith.constant 0 : index
    %0 = vector.load %arg2[%c0, %c0_0] : memref<216x8xf32, #tpu.memory_space<vmem>>, vector<216x8xf32>
    %cst = arith.constant 0.000000e+00 : f32
    %1 = vector.broadcast %cst : f32 to vector<216x8xf32>
    %2 = arith.cmpf oge, %0, %1 : vector<216x8xf32>
    %cst_1 = arith.constant 2.000000e-01 : f32
    %3 = vector.broadcast %cst_1 : f32 to vector<216x8xf32>
    %4 = arith.mulf %3, %0 : vector<216x8xf32>
    %5 = arith.select %2, %0, %4 : vector<216x8xi1>, vector<216x8xf32>
    %c0_2 = arith.constant 0 : index
    %c0_3 = arith.constant 0 : index
    %6 = vector.load %arg1[%c0_2, %c0_3] : memref<8x216xf32, #tpu.memory_space<vmem>>, vector<8x216xf32>
    %cst_4 = arith.constant dense<0.000000e+00> : vector<8x8xf32>
    %7 = tpu.matmul %6, %5, %cst_4 {dimension_numbers = #tpu.dot_dimension_numbers<[1], [0], [0], [1], [0, 0, 1, 1], [], []>} : vector<8x216xf32>, vector<216x8xf32>, vector<8x8xf32> -> vector<8x8xf32>
    %c0_5 = arith.constant 0 : index
    %c0_6 = arith.constant 0 : index
    %8 = vector.load %arg3[%c0_5, %c0_6] : memref<8x8xf32, #tpu.memory_space<vmem>>, vector<8x8xf32>
    tpu.vector_store %arg3[%c0_5, %c0_6], %7 {strides = array<i32>} : memref<8x8xf32, #tpu.memory_space<vmem>>, vector<8x8xf32>,
    return
  }
  func.func @transform_0(%arg0: i32) -> (i32, i32) {
    %c0_i32 = arith.constant 0 : i32
    %c0_i32_0 = arith.constant 0 : i32
    %c0_i32_1 = arith.constant 0 : i32
    return %c0_i32, %c0_i32_0 : i32, i32
  }
  func.func @transform_1(%arg0: i32) -> (i32, i32) {
    %c0_i32 = arith.constant 0 : i32
    %c0_i32_0 = arith.constant 0 : i32
    return %c0_i32, %arg0 : i32, i32
  }
  func.func @transform_2(%arg0: i32) -> (i32, i32) {
    %c0_i32 = arith.constant 0 : i32
    %c0_i32_0 = arith.constant 0 : i32
    return %c0_i32, %arg0 : i32, i32
  }
}

module attributes {stable_mosaic.version = 11 : i64} {
  func.func @_fused_conv_mm_kernel(%arg0: i32, %arg1: memref<64x8xf32, #tpu.memory_space<vmem>>, %arg2: memref<8x8xf32, #tpu.memory_space<vmem>>, %arg3: memref<64x8xf32, #tpu.memory_space<vmem>>) attributes {dimension_semantics = [#tpu.dimension_semantics<parallel>], iteration_bounds = array<i64: 1>, scalar_prefetch = 0 : i64, scratch_operands = 0 : i64, tpu.core_type = #tpu.core_type<tc>, window_params = [{pipeline_mode = #tpu.pipeline_mode<synchronous>, transform_indices = @transform_0, window_bounds = array<i64: 64, 8>}, {transform_indices = @transform_1, window_bounds = array<i64: 8, 8>}, {transform_indices = @transform_2, window_bounds = array<i64: 64, 8>}]} {
    %c0 = arith.constant 0 : index
    %c0_0 = arith.constant 0 : index
    %0 = vector.load %arg2[%c0, %c0_0] : memref<8x8xf32, #tpu.memory_space<vmem>>, vector<8x8xf32>
    %c0_1 = arith.constant 0 : index
    %c0_2 = arith.constant 0 : index
    %1 = vector.load %arg1[%c0_1, %c0_2] : memref<64x8xf32, #tpu.memory_space<vmem>>, vector<64x8xf32>
    %cst = arith.constant dense<0.000000e+00> : vector<64x8xf32>
    %2 = tpu.matmul %1, %0, %cst {dimension_numbers = #tpu.dot_dimension_numbers<[1], [0], [0], [1], [0, 0, 1, 1], [], []>} : vector<64x8xf32>, vector<8x8xf32>, vector<64x8xf32> -> vector<64x8xf32>
    %c0_3 = arith.constant 0 : index
    %c0_4 = arith.constant 0 : index
    %3 = vector.load %arg3[%c0_3, %c0_4] : memref<64x8xf32, #tpu.memory_space<vmem>>, vector<64x8xf32>
    tpu.vector_store %arg3[%c0_3, %c0_4], %2 {strides = array<i32>} : memref<64x8xf32, #tpu.memory_space<vmem>>, vector<64x8xf32>,
    return
  }
  func.func @transform_0(%arg0: i32) -> (i32, i32) {
    %c0_i32 = arith.constant 0 : i32
    %c0_i32_0 = arith.constant 0 : i32
    %c0_i32_1 = arith.constant 0 : i32
    return %c0_i32, %c0_i32_0 : i32, i32
  }
  func.func @transform_1(%arg0: i32) -> (i32, i32) {
    %c0_i32 = arith.constant 0 : i32
    %c0_i32_0 = arith.constant 0 : i32
    return %c0_i32, %arg0 : i32, i32
  }
  func.func @transform_2(%arg0: i32) -> (i32, i32) {
    %c0_i32 = arith.constant 0 : i32
    %c0_i32_0 = arith.constant 0 : i32
    return %c0_i32, %arg0 : i32, i32
  }
}

module attributes {stable_mosaic.version = 11 : i64} {
  func.func @_fused_conv_mm_kernel(%arg0: i32, %arg1: memref<8x216xf32, #tpu.memory_space<vmem>>, %arg2: memref<216x8xf32, #tpu.memory_space<vmem>>, %arg3: memref<8x8xf32, #tpu.memory_space<vmem>>, %arg4: memref<8x8xf32, #tpu.memory_space<vmem>>) attributes {dimension_semantics = [#tpu.dimension_semantics<parallel>], iteration_bounds = array<i64: 1>, scalar_prefetch = 0 : i64, scratch_operands = 0 : i64, tpu.core_type = #tpu.core_type<tc>, window_params = [{pipeline_mode = #tpu.pipeline_mode<synchronous>, transform_indices = @transform_0, window_bounds = array<i64: 8, 216>}, {transform_indices = @transform_1, window_bounds = array<i64: 216, 8>}, {transform_indices = @transform_2, window_bounds = array<i64: 8, 8>}, {transform_indices = @transform_3, window_bounds = array<i64: 8, 8>}]} {
    %c0 = arith.constant 0 : index
    %c0_0 = arith.constant 0 : index
    %0 = vector.load %arg2[%c0, %c0_0] : memref<216x8xf32, #tpu.memory_space<vmem>>, vector<216x8xf32>
    %cst = arith.constant 0.000000e+00 : f32
    %1 = vector.broadcast %cst : f32 to vector<216x8xf32>
    %2 = arith.cmpf oge, %0, %1 : vector<216x8xf32>
    %cst_1 = arith.constant 2.000000e-01 : f32
    %3 = vector.broadcast %cst_1 : f32 to vector<216x8xf32>
    %4 = arith.mulf %3, %0 : vector<216x8xf32>
    %5 = arith.select %2, %0, %4 : vector<216x8xi1>, vector<216x8xf32>
    %c0_2 = arith.constant 0 : index
    %c0_3 = arith.constant 0 : index
    %6 = vector.load %arg1[%c0_2, %c0_3] : memref<8x216xf32, #tpu.memory_space<vmem>>, vector<8x216xf32>
    %cst_4 = arith.constant dense<0.000000e+00> : vector<8x8xf32>
    %7 = tpu.matmul %6, %5, %cst_4 {dimension_numbers = #tpu.dot_dimension_numbers<[1], [0], [0], [1], [0, 0, 1, 1], [], []>} : vector<8x216xf32>, vector<216x8xf32>, vector<8x8xf32> -> vector<8x8xf32>
    %c0_5 = arith.constant 0 : index
    %c0_6 = arith.constant 0 : index
    %8 = vector.load %arg3[%c0_5, %c0_6] : memref<8x8xf32, #tpu.memory_space<vmem>>, vector<8x8xf32>
    %9 = arith.addf %7, %8 : vector<8x8xf32>
    %cst_7 = arith.constant 0.000000e+00 : f32
    %10 = vector.broadcast %cst_7 : f32 to vector<8x8xf32>
    %11 = arith.cmpf oge, %9, %10 : vector<8x8xf32>
    %cst_8 = arith.constant 2.000000e-01 : f32
    %12 = vector.broadcast %cst_8 : f32 to vector<8x8xf32>
    %13 = arith.mulf %12, %9 : vector<8x8xf32>
    %14 = arith.select %11, %9, %13 : vector<8x8xi1>, vector<8x8xf32>
    %c0_9 = arith.constant 0 : index
    %c0_10 = arith.constant 0 : index
    %15 = vector.load %arg4[%c0_9, %c0_10] : memref<8x8xf32, #tpu.memory_space<vmem>>, vector<8x8xf32>
    tpu.vector_store %arg4[%c0_9, %c0_10], %14 {strides = array<i32>} : memref<8x8xf32, #tpu.memory_space<vmem>>, vector<8x8xf32>,
    return
  }
  func.func @transform_0(%arg0: i32) -> (i32, i32) {
    %c0_i32 = arith.constant 0 : i32
    %c0_i32_0 = arith.constant 0 : i32
    %c0_i32_1 = arith.constant 0 : i32
    return %c0_i32, %c0_i32_0 : i32, i32
  }
  func.func @transform_1(%arg0: i32) -> (i32, i32) {
    %c0_i32 = arith.constant 0 : i32
    %c0_i32_0 = arith.constant 0 : i32
    return %c0_i32, %arg0 : i32, i32
  }
  func.func @transform_2(%arg0: i32) -> (i32, i32) {
    %c0_i32 = arith.constant 0 : i32
    %c0_i32_0 = arith.constant 0 : i32
    return %c0_i32, %arg0 : i32, i32
  }
  func.func @transform_3(%arg0: i32) -> (i32, i32) {
    %c0_i32 = arith.constant 0 : i32
    %c0_i32_0 = arith.constant 0 : i32
    return %c0_i32, %arg0 : i32, i32
  }
}

module attributes {stable_mosaic.version = 11 : i64} {
  func.func @_fused_conv_mm_kernel(%arg0: i32, %arg1: memref<64x8xf32, #tpu.memory_space<vmem>>, %arg2: memref<8x64xf32, #tpu.memory_space<vmem>>, %arg3: memref<64x64xf32, #tpu.memory_space<vmem>>) attributes {dimension_semantics = [#tpu.dimension_semantics<parallel>], iteration_bounds = array<i64: 1>, scalar_prefetch = 0 : i64, scratch_operands = 0 : i64, tpu.core_type = #tpu.core_type<tc>, window_params = [{pipeline_mode = #tpu.pipeline_mode<synchronous>, transform_indices = @transform_0, window_bounds = array<i64: 64, 8>}, {transform_indices = @transform_1, window_bounds = array<i64: 8, 64>}, {transform_indices = @transform_2, window_bounds = array<i64: 64, 64>}]} {
    %c0 = arith.constant 0 : index
    %c0_0 = arith.constant 0 : index
    %0 = vector.load %arg2[%c0, %c0_0] : memref<8x64xf32, #tpu.memory_space<vmem>>, vector<8x64xf32>
    %c0_1 = arith.constant 0 : index
    %c0_2 = arith.constant 0 : index
    %1 = vector.load %arg1[%c0_1, %c0_2] : memref<64x8xf32, #tpu.memory_space<vmem>>, vector<64x8xf32>
    %cst = arith.constant dense<0.000000e+00> : vector<64x64xf32>
    %2 = tpu.matmul %1, %0, %cst {dimension_numbers = #tpu.dot_dimension_numbers<[1], [0], [0], [1], [0, 0, 1, 1], [], []>} : vector<64x8xf32>, vector<8x64xf32>, vector<64x64xf32> -> vector<64x64xf32>
    %c0_3 = arith.constant 0 : index
    %c0_4 = arith.constant 0 : index
    %3 = vector.load %arg3[%c0_3, %c0_4] : memref<64x64xf32, #tpu.memory_space<vmem>>, vector<64x64xf32>
    tpu.vector_store %arg3[%c0_3, %c0_4], %2 {strides = array<i32>} : memref<64x64xf32, #tpu.memory_space<vmem>>, vector<64x64xf32>,
    return
  }
  func.func @transform_0(%arg0: i32) -> (i32, i32) {
    %c0_i32 = arith.constant 0 : i32
    %c0_i32_0 = arith.constant 0 : i32
    %c0_i32_1 = arith.constant 0 : i32
    return %c0_i32, %c0_i32_0 : i32, i32
  }
  func.func @transform_1(%arg0: i32) -> (i32, i32) {
    %c0_i32 = arith.constant 0 : i32
    %c0_i32_0 = arith.constant 0 : i32
    return %c0_i32, %arg0 : i32, i32
  }
  func.func @transform_2(%arg0: i32) -> (i32, i32) {
    %c0_i32 = arith.constant 0 : i32
    %c0_i32_0 = arith.constant 0 : i32
    return %c0_i32, %arg0 : i32, i32
  }
}

module attributes {stable_mosaic.version = 11 : i64} {
  func.func @_fused_conv_mm_kernel(%arg0: i32, %arg1: memref<8x216xf32, #tpu.memory_space<vmem>>, %arg2: memref<216x512xf32, #tpu.memory_space<vmem>>, %arg3: memref<8x512xf32, #tpu.memory_space<vmem>>) attributes {dimension_semantics = [#tpu.dimension_semantics<parallel>], iteration_bounds = array<i64: 1>, scalar_prefetch = 0 : i64, scratch_operands = 0 : i64, tpu.core_type = #tpu.core_type<tc>, window_params = [{pipeline_mode = #tpu.pipeline_mode<synchronous>, transform_indices = @transform_0, window_bounds = array<i64: 8, 216>}, {transform_indices = @transform_1, window_bounds = array<i64: 216, 512>}, {transform_indices = @transform_2, window_bounds = array<i64: 8, 512>}]} {
    %c0 = arith.constant 0 : index
    %c0_0 = arith.constant 0 : index
    %0 = vector.load %arg2[%c0, %c0_0] : memref<216x512xf32, #tpu.memory_space<vmem>>, vector<216x512xf32>
    %c0_1 = arith.constant 0 : index
    %c0_2 = arith.constant 0 : index
    %1 = vector.load %arg1[%c0_1, %c0_2] : memref<8x216xf32, #tpu.memory_space<vmem>>, vector<8x216xf32>
    %cst = arith.constant dense<0.000000e+00> : vector<8x512xf32>
    %2 = tpu.matmul %1, %0, %cst {dimension_numbers = #tpu.dot_dimension_numbers<[1], [0], [0], [1], [0, 0, 1, 1], [], []>} : vector<8x216xf32>, vector<216x512xf32>, vector<8x512xf32> -> vector<8x512xf32>
    %c0_3 = arith.constant 0 : index
    %c0_4 = arith.constant 0 : index
    %3 = vector.load %arg3[%c0_3, %c0_4] : memref<8x512xf32, #tpu.memory_space<vmem>>, vector<8x512xf32>
    tpu.vector_store %arg3[%c0_3, %c0_4], %2 {strides = array<i32>} : memref<8x512xf32, #tpu.memory_space<vmem>>, vector<8x512xf32>,
    return
  }
  func.func @transform_0(%arg0: i32) -> (i32, i32) {
    %c0_i32 = arith.constant 0 : i32
    %c0_i32_0 = arith.constant 0 : i32
    %c0_i32_1 = arith.constant 0 : i32
    return %c0_i32, %c0_i32_0 : i32, i32
  }
  func.func @transform_1(%arg0: i32) -> (i32, i32) {
    %c0_i32 = arith.constant 0 : i32
    %c0_i32_0 = arith.constant 0 : i32
    return %c0_i32, %arg0 : i32, i32
  }
  func.func @transform_2(%arg0: i32) -> (i32, i32) {
    %c0_i32 = arith.constant 0 : i32
    %c0_i32_0 = arith.constant 0 : i32
    return %c0_i32, %arg0 : i32, i32
  }
}

module attributes {stable_mosaic.version = 11 : i64} {
  func.func @_fused_conv_mm_kernel(%arg0: i32, %arg1: memref<8x432xf32, #tpu.memory_space<vmem>>, %arg2: memref<432x512xf32, #tpu.memory_space<vmem>>, %arg3: memref<8x512xf32, #tpu.memory_space<vmem>>) attributes {dimension_semantics = [#tpu.dimension_semantics<parallel>], iteration_bounds = array<i64: 1>, scalar_prefetch = 0 : i64, scratch_operands = 0 : i64, tpu.core_type = #tpu.core_type<tc>, window_params = [{pipeline_mode = #tpu.pipeline_mode<synchronous>, transform_indices = @transform_0, window_bounds = array<i64: 8, 432>}, {transform_indices = @transform_1, window_bounds = array<i64: 432, 512>}, {transform_indices = @transform_2, window_bounds = array<i64: 8, 512>}]} {
    %c0 = arith.constant 0 : index
    %c0_0 = arith.constant 0 : index
    %0 = vector.load %arg2[%c0, %c0_0] : memref<432x512xf32, #tpu.memory_space<vmem>>, vector<432x512xf32>
    %c0_1 = arith.constant 0 : index
    %c0_2 = arith.constant 0 : index
    %1 = vector.load %arg1[%c0_1, %c0_2] : memref<8x432xf32, #tpu.memory_space<vmem>>, vector<8x432xf32>
    %cst = arith.constant dense<0.000000e+00> : vector<8x512xf32>
    %2 = tpu.matmul %1, %0, %cst {dimension_numbers = #tpu.dot_dimension_numbers<[1], [0], [0], [1], [0, 0, 1, 1], [], []>} : vector<8x432xf32>, vector<432x512xf32>, vector<8x512xf32> -> vector<8x512xf32>
    %cst_3 = arith.constant 0.000000e+00 : f32
    %3 = vector.broadcast %cst_3 : f32 to vector<8x512xf32>
    %4 = arith.cmpf oge, %2, %3 : vector<8x512xf32>
    %cst_4 = arith.constant 2.000000e-01 : f32
    %5 = vector.broadcast %cst_4 : f32 to vector<8x512xf32>
    %6 = arith.mulf %5, %2 : vector<8x512xf32>
    %7 = arith.select %4, %2, %6 : vector<8x512xi1>, vector<8x512xf32>
    %c0_5 = arith.constant 0 : index
    %c0_6 = arith.constant 0 : index
    %8 = vector.load %arg3[%c0_5, %c0_6] : memref<8x512xf32, #tpu.memory_space<vmem>>, vector<8x512xf32>
    tpu.vector_store %arg3[%c0_5, %c0_6], %7 {strides = array<i32>} : memref<8x512xf32, #tpu.memory_space<vmem>>, vector<8x512xf32>,
    return
  }
  func.func @transform_0(%arg0: i32) -> (i32, i32) {
    %c0_i32 = arith.constant 0 : i32
    %c0_i32_0 = arith.constant 0 : i32
    %c0_i32_1 = arith.constant 0 : i32
    return %c0_i32, %c0_i32_0 : i32, i32
  }
  func.func @transform_1(%arg0: i32) -> (i32, i32) {
    %c0_i32 = arith.constant 0 : i32
    %c0_i32_0 = arith.constant 0 : i32
    return %c0_i32, %arg0 : i32, i32
  }
  func.func @transform_2(%arg0: i32) -> (i32, i32) {
    %c0_i32 = arith.constant 0 : i32
    %c0_i32_0 = arith.constant 0 : i32
    return %c0_i32, %arg0 : i32, i32
  }
}

module attributes {stable_mosaic.version = 11 : i64} {
  func.func @_fused_conv_mm_kernel(%arg0: i32, %arg1: memref<3x216xf32, #tpu.memory_space<vmem>>, %arg2: memref<216x512xf32, #tpu.memory_space<vmem>>, %arg3: memref<3x512xf32, #tpu.memory_space<vmem>>) attributes {dimension_semantics = [#tpu.dimension_semantics<parallel>], iteration_bounds = array<i64: 1>, scalar_prefetch = 0 : i64, scratch_operands = 0 : i64, tpu.core_type = #tpu.core_type<tc>, window_params = [{pipeline_mode = #tpu.pipeline_mode<synchronous>, transform_indices = @transform_0, window_bounds = array<i64: 3, 216>}, {transform_indices = @transform_1, window_bounds = array<i64: 216, 512>}, {transform_indices = @transform_2, window_bounds = array<i64: 3, 512>}]} {
    %c0 = arith.constant 0 : index
    %c0_0 = arith.constant 0 : index
    %0 = vector.load %arg2[%c0, %c0_0] : memref<216x512xf32, #tpu.memory_space<vmem>>, vector<216x512xf32>
    %c0_1 = arith.constant 0 : index
    %c0_2 = arith.constant 0 : index
    %1 = vector.load %arg1[%c0_1, %c0_2] : memref<3x216xf32, #tpu.memory_space<vmem>>, vector<3x216xf32>
    %cst = arith.constant dense<0.000000e+00> : vector<3x512xf32>
    %2 = tpu.matmul %1, %0, %cst {dimension_numbers = #tpu.dot_dimension_numbers<[1], [0], [0], [1], [0, 0, 1, 1], [], []>} : vector<3x216xf32>, vector<216x512xf32>, vector<3x512xf32> -> vector<3x512xf32>
    %3 = math.absf %2 : vector<3x512xf32>
    %cst_3 = arith.constant 1.000000e+00 : f32
    %4 = vector.broadcast %cst_3 : f32 to vector<3x512xf32>
    %5 = arith.addf %4, %3 : vector<3x512xf32>
    %6 = arith.divf %2, %5 : vector<3x512xf32>
    %cst_4 = arith.constant 4.000000e-01 : f32
    %7 = vector.broadcast %cst_4 : f32 to vector<3x512xf32>
    %8 = arith.mulf %6, %7 : vector<3x512xf32>
    %c0_5 = arith.constant 0 : index
    %c0_6 = arith.constant 0 : index
    %9 = vector.load %arg3[%c0_5, %c0_6] : memref<3x512xf32, #tpu.memory_space<vmem>>, vector<3x512xf32>
    tpu.vector_store %arg3[%c0_5, %c0_6], %8 {strides = array<i32>} : memref<3x512xf32, #tpu.memory_space<vmem>>, vector<3x512xf32>,
    return
  }
  func.func @transform_0(%arg0: i32) -> (i32, i32) {
    %c0_i32 = arith.constant 0 : i32
    %c0_i32_0 = arith.constant 0 : i32
    %c0_i32_1 = arith.constant 0 : i32
    return %c0_i32, %c0_i32_0 : i32, i32
  }
  func.func @transform_1(%arg0: i32) -> (i32, i32) {
    %c0_i32 = arith.constant 0 : i32
    %c0_i32_0 = arith.constant 0 : i32
    return %c0_i32, %arg0 : i32, i32
  }
  func.func @transform_2(%arg0: i32) -> (i32, i32) {
    %c0_i32 = arith.constant 0 : i32
    %c0_i32_0 = arith.constant 0 : i32
    return %c0_i32, %arg0 : i32, i32
  }
}

</mosaic_0001>

<bundles_post_ra>
// kernel: wavlet_forward.20
= control target key start
LH: loop header
LB: loop body
LE: loop exit
PB: predicated region body
PF: predicated region fallthrough
CT: control target
= control target key end

     0   :  { %v149_v0 = vmov 0.0|0.0   ;;  %vm150_vm0 = vmmov 0   ;;  %v151_v4 = vmov 0.0   ;;  %vm23_vm1 = vcmask 1045504   ;;  %s194_s1 = inlined_call_operand.vmem [shape: f32[54,64], index: 1, kind: input, shape index: {}]   ;;  %s195_s0 = inlined_call_operand.vmem [shape: f32[3,54], index: 0, kind: input, shape index: {}]   ;;  %s196_s2 = inlined_call_operand.vmem [shape: f32[3,64], index: 2, kind: output, shape index: {}]  }
   0x1   :  { %135 = vmatprep.subr.bf16.mxu0 %v149_v0  ;;  %v11_v1 = vld [vmem:[%s194_s1] sm:$0xff]  ;;  %v12_v2 = vld [vmem:[%s194_s1 + $0x8] sm:$0xff]  ;;  %v13_v3 = vld [vmem:[%s194_s1 + $0x10] sm:$0xff]  ;;  %132 = vmatprep.mubr.msk.f32.mxu0 %vm150_vm0, %v151_v4  ;;  %vm19_vm2 = vcmask 441344   ;;  %vm102_vm3 = vcmask 518144  }
   0x2   :  { %v136_v5 = vpack.c.bf16 %v12_v2, %v11_v1  ;;  %v14_v6 = vld [vmem:[%s194_s1 + $0x18] sm:$0xff]  ;;  %v15_v8 = vld [vmem:[%s194_s1 + $0x20] sm:$0xff]  ;;  %v16_v9 = vld [vmem:[%s194_s1 + $0x28] sm:$0xff] }
   0x3   :  { %v139_v7 = vpack.c.bf16 %v14_v6, %v13_v3  ;;  %v142_v10 = vpack.c.bf16 %v16_v9, %v15_v8  ;;  %v17_v11 = vld [vmem:[%s194_s1 + $0x30] sm:$0x3f]  ;;  %v18_v12 = vld [vmem:[%s195_s0] sm:$0x7] }
   0x4   :  { %137 = vmatpush3.bf16.msra.mxu0 %v136_v5 }
   0x5   :  { %138 = vmatprep.subr.bf16.mxu0 %v149_v0 }
   0x8   :  { %140 = vmatpush3.bf16.msra.mxu0 %v139_v7 }
   0x9   :  { %141 = vmatprep.subr.bf16.mxu0 %v149_v0 }
   0xc   :  { %143 = vmatpush3.bf16.msra.mxu0 %v142_v10 }
   0xd   :  { %130 = vmatprep.subr.mxu0 %v151_v4 }
  0x10   :  { %131 = vmatpush3.msk.msra.mxu0 %vm23_vm1, %v17_v11 }
  0x11   :  { %133 = vmatmul.mubr.msk.f32.vlgmr.msra.gmra.mrb[0].mxu0 %vm19_vm2, %v18_v12 }
  0xe4   :  { %v93_v13 = vpop.f32.mrb[0].mxu0 }
  0xe5   :  { %v97_v14 = vand.u32 2147483647, %v93_v13  ;;  %v134_v15 = vpop.f32.mrb[1].mxu0 }
  0xe7   :  { %v98_v16 = vadd.f32 1.0, %v97_v14 }
  0xe9   :  { %147 = vrcp.f32 %v98_v16 }
  0xf3   :  { %v148_v17 = vpop.eup %147 }
  0xf4   :  { %v100_v18 = vmul.f32 %v148_v17, %v93_v13 }
  0xf6   :  { %v101_v19 = vmul.f32 0.4, %v100_v18 }
  0xf8   :  { %103 = vst.msk [vmem:[%s196_s2] sm:$0x7] %vm102_vm3, %v101_v19 }

// kernel: wavlet_forward.22
= control target key start
LH: loop header
LB: loop body
LE: loop exit
PB: predicated region body
PF: predicated region fallthrough
CT: control target
= control target key end

     0   :  { %v244_v3 = vmov 0.0   ;;  %vm44_vm0 = vcmask 1045504   ;;  %vm40_vm1 = vcmask 441344   ;;  %s353_s1 = inlined_call_operand.vmem [shape: f32[54,512], index: 1, kind: input, shape index: {}]   ;;  %s354_s0 = inlined_call_operand.vmem [shape: f32[4,54], index: 0, kind: input, shape index: {}]   ;;  %s355_s2 = inlined_call_operand.vmem [shape: f32[4,512], index: 2, kind: output, shape index: {}]  }
   0x1   :  { %v12_v0 = vld [vmem:[%s353_s1 + $0x8] sm:$0xff]  ;;  %v14_v2 = vld [vmem:[%s353_s1 + $0x18] sm:$0xff]  ;;  %121 = vmatprep.mubr.f32.mxu0 %v244_v3  ;;  %192 = vmatprep.mubr.f32.mxu1 %v244_v3  ;;  %v11_v6 = vld [vmem:[%s353_s1] sm:$0xff] }
   0x2   :  { %v16_v1 = vld [vmem:[%s353_s1 + $0x28] sm:$0xff]  ;;  %v18_v5 = vld [vmem:[%s353_s1 + $0x38] sm:$0xff]  ;;  %v15_v7 = vld [vmem:[%s353_s1 + $0x20] sm:$0xff] }
   0x3   :  { %v219_v4 = vpack.c.bf16 %v16_v1, %v12_v0  ;;  %v231_v8 = vpack.c.bf16 %v18_v5, %v14_v2  ;;  %v221_v9 = vpack.c.bf16 %v15_v7, %v11_v6  ;;  %v13_v10 = vld [vmem:[%s353_s1 + $0x10] sm:$0xff]  ;;  %v20_v12 = vld [vmem:[%s353_s1 + $0x48] sm:$0xff]  ;;  %v22_v15 = vld [vmem:[%s353_s1 + $0x58] sm:$0xff] }
   0x4   :  { %v17_v11 = vld [vmem:[%s353_s1 + $0x30] sm:$0xff]  ;;  %v24_v14 = vld [vmem:[%s353_s1 + $0x68] sm:$0xff]  ;;  %v26_v16 = vld [vmem:[%s353_s1 + $0x78] sm:$0xff] }
   0x5   :  { %220 = vmatprep.subr.bf16.mxu0 %v219_v4  ;;  %v233_v13 = vpack.c.bf16 %v17_v11, %v13_v10  ;;  %232 = vmatprep.subr.bf16.mxu1 %v231_v8  ;;  %v223_v17 = vpack.c.bf16 %v24_v14, %v20_v12  ;;  %v235_v18 = vpack.c.bf16 %v26_v16, %v22_v15  ;;  %v19_v19 = vld [vmem:[%s353_s1 + $0x40] sm:$0xff]  ;;  %v21_v21 = vld [vmem:[%s353_s1 + $0x50] sm:$0xff]  ;;  %v28_v24 = vld [vmem:[%s353_s1 + $0x88] sm:$0xff] }
   0x6   :  { %222 = vmatpush1.bf16.msra.mxu0 %v221_v9  ;;  %v23_v20 = vld [vmem:[%s353_s1 + $0x60] sm:$0xff]  ;;  %v25_v23 = vld [vmem:[%s353_s1 + $0x70] sm:$0xff]  ;;  %v32_v25 = vld [vmem:[%s353_s1 + $0xa8] sm:$0xff] }
   0x7   :  { %234 = vmatpush1.bf16.msra.mxu1 %v233_v13  ;;  %v225_v22 = vpack.c.bf16 %v23_v20, %v19_v19  ;;  %224 = vmatprep.subr.bf16.mxu0 %v223_v17  ;;  %v237_v26 = vpack.c.bf16 %v25_v23, %v21_v21  ;;  %v227_v27 = vpack.c.bf16 %v32_v25, %v28_v24  ;;  %v30_v28 = vld [vmem:[%s353_s1 + $0x98] sm:$0xff]  ;;  %v27_v30 = vld [vmem:[%s353_s1 + $0x80] sm:$0xff]  ;;  %v29_v33 = vld [vmem:[%s353_s1 + $0x90] sm:$0xff] }
   0x8   :  { %236 = vmatprep.subr.bf16.mxu1 %v235_v18  ;;  %v34_v29 = vld [vmem:[%s353_s1 + $0xb8] sm:$0xff]  ;;  %v31_v32 = vld [vmem:[%s353_s1 + $0xa0] sm:$0xff]  ;;  %v33_v34 = vld [vmem:[%s353_s1 + $0xb0] sm:$0xff] }
   0x9   :  { %v239_v31 = vpack.c.bf16 %v34_v29, %v30_v28  ;;  %v229_v35 = vpack.c.bf16 %v31_v32, %v27_v30  ;;  %v241_v36 = vpack.c.bf16 %v33_v34, %v29_v33  ;;  %v36_v37 = vld [vmem:[%s353_s1 + $0xc8] sm:$0x3f]  ;;  %v38_v38 = vld [vmem:[%s353_s1 + $0xd8] sm:$0x3f]  ;;  %v35_v39 = vld [vmem:[%s353_s1 + $0xc0] sm:$0x3f] }
   0xa   :  { %226 = vmatpush1.bf16.msra.mxu0 %v225_v22  ;;  %v37_v40 = vld [vmem:[%s353_s1 + $0xd0] sm:$0x3f]  ;;  %v39_v41 = vld [vmem:[%s354_s0] sm:$0xf] }
   0xb   :  { %238 = vmatpush1.bf16.msra.mxu1 %v237_v26  ;;  %228 = vmatprep.subr.bf16.mxu0 %v227_v27 }
   0xc   :  { %240 = vmatprep.subr.bf16.mxu1 %v239_v31 }
   0xe   :  { %230 = vmatpush1.bf16.msra.mxu0 %v229_v35 }
   0xf   :  { %242 = vmatpush1.bf16.msra.mxu1 %v241_v36  ;;  %213 = vmatprep.subr.msk.mxu0 %vm44_vm0, %v36_v37 }
  0x10   :  { %216 = vmatprep.subr.msk.mxu1 %vm44_vm0, %v38_v38 }
  0x12   :  { %214 = vmatpush1.msk.msra.mxu0 %vm44_vm0, %v35_v39 }
  0x13   :  { %217 = vmatpush1.msk.msra.mxu1 %vm44_vm0, %v37_v40  ;;  %215 = vmatmul.mubr.msk.f32.vlgmr.msra.gmra.mrb[0].mxu0 %vm40_vm1, %v39_v41 }
  0x14   :  { %218 = vmatmul.mubr.msk.f32.vlgmr.msra.gmra.mrb[0].mxu1 %vm40_vm1, %v39_v41 }
  0xe6   :  { %v123_v42 = vpop.f32.mrb[0].mxu0 }
  0xe7   :  { %v194_v43 = vpop.f32.mrb[0].mxu1  ;;  %v125_v44 = vpop.f32.mrb[1].mxu0 }
  0xe8   :  { %v203_v45 = vcombine.low %v123_v42, %v125_v44  ;;  %v196_v46 = vpop.f32.mrb[1].mxu1 }
  0xe9   :  { %v204_v47 = vcombine.low %v194_v43, %v196_v46 }
  0xea   :  { %207 = vst [vmem:[%s355_s2] sm:$0xff] %v203_v45 }
  0xeb   :  { %208 = vst [vmem:[%s355_s2 + $0x8] sm:$0xff] %v204_v47 }

// kernel: wavlet_forward.21
= control target key start
LH: loop header
LB: loop body
LE: loop exit
PB: predicated region body
PF: predicated region fallthrough
CT: control target
= control target key end

     0   :  { %vm82_vm0 = vcmask 56320   ;;  %vm85_vm1 = vcmask 1046528   ;;  %s553_s1 = inlined_call_operand.vmem [shape: f32[135,512], index: 1, kind: input, shape index: {}]   ;;  %s554_s0 = inlined_call_operand.vmem [shape: f32[4,135], index: 0, kind: input, shape index: {}]   ;;  %s555_s2 = inlined_call_operand.vmem [shape: f32[4,512], index: 2, kind: output, shape index: {}]  }
   0x1   :  { %v12_v0 = vld [vmem:[%s553_s1 + $0x8] sm:$0xff]  ;;  %v14_v2 = vld [vmem:[%s553_s1 + $0x18] sm:$0xff]  ;;  %v11_v5 = vld [vmem:[%s553_s1] sm:$0xff] }
   0x2   :  { %v16_v1 = vld [vmem:[%s553_s1 + $0x28] sm:$0xff]  ;;  %v18_v4 = vld [vmem:[%s553_s1 + $0x38] sm:$0xff]  ;;  %v15_v6 = vld [vmem:[%s553_s1 + $0x20] sm:$0xff] }
   0x3   :  { %v260_v3 = vpack.c.bf16 %v16_v1, %v12_v0  ;;  %v292_v7 = vpack.c.bf16 %v18_v4, %v14_v2  ;;  %v262_v8 = vpack.c.bf16 %v15_v6, %v11_v5  ;;  %v13_v9 = vld [vmem:[%s553_s1 + $0x10] sm:$0xff]  ;;  %v20_v11 = vld [vmem:[%s553_s1 + $0x48] sm:$0xff]  ;;  %v22_v14 = vld [vmem:[%s553_s1 + $0x58] sm:$0xff] }
   0x4   :  { %v17_v10 = vld [vmem:[%s553_s1 + $0x30] sm:$0xff]  ;;  %v24_v13 = vld [vmem:[%s553_s1 + $0x68] sm:$0xff]  ;;  %v26_v15 = vld [vmem:[%s553_s1 + $0x78] sm:$0xff] }
   0x5   :  { %261 = vmatprep.subr.bf16.mxu0 %v260_v3  ;;  %v294_v12 = vpack.c.bf16 %v17_v10, %v13_v9  ;;  %293 = vmatprep.subr.bf16.mxu1 %v292_v7  ;;  %v264_v16 = vpack.c.bf16 %v24_v13, %v20_v11  ;;  %v296_v17 = vpack.c.bf16 %v26_v15, %v22_v14  ;;  %v19_v18 = vld [vmem:[%s553_s1 + $0x40] sm:$0xff]  ;;  %v21_v20 = vld [vmem:[%s553_s1 + $0x50] sm:$0xff]  ;;  %v28_v23 = vld [vmem:[%s553_s1 + $0x88] sm:$0xff] }
   0x6   :  { %263 = vmatpush1.bf16.msra.mxu0 %v262_v8  ;;  %v23_v19 = vld [vmem:[%s553_s1 + $0x60] sm:$0xff]  ;;  %v25_v22 = vld [vmem:[%s553_s1 + $0x70] sm:$0xff]  ;;  %v32_v24 = vld [vmem:[%s553_s1 + $0xa8] sm:$0xff] }
   0x7   :  { %295 = vmatpush1.bf16.msra.mxu1 %v294_v12  ;;  %v266_v21 = vpack.c.bf16 %v23_v19, %v19_v18  ;;  %265 = vmatprep.subr.bf16.mxu0 %v264_v16  ;;  %v298_v25 = vpack.c.bf16 %v25_v22, %v21_v20  ;;  %v268_v26 = vpack.c.bf16 %v32_v24, %v28_v23  ;;  %v30_v27 = vld [vmem:[%s553_s1 + $0x98] sm:$0xff]  ;;  %v27_v29 = vld [vmem:[%s553_s1 + $0x80] sm:$0xff]  ;;  %v29_v32 = vld [vmem:[%s553_s1 + $0x90] sm:$0xff] }
   0x8   :  { %297 = vmatprep.subr.bf16.mxu1 %v296_v17  ;;  %v34_v28 = vld [vmem:[%s553_s1 + $0xb8] sm:$0xff]  ;;  %v31_v31 = vld [vmem:[%s553_s1 + $0xa0] sm:$0xff]  ;;  %v33_v33 = vld [vmem:[%s553_s1 + $0xb0] sm:$0xff] }
   0x9   :  { %v300_v30 = vpack.c.bf16 %v34_v28, %v30_v27  ;;  %v270_v34 = vpack.c.bf16 %v31_v31, %v27_v29  ;;  %v36_v35 = vld [vmem:[%s553_s1 + $0xc8] sm:$0xff]  ;;  %v38_v37 = vld [vmem:[%s553_s1 + $0xd8] sm:$0xff]  ;;  %v302_v38 = vpack.c.bf16 %v33_v33, %v29_v32  ;;  %v35_v41 = vld [vmem:[%s553_s1 + $0xc0] sm:$0xff] }
   0xa   :  { %267 = vmatpush1.bf16.msra.mxu0 %v266_v21  ;;  %v40_v36 = vld [vmem:[%s553_s1 + $0xe8] sm:$0xff]  ;;  %v42_v40 = vld [vmem:[%s553_s1 + $0xf8] sm:$0xff]  ;;  %v39_v42 = vld [vmem:[%s553_s1 + $0xe0] sm:$0xff] }
   0xb   :  { %299 = vmatpush1.bf16.msra.mxu1 %v298_v25  ;;  %269 = vmatprep.subr.bf16.mxu0 %v268_v26  ;;  %v272_v39 = vpack.c.bf16 %v40_v36, %v36_v35  ;;  %v304_v43 = vpack.c.bf16 %v42_v40, %v38_v37  ;;  %v37_v44 = vld [vmem:[%s553_s1 + $0xd0] sm:$0xff]  ;;  %v44_v46 = vld [vmem:[%s553_s1 + $0x108] sm:$0xff]  ;;  %v46_v48 = vld [vmem:[%s553_s1 + $0x118] sm:$0xff]  ;;  %v274_v50 = vpack.c.bf16 %v39_v42, %v35_v41 }
   0xc   :  { %301 = vmatprep.subr.bf16.mxu1 %v300_v30  ;;  %v41_v45 = vld [vmem:[%s553_s1 + $0xf0] sm:$0xff]  ;;  %v48_v47 = vld [vmem:[%s553_s1 + $0x128] sm:$0xff]  ;;  %v50_v49 = vld [vmem:[%s553_s1 + $0x138] sm:$0xff] }
   0xd   :  { %v306_v51 = vpack.c.bf16 %v41_v45, %v37_v44  ;;  %v276_v52 = vpack.c.bf16 %v48_v47, %v44_v46  ;;  %v43_v53 = vld [vmem:[%s553_s1 + $0x100] sm:$0xff]  ;;  %v45_v55 = vld [vmem:[%s553_s1 + $0x110] sm:$0xff]  ;;  %v308_v56 = vpack.c.bf16 %v50_v49, %v46_v48  ;;  %v52_v58 = vld [vmem:[%s553_s1 + $0x148] sm:$0xff] }
   0xe   :  { %271 = vmatpush1.bf16.msra.mxu0 %v270_v34  ;;  %v47_v54 = vld [vmem:[%s553_s1 + $0x120] sm:$0xff]  ;;  %v49_v57 = vld [vmem:[%s553_s1 + $0x130] sm:$0xff]  ;;  %v56_v59 = vld [vmem:[%s553_s1 + $0x168] sm:$0xff] }
   0xf   :  { %303 = vmatpush1.bf16.msra.mxu1 %v302_v38  ;;  %273 = vmatprep.subr.bf16.mxu0 %v272_v39  ;;  %v54_v60 = vld [vmem:[%s553_s1 + $0x158] sm:$0xff]  ;;  %v278_v62 = vpack.c.bf16 %v47_v54, %v43_v53  ;;  %v310_v63 = vpack.c.bf16 %v49_v57, %v45_v55  ;;  %v280_v0 = vpack.c.bf16 %v56_v59, %v52_v58  ;;  %v51_v1 = vld [vmem:[%s553_s1 + $0x140] sm:$0xff]  ;;  %v53_v3 = vld [vmem:[%s553_s1 + $0x150] sm:$0xff] }
  0x10   :  { %305 = vmatprep.subr.bf16.mxu1 %v304_v43  ;;  %v58_v61 = vld [vmem:[%s553_s1 + $0x178] sm:$0xff]  ;;  %v55_v2 = vld [vmem:[%s553_s1 + $0x160] sm:$0xff]  ;;  %v57_v5 = vld [vmem:[%s553_s1 + $0x170] sm:$0xff] }
  0x11   :  { %v312_v4 = vpack.c.bf16 %v58_v61, %v54_v60  ;;  %v60_v6 = vld [vmem:[%s553_s1 + $0x188] sm:$0xff]  ;;  %v62_v8 = vld [vmem:[%s553_s1 + $0x198] sm:$0xff]  ;;  %v282_v10 = vpack.c.bf16 %v55_v2, %v51_v1  ;;  %v59_v11 = vld [vmem:[%s553_s1 + $0x180] sm:$0xff]  ;;  %v314_v12 = vpack.c.bf16 %v57_v5, %v53_v3 }
  0x12   :  { %275 = vmatpush1.bf16.msra.mxu0 %v274_v50  ;;  %v64_v7 = vld [vmem:[%s553_s1 + $0x1a8] sm:$0xff]  ;;  %v66_v9 = vld [vmem:[%s553_s1 + $0x1b8] sm:$0xff]  ;;  %v63_v14 = vld [vmem:[%s553_s1 + $0x1a0] sm:$0xff] }
  0x13   :  { %307 = vmatpush1.bf16.msra.mxu1 %v306_v51  ;;  %277 = vmatprep.subr.bf16.mxu0 %v276_v52  ;;  %v284_v13 = vpack.c.bf16 %v64_v7, %v60_v6  ;;  %v61_v15 = vld [vmem:[%s553_s1 + $0x190] sm:$0xff]  ;;  %v316_v17 = vpack.c.bf16 %v66_v9, %v62_v8  ;;  %v68_v18 = vld [vmem:[%s553_s1 + $0x1c8] sm:$0xff]  ;;  %v79_v20 = vld [vmem:[%s554_s0] sm:$0xff]  ;;  %v286_v24 = vpack.c.bf16 %v63_v14, %v59_v11 }
  0x14   :  { %309 = vmatprep.subr.bf16.mxu1 %v308_v56  ;;  %v65_v16 = vld [vmem:[%s553_s1 + $0x1b0] sm:$0xff]  ;;  %v72_v19 = vld [vmem:[%s553_s1 + $0x1e8] sm:$0xff]  ;;  %v70_v21 = vld [vmem:[%s553_s1 + $0x1d8] sm:$0xff]  ;;  %v81_v23 = vcombine.high %v79_v20, %v79_v20 }
  0x15   :  { %v74_v22 = vld [vmem:[%s553_s1 + $0x1f8] sm:$0xff]  ;;  %v318_v25 = vpack.c.bf16 %v65_v16, %v61_v15  ;;  %v288_v26 = vpack.c.bf16 %v72_v19, %v68_v18  ;;  %v67_v27 = vld [vmem:[%s553_s1 + $0x1c0] sm:$0xff]  ;;  %v69_v30 = vld [vmem:[%s553_s1 + $0x1d0] sm:$0xff] }
  0x16   :  { %279 = vmatpush1.bf16.msra.mxu0 %v278_v62  ;;  %v71_v28 = vld [vmem:[%s553_s1 + $0x1e0] sm:$0xff]  ;;  %v320_v29 = vpack.c.bf16 %v74_v22, %v70_v21  ;;  %v73_v31 = vld [vmem:[%s553_s1 + $0x1f0] sm:$0xff]  ;;  %256 = vmatprep.mubr.msk.f32.mxu0 %vm82_vm0, %v81_v23  ;;  %v76_v34 = vld [vmem:[%s553_s1 + $0x208] sm:$0x7f] }
  0x17   :  { %311 = vmatpush1.bf16.msra.mxu1 %v310_v63  ;;  %281 = vmatprep.subr.bf16.mxu0 %v280_v0  ;;  %v290_v32 = vpack.c.bf16 %v71_v28, %v67_v27  ;;  %v322_v33 = vpack.c.bf16 %v73_v31, %v69_v30  ;;  %v78_v35 = vld [vmem:[%s553_s1 + $0x218] sm:$0x7f]  ;;  %v75_v36 = vld [vmem:[%s553_s1 + $0x200] sm:$0x7f]  ;;  %v77_v37 = vld [vmem:[%s553_s1 + $0x210] sm:$0x7f] }
  0x18   :  { %313 = vmatprep.subr.bf16.mxu1 %v312_v4  ;;  %259 = vmatprep.mubr.msk.f32.mxu1 %vm82_vm0, %v81_v23 }
  0x1a   :  { %283 = vmatpush1.bf16.msra.mxu0 %v282_v10 }
  0x1b   :  { %315 = vmatpush1.bf16.msra.mxu1 %v314_v12  ;;  %285 = vmatprep.subr.bf16.mxu0 %v284_v13 }
  0x1c   :  { %317 = vmatprep.subr.bf16.mxu1 %v316_v17 }
  0x1e   :  { %287 = vmatpush1.bf16.msra.mxu0 %v286_v24 }
  0x1f   :  { %319 = vmatpush1.bf16.msra.mxu1 %v318_v25  ;;  %289 = vmatprep.subr.bf16.mxu0 %v288_v26 }
  0x20   :  { %321 = vmatprep.subr.bf16.mxu1 %v320_v29 }
  0x22   :  { %291 = vmatpush1.bf16.msra.mxu0 %v290_v32 }
  0x23   :  { %323 = vmatpush1.bf16.msra.mxu1 %v322_v33  ;;  %254 = vmatprep.subr.msk.mxu0 %vm85_vm1, %v76_v34 }
  0x24   :  { %257 = vmatprep.subr.msk.mxu1 %vm85_vm1, %v78_v35 }
  0x26   :  { %255 = vmatpush1.msk.msra.mxu0 %vm85_vm1, %v75_v36 }
  0x27   :  { %258 = vmatpush1.msk.msra.mxu1 %vm85_vm1, %v77_v37  ;;  %163 = vmatmul.mubr.f32.vlgmr.msra.gmra.mrb[0].mxu0 %v79_v20 }
  0x28   :  { %234 = vmatmul.mubr.f32.vlgmr.msra.gmra.mrb[0].mxu1 %v79_v20 }
  0xfa   :  { %v164_v38 = vpop.f32.mrb[0].mxu0 }
  0xfb   :  { %v235_v39 = vpop.f32.mrb[0].mxu1  ;;  %v166_v40 = vpop.f32.mrb[1].mxu0 }
  0xfc   :  { %v244_v41 = vcombine.low %v164_v38, %v166_v40  ;;  %v237_v42 = vpop.f32.mrb[1].mxu1 }
  0xfd   :  { %v245_v43 = vcombine.low %v235_v39, %v237_v42 }
  0xfe   :  { %248 = vst [vmem:[%s555_s2] sm:$0xff] %v244_v41 }
  0xff   :  { %249 = vst [vmem:[%s555_s2 + $0x8] sm:$0xff] %v245_v43 }

// kernel: wavlet_forward.23
= control target key start
LH: loop header
LB: loop body
LE: loop exit
PB: predicated region body
PF: predicated region fallthrough
CT: control target
= control target key end

     0   :  { %s1106_s1 = inlined_call_operand.vmem [shape: f32[216,512], index: 1, kind: input, shape index: {}]   ;;  %s1107_s0 = inlined_call_operand.vmem [shape: f32[8,216], index: 0, kind: input, shape index: {}]   ;;  %s1108_s2 = inlined_call_operand.vmem [shape: f32[8,512], index: 2, kind: output, shape index: {}]  }
   0x1   :  { %v12_v0 = vld [vmem:[%s1106_s1 + $0x8] sm:$0xff]  ;;  %v14_v2 = vld [vmem:[%s1106_s1 + $0x18] sm:$0xff]  ;;  %v11_v7 = vld [vmem:[%s1106_s1] sm:$0xff] }
   0x2   :  { %v16_v1 = vld [vmem:[%s1106_s1 + $0x28] sm:$0xff]  ;;  %vm120_vm0 = vcmp.ge.f32.partialorder %v12_v0, 0.0  ;;  %v228_v3 = vmul.f32 0.2, %v12_v0  ;;  %v18_v5 = vld [vmem:[%s1106_s1 + $0x38] sm:$0xff]  ;;  %vm122_vm2 = vcmp.ge.f32.partialorder %v14_v2, 0.0 }
   0x3   :  { %vm124_vm1 = vcmp.ge.f32.partialorder %v16_v1, 0.0  ;;  %v232_v4 = vmul.f32 0.2, %v16_v1  ;;  %v230_v6 = vmul.f32 0.2, %v14_v2  ;;  %v15_v8 = vld [vmem:[%s1106_s1 + $0x20] sm:$0xff] }
   0x4   :  { %v336_v9 = vsel %vm120_vm0, %v12_v0, %v228_v3  ;;  %vm126_vm3 = vcmp.ge.f32.partialorder %v18_v5, 0.0  ;;  %v234_v11 = vmul.f32 0.2, %v18_v5  ;;  %v13_v12 = vld [vmem:[%s1106_s1 + $0x10] sm:$0xff]  ;;  %vm119_vm4 = vcmp.ge.f32.partialorder %v11_v7, 0.0  ;;  %v20_v16 = vld [vmem:[%s1106_s1 + $0x48] sm:$0xff] }
   0x5   :  { %v340_v10 = vsel %vm124_vm1, %v16_v1, %v232_v4  ;;  %v17_v13 = vld [vmem:[%s1106_s1 + $0x30] sm:$0xff]  ;;  %v338_v15 = vsel %vm122_vm2, %v14_v2, %v230_v6  ;;  %vm123_vm5 = vcmp.ge.f32.partialorder %v15_v8, 0.0  ;;  %v24_v17 = vld [vmem:[%s1106_s1 + $0x68] sm:$0xff]  ;;  %v227_v19 = vmul.f32 0.2, %v11_v7  ;;  %v22_v21 = vld [vmem:[%s1106_s1 + $0x58] sm:$0xff] }
   0x6   :  { %v601_v14 = vpack.c.bf16 %v340_v10, %v336_v9  ;;  %v342_v18 = vsel %vm126_vm3, %v18_v5, %v234_v11  ;;  %v231_v20 = vmul.f32 0.2, %v15_v8  ;;  %vm121_vm6 = vcmp.ge.f32.partialorder %v13_v12, 0.0  ;;  %v26_v25 = vld [vmem:[%s1106_s1 + $0x78] sm:$0xff]  ;;  %v19_v28 = vld [vmem:[%s1106_s1 + $0x40] sm:$0xff]  ;;  %v21_v36 = vld [vmem:[%s1106_s1 + $0x50] sm:$0xff] }
   0x7   :  { %v653_v22 = vpack.c.bf16 %v342_v18, %v338_v15  ;;  %vm125_vm7 = vcmp.ge.f32.partialorder %v17_v13, 0.0  ;;  %v229_v23 = vmul.f32 0.2, %v13_v12  ;;  %v233_v24 = vmul.f32 0.2, %v17_v13  ;;  %v23_v33 = vld [vmem:[%s1106_s1 + $0x60] sm:$0xff] }
   0x8   :  { %602 = vmatprep.subr.bf16.mxu0 %v601_v14  ;;  %v335_v26 = vsel %vm119_vm4, %v11_v7, %v227_v19  ;;  %v339_v27 = vsel %vm123_vm5, %v15_v8, %v231_v20  ;;  %vm128_vm8 = vcmp.ge.f32.partialorder %v20_v16, 0.0  ;;  %vm132_vm9 = vcmp.ge.f32.partialorder %v24_v17, 0.0  ;;  %v25_v40 = vld [vmem:[%s1106_s1 + $0x70] sm:$0xff]  ;;  %v28_v44 = vld [vmem:[%s1106_s1 + $0x88] sm:$0xff]  ;;  %v30_v49 = vld [vmem:[%s1106_s1 + $0x98] sm:$0xff] }
   0x9   :  { %654 = vmatprep.subr.bf16.mxu1 %v653_v22  ;;  %v603_v29 = vpack.c.bf16 %v339_v27, %v335_v26  ;;  %v337_v30 = vsel %vm121_vm6, %v13_v12, %v229_v23  ;;  %v341_v31 = vsel %vm125_vm7, %v17_v13, %v233_v24  ;;  %v236_v32 = vmul.f32 0.2, %v20_v16  ;;  %v32_v48 = vld [vmem:[%s1106_s1 + $0xa8] sm:$0xff]  ;;  %v34_v53 = vld [vmem:[%s1106_s1 + $0xb8] sm:$0xff]  ;;  %v27_v54 = vld [vmem:[%s1106_s1 + $0x80] sm:$0xff] }
   0xa   :  { %v655_v34 = vpack.c.bf16 %v341_v31, %v337_v30  ;;  %v240_v35 = vmul.f32 0.2, %v24_v17  ;;  %vm130_vm10 = vcmp.ge.f32.partialorder %v22_v21, 0.0  ;;  %vm134_vm11 = vcmp.ge.f32.partialorder %v26_v25, 0.0  ;;  %v31_v58 = vld [vmem:[%s1106_s1 + $0xa0] sm:$0xff]  ;;  %v29_v0 = vld [vmem:[%s1106_s1 + $0x90] sm:$0xff] }
   0xb   :  { %604 = vmatpush1.bf16.msra.mxu0 %v603_v29  ;;  %v344_v37 = vsel %vm128_vm8, %v20_v16, %v236_v32  ;;  %v238_v38 = vmul.f32 0.2, %v22_v21  ;;  %v242_v39 = vmul.f32 0.2, %v26_v25  ;;  %vm127_vm12 = vcmp.ge.f32.partialorder %v19_v28, 0.0  ;;  %v33_v5 = vld [vmem:[%s1106_s1 + $0xb0] sm:$0xff] }
   0xc   :  { %656 = vmatpush1.bf16.msra.mxu1 %v655_v34  ;;  %v348_v41 = vsel %vm132_vm9, %v24_v17, %v240_v35  ;;  %vm131_vm13 = vcmp.ge.f32.partialorder %v23_v33, 0.0  ;;  %v235_v42 = vmul.f32 0.2, %v19_v28  ;;  %v239_v43 = vmul.f32 0.2, %v23_v33  ;;  %v36_v8 = vld [vmem:[%s1106_s1 + $0xc8] sm:$0xff] }
   0xd   :  { %v605_v45 = vpack.c.bf16 %v348_v41, %v344_v37  ;;  %v346_v46 = vsel %vm130_vm10, %v22_v21, %v238_v38  ;;  %v350_v47 = vsel %vm134_vm11, %v26_v25, %v242_v39  ;;  %vm129_vm14 = vcmp.ge.f32.partialorder %v21_v36, 0.0  ;;  %v40_v9 = vld [vmem:[%s1106_s1 + $0xe8] sm:$0xff]  ;;  %v38_v13 = vld [vmem:[%s1106_s1 + $0xd8] sm:$0xff]  ;;  %v35_v20 = vld [vmem:[%s1106_s1 + $0xc0] sm:$0xff] }
   0xe   :  { %v657_v50 = vpack.c.bf16 %v350_v47, %v346_v46  ;;  %v343_v51 = vsel %vm127_vm12, %v19_v28, %v235_v42  ;;  %v347_v52 = vsel %vm131_vm13, %v23_v33, %v239_v43  ;;  %vm133_vm15 = vcmp.ge.f32.partialorder %v25_v40, 0.0  ;;  %v42_v17 = vld [vmem:[%s1106_s1 + $0xf8] sm:$0xff]  ;;  %v39_v25 = vld [vmem:[%s1106_s1 + $0xe0] sm:$0xff]  ;;  %v37_v28 = vld [vmem:[%s1106_s1 + $0xd0] sm:$0xff] }
   0xf   :  { %606 = vmatprep.subr.bf16.mxu0 %v605_v45  ;;  %v607_v55 = vpack.c.bf16 %v347_v52, %v343_v51  ;;  %v237_v56 = vmul.f32 0.2, %v21_v36  ;;  %v241_v57 = vmul.f32 0.2, %v25_v40  ;;  %vm136_vm0 = vcmp.ge.f32.partialorder %v28_v44, 0.0  ;;  %v41_v32 = vld [vmem:[%s1106_s1 + $0xf0] sm:$0xff] }
  0x10   :  { %658 = vmatprep.subr.bf16.mxu1 %v657_v50  ;;  %vm140_vm1 = vcmp.ge.f32.partialorder %v32_v48, 0.0  ;;  %v244_v59 = vmul.f32 0.2, %v28_v44  ;;  %v248_v60 = vmul.f32 0.2, %v32_v48  ;;  %vm138_vm2 = vcmp.ge.f32.partialorder %v30_v49, 0.0 }
  0x11   :  { %608 = vmatpush1.bf16.msra.mxu0 %v607_v55  ;;  %v345_v61 = vsel %vm129_vm14, %v21_v36, %v237_v56  ;;  %v349_v62 = vsel %vm133_vm15, %v25_v40, %v241_v57  ;;  %vm142_vm3 = vcmp.ge.f32.partialorder %v34_v53, 0.0  ;;  %v246_v63 = vmul.f32 0.2, %v30_v49  ;;  %v44_v36 = vld [vmem:[%s1106_s1 + $0x108] sm:$0xff]  ;;  %v46_v41 = vld [vmem:[%s1106_s1 + $0x118] sm:$0xff]  ;;  %v43_v46 = vld [vmem:[%s1106_s1 + $0x100] sm:$0xff] }
  0x12   :  { %v659_v1 = vpack.c.bf16 %v349_v62, %v345_v61  ;;  %v352_v2 = vsel %vm136_vm0, %v28_v44, %v244_v59  ;;  %v356_v3 = vsel %vm140_vm1, %v32_v48, %v248_v60  ;;  %v250_v4 = vmul.f32 0.2, %v34_v53  ;;  %v48_v40 = vld [vmem:[%s1106_s1 + $0x128] sm:$0xff]  ;;  %v50_v45 = vld [vmem:[%s1106_s1 + $0x138] sm:$0xff]  ;;  %v47_v50 = vld [vmem:[%s1106_s1 + $0x120] sm:$0xff] }
  0x13   :  { %v609_v6 = vpack.c.bf16 %v356_v3, %v352_v2  ;;  %v354_v7 = vsel %vm138_vm2, %v30_v49, %v246_v63  ;;  %vm135_vm4 = vcmp.ge.f32.partialorder %v27_v54, 0.0  ;;  %vm139_vm5 = vcmp.ge.f32.partialorder %v31_v58, 0.0  ;;  %v45_v56 = vld [vmem:[%s1106_s1 + $0x110] sm:$0xff] }
  0x14   :  { %660 = vmatpush1.bf16.msra.mxu1 %v659_v1  ;;  %v358_v10 = vsel %vm142_vm3, %v34_v53, %v250_v4  ;;  %v243_v11 = vmul.f32 0.2, %v27_v54  ;;  %v247_v12 = vmul.f32 0.2, %v31_v58  ;;  %vm137_vm6 = vcmp.ge.f32.partialorder %v29_v0, 0.0  ;;  %v49_v61 = vld [vmem:[%s1106_s1 + $0x130] sm:$0xff] }
  0x15   :  { %610 = vmatprep.subr.bf16.mxu0 %v609_v6  ;;  %v661_v14 = vpack.c.bf16 %v358_v10, %v354_v7  ;;  %vm141_vm7 = vcmp.ge.f32.partialorder %v33_v5, 0.0  ;;  %v245_v15 = vmul.f32 0.2, %v29_v0  ;;  %v249_v16 = vmul.f32 0.2, %v33_v5  ;;  %v56_v1 = vld [vmem:[%s1106_s1 + $0x168] sm:$0xff] }
  0x16   :  { %v351_v18 = vsel %vm135_vm4, %v27_v54, %v243_v11  ;;  %v355_v19 = vsel %vm139_vm5, %v31_v58, %v247_v12  ;;  %vm144_vm8 = vcmp.ge.f32.partialorder %v36_v8, 0.0  ;;  %vm148_vm9 = vcmp.ge.f32.partialorder %v40_v9, 0.0  ;;  %v51_v12 = vld [vmem:[%s1106_s1 + $0x140] sm:$0xff] }
  0x17   :  { %662 = vmatprep.subr.bf16.mxu1 %v661_v14  ;;  %v611_v21 = vpack.c.bf16 %v355_v19, %v351_v18  ;;  %v353_v22 = vsel %vm137_vm6, %v29_v0, %v245_v15  ;;  %v357_v23 = vsel %vm141_vm7, %v33_v5, %v249_v16  ;;  %v252_v24 = vmul.f32 0.2, %v36_v8  ;;  %v52_v0 = vld [vmem:[%s1106_s1 + $0x148] sm:$0xff]  ;;  %v54_v5 = vld [vmem:[%s1106_s1 + $0x158] sm:$0xff] }
  0x18   :  { %v663_v26 = vpack.c.bf16 %v357_v23, %v353_v22  ;;  %v256_v27 = vmul.f32 0.2, %v40_v9  ;;  %vm146_vm10 = vcmp.ge.f32.partialorder %v38_v13, 0.0  ;;  %vm150_vm11 = vcmp.ge.f32.partialorder %v42_v17, 0.0 }
  0x19   :  { %612 = vmatpush1.bf16.msra.mxu0 %v611_v21  ;;  %v360_v29 = vsel %vm144_vm8, %v36_v8, %v252_v24  ;;  %v254_v30 = vmul.f32 0.2, %v38_v13  ;;  %v258_v31 = vmul.f32 0.2, %v42_v17  ;;  %vm143_vm12 = vcmp.ge.f32.partialorder %v35_v20, 0.0  ;;  %v57_v24 = vld [vmem:[%s1106_s1 + $0x170] sm:$0xff] }
  0x1a   :  { %664 = vmatpush1.bf16.msra.mxu1 %v663_v26  ;;  %v364_v33 = vsel %vm148_vm9, %v40_v9, %v256_v27  ;;  %vm147_vm13 = vcmp.ge.f32.partialorder %v39_v25, 0.0  ;;  %v251_v34 = vmul.f32 0.2, %v35_v20  ;;  %v255_v35 = vmul.f32 0.2, %v39_v25  ;;  %v58_v9 = vld [vmem:[%s1106_s1 + $0x178] sm:$0xff] }
  0x1b   :  { %v613_v37 = vpack.c.bf16 %v364_v33, %v360_v29  ;;  %v362_v38 = vsel %vm146_vm10, %v38_v13, %v254_v30  ;;  %v366_v39 = vsel %vm150_vm11, %v42_v17, %v258_v31  ;;  %vm145_vm14 = vcmp.ge.f32.partialorder %v37_v28, 0.0  ;;  %v55_v17 = vld [vmem:[%s1106_s1 + $0x160] sm:$0xff]  ;;  %v62_v33 = vld [vmem:[%s1106_s1 + $0x198] sm:$0xff] }
  0x1c   :  { %v665_v42 = vpack.c.bf16 %v366_v39, %v362_v38  ;;  %v359_v43 = vsel %vm143_vm12, %v35_v20, %v251_v34  ;;  %v363_v44 = vsel %vm147_vm13, %v39_v25, %v255_v35  ;;  %vm149_vm15 = vcmp.ge.f32.partialorder %v41_v32, 0.0  ;;  %v53_v20 = vld [vmem:[%s1106_s1 + $0x150] sm:$0xff]  ;;  %v59_v38 = vld [vmem:[%s1106_s1 + $0x180] sm:$0xff] }
  0x1d   :  { %614 = vmatprep.subr.bf16.mxu0 %v613_v37  ;;  %v615_v47 = vpack.c.bf16 %v363_v44, %v359_v43  ;;  %v253_v48 = vmul.f32 0.2, %v37_v28  ;;  %v257_v49 = vmul.f32 0.2, %v41_v32  ;;  %vm152_vm0 = vcmp.ge.f32.partialorder %v44_v36, 0.0  ;;  %v66_v37 = vld [vmem:[%s1106_s1 + $0x1b8] sm:$0xff] }
  0x1e   :  { %666 = vmatprep.subr.bf16.mxu1 %v665_v42  ;;  %vm156_vm1 = vcmp.ge.f32.partialorder %v48_v40, 0.0  ;;  %v260_v51 = vmul.f32 0.2, %v44_v36  ;;  %v264_v52 = vmul.f32 0.2, %v48_v40  ;;  %vm154_vm2 = vcmp.ge.f32.partialorder %v46_v41, 0.0 }
  0x1f   :  { %616 = vmatpush1.bf16.msra.mxu0 %v615_v47  ;;  %v361_v53 = vsel %vm145_vm14, %v37_v28, %v253_v48  ;;  %v365_v54 = vsel %vm149_vm15, %v41_v32, %v257_v49  ;;  %vm158_vm3 = vcmp.ge.f32.partialorder %v50_v45, 0.0  ;;  %v262_v55 = vmul.f32 0.2, %v46_v41  ;;  %v60_v28 = vld [vmem:[%s1106_s1 + $0x188] sm:$0xff]  ;;  %v63_v42 = vld [vmem:[%s1106_s1 + $0x1a0] sm:$0xff]  ;;  %v61_v48 = vld [vmem:[%s1106_s1 + $0x190] sm:$0xff] }
  0x20   :  { %v667_v57 = vpack.c.bf16 %v365_v54, %v361_v53  ;;  %v368_v58 = vsel %vm152_vm0, %v44_v36, %v260_v51  ;;  %v372_v59 = vsel %vm156_vm1, %v48_v40, %v264_v52  ;;  %v266_v60 = vmul.f32 0.2, %v50_v45  ;;  %v64_v32 = vld [vmem:[%s1106_s1 + $0x1a8] sm:$0xff]  ;;  %v65_v53 = vld [vmem:[%s1106_s1 + $0x1b0] sm:$0xff] }
  0x21   :  { %v617_v62 = vpack.c.bf16 %v372_v59, %v368_v58  ;;  %v370_v63 = vsel %vm154_vm2, %v46_v41, %v262_v55  ;;  %vm151_vm4 = vcmp.ge.f32.partialorder %v43_v46, 0.0  ;;  %vm155_vm5 = vcmp.ge.f32.partialorder %v47_v50, 0.0 }
  0x22   :  { %668 = vmatpush1.bf16.msra.mxu1 %v667_v57  ;;  %v374_v2 = vsel %vm158_vm3, %v50_v45, %v266_v60  ;;  %v259_v3 = vmul.f32 0.2, %v43_v46  ;;  %v263_v4 = vmul.f32 0.2, %v47_v50  ;;  %vm153_vm6 = vcmp.ge.f32.partialorder %v45_v56, 0.0  ;;  %v72_v57 = vld [vmem:[%s1106_s1 + $0x1e8] sm:$0xff] }
  0x23   :  { %618 = vmatprep.subr.bf16.mxu0 %v617_v62  ;;  %v669_v6 = vpack.c.bf16 %v374_v2, %v370_v63  ;;  %vm157_vm7 = vcmp.ge.f32.partialorder %v49_v61, 0.0  ;;  %v261_v7 = vmul.f32 0.2, %v45_v56  ;;  %v265_v8 = vmul.f32 0.2, %v49_v61 }
  0x24   :  { %v367_v10 = vsel %vm151_vm4, %v43_v46, %v259_v3  ;;  %v371_v11 = vsel %vm155_vm5, %v47_v50, %v263_v4  ;;  %vm160_vm8 = vcmp.ge.f32.partialorder %v52_v0, 0.0  ;;  %vm164_vm9 = vcmp.ge.f32.partialorder %v56_v1, 0.0  ;;  %v67_v4 = vld [vmem:[%s1106_s1 + $0x1c0] sm:$0xff] }
  0x25   :  { %670 = vmatprep.subr.bf16.mxu1 %v669_v6  ;;  %v619_v13 = vpack.c.bf16 %v371_v11, %v367_v10  ;;  %v369_v14 = vsel %vm153_vm6, %v45_v56, %v261_v7  ;;  %v373_v15 = vsel %vm157_vm7, %v49_v61, %v265_v8  ;;  %v268_v16 = vmul.f32 0.2, %v52_v0  ;;  %v68_v56 = vld [vmem:[%s1106_s1 + $0x1c8] sm:$0xff]  ;;  %v70_v61 = vld [vmem:[%s1106_s1 + $0x1d8] sm:$0xff] }
  0x26   :  { %v671_v18 = vpack.c.bf16 %v373_v15, %v369_v14  ;;  %v272_v19 = vmul.f32 0.2, %v56_v1  ;;  %vm162_vm10 = vcmp.ge.f32.partialorder %v54_v5, 0.0  ;;  %vm166_vm11 = vcmp.ge.f32.partialorder %v58_v9, 0.0 }
  0x27   :  { %620 = vmatpush1.bf16.msra.mxu0 %v619_v13  ;;  %v376_v21 = vsel %vm160_vm8, %v52_v0, %v268_v16  ;;  %v270_v22 = vmul.f32 0.2, %v54_v5  ;;  %v274_v23 = vmul.f32 0.2, %v58_v9  ;;  %vm159_vm12 = vcmp.ge.f32.partialorder %v51_v12, 0.0  ;;  %v73_v13 = vld [vmem:[%s1106_s1 + $0x1f0] sm:$0xff] }
  0x28   :  { %672 = vmatpush1.bf16.msra.mxu1 %v671_v18  ;;  %v380_v25 = vsel %vm164_vm9, %v56_v1, %v272_v19  ;;  %vm163_vm13 = vcmp.ge.f32.partialorder %v55_v17, 0.0  ;;  %v267_v26 = vmul.f32 0.2, %v51_v12  ;;  %v271_v27 = vmul.f32 0.2, %v55_v17  ;;  %v74_v1 = vld [vmem:[%s1106_s1 + $0x1f8] sm:$0xff] }
  0x29   :  { %v621_v29 = vpack.c.bf16 %v380_v25, %v376_v21  ;;  %v378_v30 = vsel %vm162_vm10, %v54_v5, %v270_v22  ;;  %v382_v31 = vsel %vm166_vm11, %v58_v9, %v274_v23  ;;  %vm161_vm14 = vcmp.ge.f32.partialorder %v53_v20, 0.0  ;;  %v71_v9 = vld [vmem:[%s1106_s1 + $0x1e0] sm:$0xff]  ;;  %v444_v21 = vld [vmem:[%s1107_s0 + $0x8] sm:$0xff] }
  0x2a   :  { %v673_v34 = vpack.c.bf16 %v382_v31, %v378_v30  ;;  %v375_v35 = vsel %vm159_vm12, %v51_v12, %v267_v26  ;;  %v379_v36 = vsel %vm163_vm13, %v55_v17, %v271_v27  ;;  %vm165_vm15 = vcmp.ge.f32.partialorder %v57_v24, 0.0  ;;  %v69_v12 = vld [vmem:[%s1106_s1 + $0x1d0] sm:$0xff]  ;;  %v76_v17 = vld [vmem:[%s1106_s1 + $0x208] sm:$0xff]  ;;  %v78_v26 = vld [vmem:[%s1106_s1 + $0x218] sm:$0xff] }
  0x2b   :  { %622 = vmatprep.subr.bf16.mxu0 %v621_v29  ;;  %v623_v39 = vpack.c.bf16 %v379_v36, %v375_v35  ;;  %v269_v40 = vmul.f32 0.2, %v53_v20  ;;  %v273_v41 = vmul.f32 0.2, %v57_v24  ;;  %vm168_vm0 = vcmp.ge.f32.partialorder %v60_v28, 0.0  ;;  %v80_v25 = vld [vmem:[%s1106_s1 + $0x228] sm:$0xff] }
  0x2c   :  { %674 = vmatprep.subr.bf16.mxu1 %v673_v34  ;;  %vm172_vm1 = vcmp.ge.f32.partialorder %v64_v32, 0.0  ;;  %v276_v43 = vmul.f32 0.2, %v60_v28  ;;  %v280_v44 = vmul.f32 0.2, %v64_v32  ;;  %vm170_vm2 = vcmp.ge.f32.partialorder %v62_v33, 0.0 }
  0x2d   :  { %vm445_vm3 = vcmask 719872   ;;  %624 = vmatpush1.bf16.msra.mxu0 %v623_v39  ;;  %v377_v45 = vsel %vm161_vm14, %v53_v20, %v269_v40  ;;  %v381_v46 = vsel %vm165_vm15, %v57_v24, %v273_v41  ;;  %vm174_vm4 = vcmp.ge.f32.partialorder %v66_v37, 0.0  ;;  %v82_v30 = vld [vmem:[%s1106_s1 + $0x238] sm:$0xff]  ;;  %v75_v31 = vld [vmem:[%s1106_s1 + $0x200] sm:$0xff]  ;;  %v77_v41 = vld [vmem:[%s1106_s1 + $0x210] sm:$0xff] }
  0x2e   :  { %v278_v47 = vmul.f32 0.2, %v62_v33  ;;  %v675_v49 = vpack.c.bf16 %v381_v46, %v377_v45  ;;  %v384_v50 = vsel %vm168_vm0, %v60_v28, %v276_v43  ;;  %v388_v51 = vsel %vm172_vm1, %v64_v32, %v280_v44  ;;  %599 = vmatprep.mubr.msk.f32.mxu0 %vm445_vm3, %v444_v21  ;;  %600 = vmatprep.mubr.msk.f32.mxu1 %vm445_vm3, %v444_v21  ;;  %v79_v35 = vld [vmem:[%s1106_s1 + $0x220] sm:$0xff]  ;;  %v81_v46 = vld [vmem:[%s1106_s1 + $0x230] sm:$0xff] }
  0x2f   :  { %v282_v52 = vmul.f32 0.2, %v66_v37  ;;  %v625_v54 = vpack.c.bf16 %v388_v51, %v384_v50  ;;  %vm167_vm5 = vcmp.ge.f32.partialorder %v59_v38, 0.0  ;;  %vm171_vm6 = vcmp.ge.f32.partialorder %v63_v42, 0.0  ;;  %v88_v50 = vld [vmem:[%s1106_s1 + $0x268] sm:$0xff] }
  0x30   :  { %v386_v55 = vsel %vm170_vm2, %v62_v33, %v278_v47  ;;  %676 = vmatpush1.bf16.msra.mxu1 %v675_v49  ;;  %v275_v59 = vmul.f32 0.2, %v59_v38  ;;  %v279_v60 = vmul.f32 0.2, %v63_v42  ;;  %vm169_vm7 = vcmp.ge.f32.partialorder %v61_v48, 0.0  ;;  %v84_v49 = vld [vmem:[%s1106_s1 + $0x248] sm:$0xff] }
  0x31   :  { %v390_v58 = vsel %vm174_vm4, %v66_v37, %v282_v52  ;;  %626 = vmatprep.subr.bf16.mxu0 %v625_v54  ;;  %vm173_vm8 = vcmp.ge.f32.partialorder %v65_v53, 0.0  ;;  %v277_v63 = vmul.f32 0.2, %v61_v48  ;;  %v281_v0 = vmul.f32 0.2, %v65_v53  ;;  %v86_v54 = vld [vmem:[%s1106_s1 + $0x258] sm:$0xff] }
  0x32   :  { %v677_v62 = vpack.c.bf16 %v390_v58, %v386_v55  ;;  %v383_v2 = vsel %vm167_vm5, %v59_v38, %v275_v59  ;;  %v387_v3 = vsel %vm171_vm6, %v63_v42, %v279_v60  ;;  %vm176_vm9 = vcmp.ge.f32.partialorder %v68_v56, 0.0  ;;  %v90_v58 = vld [vmem:[%s1106_s1 + $0x278] sm:$0xff] }
  0x33   :  { %vm180_vm10 = vcmp.ge.f32.partialorder %v72_v57, 0.0  ;;  %v627_v5 = vpack.c.bf16 %v387_v3, %v383_v2  ;;  %v385_v6 = vsel %vm169_vm7, %v61_v48, %v277_v63  ;;  %v389_v7 = vsel %vm173_vm8, %v65_v53, %v281_v0  ;;  %v87_v2 = vld [vmem:[%s1106_s1 + $0x260] sm:$0xff] }
  0x34   :  { %678 = vmatprep.subr.bf16.mxu1 %v677_v62  ;;  %v284_v8 = vmul.f32 0.2, %v68_v56  ;;  %v679_v10 = vpack.c.bf16 %v389_v7, %v385_v6  ;;  %v288_v11 = vmul.f32 0.2, %v72_v57  ;;  %vm178_vm11 = vcmp.ge.f32.partialorder %v70_v61, 0.0 }
  0x35   :  { %vm182_vm12 = vcmp.ge.f32.partialorder %v74_v1, 0.0  ;;  %628 = vmatpush1.bf16.msra.mxu0 %v627_v5  ;;  %v286_v15 = vmul.f32 0.2, %v70_v61  ;;  %v290_v16 = vmul.f32 0.2, %v74_v1  ;;  %vm175_vm13 = vcmp.ge.f32.partialorder %v67_v4, 0.0 }
  0x36   :  { %v392_v14 = vsel %vm176_vm9, %v68_v56, %v284_v8  ;;  %680 = vmatpush1.bf16.msra.mxu1 %v679_v10  ;;  %v396_v18 = vsel %vm180_vm10, %v72_v57, %v288_v11  ;;  %vm179_vm14 = vcmp.ge.f32.partialorder %v71_v9, 0.0  ;;  %v283_v19 = vmul.f32 0.2, %v67_v4  ;;  %v85_v5 = vld [vmem:[%s1106_s1 + $0x250] sm:$0xff] }
  0x37   :  { %v287_v20 = vmul.f32 0.2, %v71_v9  ;;  %v629_v22 = vpack.c.bf16 %v396_v18, %v392_v14  ;;  %v394_v23 = vsel %vm178_vm11, %v70_v61, %v286_v15  ;;  %v398_v24 = vsel %vm182_vm12, %v74_v1, %v290_v16  ;;  %v83_v61 = vld [vmem:[%s1106_s1 + $0x240] sm:$0xff]  ;;  %v94_v18 = vld [vmem:[%s1106_s1 + $0x298] sm:$0xff] }
  0x38   :  { %vm177_vm15 = vcmp.ge.f32.partialorder %v69_v12, 0.0  ;;  %v681_v27 = vpack.c.bf16 %v398_v24, %v394_v23  ;;  %v391_v28 = vsel %vm175_vm13, %v67_v4, %v283_v19  ;;  %vm181_vm0 = vcmp.ge.f32.partialorder %v73_v13, 0.0  ;;  %v91_v23 = vld [vmem:[%s1106_s1 + $0x280] sm:$0xff] }
  0x39   :  { %v395_v29 = vsel %vm179_vm14, %v71_v9, %v287_v20  ;;  %630 = vmatprep.subr.bf16.mxu0 %v629_v22  ;;  %v285_v33 = vmul.f32 0.2, %v69_v12  ;;  %v289_v34 = vmul.f32 0.2, %v73_v13  ;;  %vm184_vm1 = vcmp.ge.f32.partialorder %v76_v17, 0.0  ;;  %v89_v9 = vld [vmem:[%s1106_s1 + $0x270] sm:$0xff] }
  0x3a   :  { %v631_v32 = vpack.c.bf16 %v395_v29, %v391_v28  ;;  %682 = vmatprep.subr.bf16.mxu1 %v681_v27  ;;  %vm188_vm2 = vcmp.ge.f32.partialorder %v80_v25, 0.0  ;;  %v292_v36 = vmul.f32 0.2, %v76_v17  ;;  %v296_v37 = vmul.f32 0.2, %v80_v25  ;;  %v98_v22 = vld [vmem:[%s1106_s1 + $0x2b8] sm:$0xff] }
  0x3b   :  { %vm186_vm3 = vcmp.ge.f32.partialorder %v78_v26, 0.0  ;;  %v393_v38 = vsel %vm177_vm15, %v69_v12, %v285_v33  ;;  %v397_v39 = vsel %vm181_vm0, %v73_v13, %v289_v34  ;;  %vm190_vm4 = vcmp.ge.f32.partialorder %v82_v30, 0.0  ;;  %v92_v13 = vld [vmem:[%s1106_s1 + $0x288] sm:$0xff]  ;;  %v95_v27 = vld [vmem:[%s1106_s1 + $0x2a0] sm:$0xff]  ;;  %v93_v33 = vld [vmem:[%s1106_s1 + $0x290] sm:$0xff] }
  0x3c   :  { %632 = vmatpush1.bf16.msra.mxu0 %v631_v32  ;;  %v294_v40 = vmul.f32 0.2, %v78_v26  ;;  %v683_v42 = vpack.c.bf16 %v397_v39, %v393_v38  ;;  %v400_v43 = vsel %vm184_vm1, %v76_v17, %v292_v36  ;;  %v404_v44 = vsel %vm188_vm2, %v80_v25, %v296_v37  ;;  %v96_v17 = vld [vmem:[%s1106_s1 + $0x2a8] sm:$0xff]  ;;  %v97_v38 = vld [vmem:[%s1106_s1 + $0x2b0] sm:$0xff] }
  0x3d   :  { %v298_v45 = vmul.f32 0.2, %v82_v30  ;;  %v633_v47 = vpack.c.bf16 %v404_v44, %v400_v43  ;;  %vm183_vm5 = vcmp.ge.f32.partialorder %v75_v31, 0.0  ;;  %vm187_vm6 = vcmp.ge.f32.partialorder %v79_v35, 0.0 }
  0x3e   :  { %v402_v48 = vsel %vm186_vm3, %v78_v26, %v294_v40  ;;  %684 = vmatpush1.bf16.msra.mxu1 %v683_v42  ;;  %v291_v52 = vmul.f32 0.2, %v75_v31  ;;  %v295_v53 = vmul.f32 0.2, %v79_v35  ;;  %vm185_vm7 = vcmp.ge.f32.partialorder %v77_v41, 0.0  ;;  %v104_v42 = vld [vmem:[%s1106_s1 + $0x2e8] sm:$0xff] }
  0x3f   :  { %v406_v51 = vsel %vm190_vm4, %v82_v30, %v298_v45  ;;  %634 = vmatprep.subr.bf16.mxu0 %v633_v47  ;;  %vm189_vm8 = vcmp.ge.f32.partialorder %v81_v46, 0.0  ;;  %v293_v56 = vmul.f32 0.2, %v77_v41  ;;  %v297_v57 = vmul.f32 0.2, %v81_v46 }
  0x40   :  { %v685_v55 = vpack.c.bf16 %v406_v51, %v402_v48  ;;  %v399_v59 = vsel %vm183_vm5, %v75_v31, %v291_v52  ;;  %v403_v60 = vsel %vm187_vm6, %v79_v35, %v295_v53  ;;  %vm192_vm9 = vcmp.ge.f32.partialorder %v84_v49, 0.0  ;;  %v99_v53 = vld [vmem:[%s1106_s1 + $0x2c0] sm:$0xff] }
  0x41   :  { %vm196_vm10 = vcmp.ge.f32.partialorder %v88_v50, 0.0  ;;  %v635_v62 = vpack.c.bf16 %v403_v60, %v399_v59  ;;  %v401_v63 = vsel %vm185_vm7, %v77_v41, %v293_v56  ;;  %v405_v0 = vsel %vm189_vm8, %v81_v46, %v297_v57  ;;  %v100_v41 = vld [vmem:[%s1106_s1 + $0x2c8] sm:$0xff]  ;;  %v102_v46 = vld [vmem:[%s1106_s1 + $0x2d8] sm:$0xff] }
  0x42   :  { %686 = vmatprep.subr.bf16.mxu1 %v685_v55  ;;  %v300_v1 = vmul.f32 0.2, %v84_v49  ;;  %v687_v3 = vpack.c.bf16 %v405_v0, %v401_v63  ;;  %v304_v4 = vmul.f32 0.2, %v88_v50  ;;  %vm194_vm11 = vcmp.ge.f32.partialorder %v86_v54, 0.0 }
  0x43   :  { %vm198_vm12 = vcmp.ge.f32.partialorder %v90_v58, 0.0  ;;  %636 = vmatpush1.bf16.msra.mxu0 %v635_v62  ;;  %v302_v7 = vmul.f32 0.2, %v86_v54  ;;  %v306_v8 = vmul.f32 0.2, %v90_v58  ;;  %vm191_vm13 = vcmp.ge.f32.partialorder %v83_v61, 0.0 }
  0x44   :  { %v408_v6 = vsel %vm192_vm9, %v84_v49, %v300_v1  ;;  %688 = vmatpush1.bf16.msra.mxu1 %v687_v3  ;;  %v412_v10 = vsel %vm196_vm10, %v88_v50, %v304_v4  ;;  %vm195_vm14 = vcmp.ge.f32.partialorder %v87_v2, 0.0  ;;  %v299_v11 = vmul.f32 0.2, %v83_v61  ;;  %v106_v50 = vld [vmem:[%s1106_s1 + $0x2f8] sm:$0xff]  ;;  %v105_v1 = vld [vmem:[%s1106_s1 + $0x2f0] sm:$0xff] }
  0x45   :  { %v303_v12 = vmul.f32 0.2, %v87_v2  ;;  %v637_v14 = vpack.c.bf16 %v412_v10, %v408_v6  ;;  %v410_v15 = vsel %vm194_vm11, %v86_v54, %v302_v7  ;;  %v414_v16 = vsel %vm198_vm12, %v90_v58, %v306_v8  ;;  %v103_v58 = vld [vmem:[%s1106_s1 + $0x2e0] sm:$0xff]  ;;  %v110_v10 = vld [vmem:[%s1106_s1 + $0x318] sm:$0xff] }
  0x46   :  { %vm193_vm15 = vcmp.ge.f32.partialorder %v85_v5, 0.0  ;;  %v689_v19 = vpack.c.bf16 %v414_v16, %v410_v15  ;;  %v407_v20 = vsel %vm191_vm13, %v83_v61, %v299_v11  ;;  %vm197_vm0 = vcmp.ge.f32.partialorder %v89_v9, 0.0  ;;  %v101_v61 = vld [vmem:[%s1106_s1 + $0x2d0] sm:$0xff]  ;;  %v107_v15 = vld [vmem:[%s1106_s1 + $0x300] sm:$0xff] }
  0x47   :  { %v411_v21 = vsel %vm195_vm14, %v87_v2, %v303_v12  ;;  %638 = vmatprep.subr.bf16.mxu0 %v637_v14  ;;  %v301_v25 = vmul.f32 0.2, %v85_v5  ;;  %v305_v26 = vmul.f32 0.2, %v89_v9  ;;  %vm200_vm1 = vcmp.ge.f32.partialorder %v92_v13, 0.0  ;;  %v114_v14 = vld [vmem:[%s1106_s1 + $0x338] sm:$0xff] }
  0x48   :  { %v639_v24 = vpack.c.bf16 %v411_v21, %v407_v20  ;;  %690 = vmatprep.subr.bf16.mxu1 %v689_v19  ;;  %vm204_vm2 = vcmp.ge.f32.partialorder %v96_v17, 0.0  ;;  %v308_v28 = vmul.f32 0.2, %v92_v13  ;;  %v312_v29 = vmul.f32 0.2, %v96_v17  ;;  %v111_v19 = vld [vmem:[%s1106_s1 + $0x320] sm:$0xff] }
  0x49   :  { %vm202_vm3 = vcmp.ge.f32.partialorder %v94_v18, 0.0  ;;  %v409_v30 = vsel %vm193_vm15, %v85_v5, %v301_v25  ;;  %v413_v31 = vsel %vm197_vm0, %v89_v9, %v305_v26  ;;  %vm206_vm4 = vcmp.ge.f32.partialorder %v98_v22, 0.0  ;;  %v108_v5 = vld [vmem:[%s1106_s1 + $0x308] sm:$0xff]  ;;  %v109_v25 = vld [vmem:[%s1106_s1 + $0x310] sm:$0xff] }
  0x4a   :  { %640 = vmatpush1.bf16.msra.mxu0 %v639_v24  ;;  %v310_v32 = vmul.f32 0.2, %v94_v18  ;;  %v691_v34 = vpack.c.bf16 %v413_v31, %v409_v30  ;;  %v416_v35 = vsel %vm200_vm1, %v92_v13, %v308_v28  ;;  %v420_v36 = vsel %vm204_vm2, %v96_v17, %v312_v29  ;;  %v112_v9 = vld [vmem:[%s1106_s1 + $0x328] sm:$0xff]  ;;  %v113_v30 = vld [vmem:[%s1106_s1 + $0x330] sm:$0xff] }
  0x4b   :  { %v314_v37 = vmul.f32 0.2, %v98_v22  ;;  %v641_v39 = vpack.c.bf16 %v420_v36, %v416_v35  ;;  %vm199_vm5 = vcmp.ge.f32.partialorder %v91_v23, 0.0  ;;  %vm203_vm6 = vcmp.ge.f32.partialorder %v95_v27, 0.0 }
  0x4c   :  { %v418_v40 = vsel %vm202_vm3, %v94_v18, %v310_v32  ;;  %692 = vmatpush1.bf16.msra.mxu1 %v691_v34  ;;  %v307_v44 = vmul.f32 0.2, %v91_v23  ;;  %v311_v45 = vmul.f32 0.2, %v95_v27  ;;  %vm201_vm7 = vcmp.ge.f32.partialorder %v93_v33, 0.0 }
  0x4d   :  { %v422_v43 = vsel %vm206_vm4, %v98_v22, %v314_v37  ;;  %642 = vmatprep.subr.bf16.mxu0 %v641_v39  ;;  %vm205_vm8 = vcmp.ge.f32.partialorder %v97_v38, 0.0  ;;  %v309_v48 = vmul.f32 0.2, %v93_v33  ;;  %v313_v49 = vmul.f32 0.2, %v97_v38  ;;  %v118_v37 = vld [vmem:[%s1106_s1 + $0x358] sm:$0xff] }
  0x4e   :  { %v693_v47 = vpack.c.bf16 %v422_v43, %v418_v40  ;;  %v415_v51 = vsel %vm199_vm5, %v91_v23, %v307_v44  ;;  %v419_v52 = vsel %vm203_vm6, %v95_v27, %v311_v45  ;;  %vm208_vm9 = vcmp.ge.f32.partialorder %v100_v41, 0.0  ;;  %v117_v45 = vld [vmem:[%s1106_s1 + $0x350] sm:$0xff] }
  0x4f   :  { %vm212_vm10 = vcmp.ge.f32.partialorder %v104_v42, 0.0  ;;  %v643_v54 = vpack.c.bf16 %v419_v52, %v415_v51  ;;  %v417_v55 = vsel %vm201_vm7, %v93_v33, %v309_v48  ;;  %v421_v56 = vsel %vm205_vm8, %v97_v38, %v313_v49  ;;  %v116_v33 = vld [vmem:[%s1106_s1 + $0x348] sm:$0xff] }
  0x50   :  { %694 = vmatprep.subr.bf16.mxu1 %v693_v47  ;;  %v316_v57 = vmul.f32 0.2, %v100_v41  ;;  %v695_v59 = vpack.c.bf16 %v421_v56, %v417_v55  ;;  %v320_v60 = vmul.f32 0.2, %v104_v42  ;;  %vm210_vm11 = vcmp.ge.f32.partialorder %v102_v46, 0.0 }
  0x51   :  { %vm214_vm12 = vcmp.ge.f32.partialorder %v106_v50, 0.0  ;;  %644 = vmatpush1.bf16.msra.mxu0 %v643_v54  ;;  %v318_v63 = vmul.f32 0.2, %v102_v46  ;;  %v322_v0 = vmul.f32 0.2, %v106_v50  ;;  %vm207_vm13 = vcmp.ge.f32.partialorder %v99_v53, 0.0 }
  0x52   :  { %v424_v62 = vsel %vm208_vm9, %v100_v41, %v316_v57  ;;  %696 = vmatpush1.bf16.msra.mxu1 %v695_v59  ;;  %v428_v2 = vsel %vm212_vm10, %v104_v42, %v320_v60  ;;  %vm211_vm14 = vcmp.ge.f32.partialorder %v103_v58, 0.0  ;;  %v315_v3 = vmul.f32 0.2, %v99_v53  ;;  %v115_v41 = vld [vmem:[%s1106_s1 + $0x340] sm:$0xff] }
  0x53   :  { %v319_v4 = vmul.f32 0.2, %v103_v58  ;;  %v645_v6 = vpack.c.bf16 %v428_v2, %v424_v62  ;;  %v426_v7 = vsel %vm210_vm11, %v102_v46, %v318_v63  ;;  %v430_v8 = vsel %vm214_vm12, %v106_v50, %v322_v0  ;;  %v443_v57 = vld [vmem:[%s1107_s0] sm:$0xff] }
  0x54   :  { %vm209_vm15 = vcmp.ge.f32.partialorder %v101_v61, 0.0  ;;  %v697_v11 = vpack.c.bf16 %v430_v8, %v426_v7  ;;  %v423_v12 = vsel %vm207_vm13, %v99_v53, %v315_v3  ;;  %vm213_vm0 = vcmp.ge.f32.partialorder %v105_v1, 0.0 }
  0x55   :  { %v427_v13 = vsel %vm211_vm14, %v103_v58, %v319_v4  ;;  %646 = vmatprep.subr.bf16.mxu0 %v645_v6  ;;  %v317_v17 = vmul.f32 0.2, %v101_v61  ;;  %v321_v18 = vmul.f32 0.2, %v105_v1  ;;  %vm216_vm1 = vcmp.ge.f32.partialorder %v108_v5, 0.0 }
  0x56   :  { %v647_v16 = vpack.c.bf16 %v427_v13, %v423_v12  ;;  %698 = vmatprep.subr.bf16.mxu1 %v697_v11  ;;  %vm220_vm2 = vcmp.ge.f32.partialorder %v112_v9, 0.0  ;;  %v324_v20 = vmul.f32 0.2, %v108_v5  ;;  %v328_v21 = vmul.f32 0.2, %v112_v9 }
  0x57   :  { %vm218_vm3 = vcmp.ge.f32.partialorder %v110_v10, 0.0  ;;  %v425_v22 = vsel %vm209_vm15, %v101_v61, %v317_v17  ;;  %v429_v23 = vsel %vm213_vm0, %v105_v1, %v321_v18  ;;  %vm222_vm4 = vcmp.ge.f32.partialorder %v114_v14, 0.0 }
  0x58   :  { %648 = vmatpush1.bf16.msra.mxu0 %v647_v16  ;;  %v326_v24 = vmul.f32 0.2, %v110_v10  ;;  %v699_v26 = vpack.c.bf16 %v429_v23, %v425_v22  ;;  %v432_v27 = vsel %vm216_vm1, %v108_v5, %v324_v20  ;;  %v436_v28 = vsel %vm220_vm2, %v112_v9, %v328_v21 }
  0x59   :  { %v330_v29 = vmul.f32 0.2, %v114_v14  ;;  %v649_v31 = vpack.c.bf16 %v436_v28, %v432_v27  ;;  %vm215_vm5 = vcmp.ge.f32.partialorder %v107_v15, 0.0  ;;  %vm219_vm6 = vcmp.ge.f32.partialorder %v111_v19, 0.0 }
  0x5a   :  { %v434_v32 = vsel %vm218_vm3, %v110_v10, %v326_v24  ;;  %700 = vmatpush1.bf16.msra.mxu1 %v699_v26  ;;  %v323_v35 = vmul.f32 0.2, %v107_v15  ;;  %v327_v36 = vmul.f32 0.2, %v111_v19  ;;  %vm217_vm7 = vcmp.ge.f32.partialorder %v109_v25, 0.0 }
  0x5b   :  { %v438_v34 = vsel %vm222_vm4, %v114_v14, %v330_v29  ;;  %650 = vmatprep.subr.bf16.mxu0 %v649_v31  ;;  %vm221_vm8 = vcmp.ge.f32.partialorder %v113_v30, 0.0  ;;  %v325_v39 = vmul.f32 0.2, %v109_v25  ;;  %v329_v40 = vmul.f32 0.2, %v113_v30 }
  0x5c   :  { %v701_v38 = vpack.c.bf16 %v438_v34, %v434_v32  ;;  %v431_v42 = vsel %vm215_vm5, %v107_v15, %v323_v35  ;;  %v435_v43 = vsel %vm219_vm6, %v111_v19, %v327_v36  ;;  %vm224_vm9 = vcmp.ge.f32.partialorder %v116_v33, 0.0 }
  0x5d   :  { %v332_v44 = vmul.f32 0.2, %v116_v33  ;;  %v651_v46 = vpack.c.bf16 %v435_v43, %v431_v42  ;;  %v433_v47 = vsel %vm217_vm7, %v109_v25, %v325_v39  ;;  %v437_v48 = vsel %vm221_vm8, %v113_v30, %v329_v40 }
  0x5e   :  { %702 = vmatprep.subr.bf16.mxu1 %v701_v38  ;;  %vm226_vm10 = vcmp.ge.f32.partialorder %v118_v37, 0.0  ;;  %v703_v49 = vpack.c.bf16 %v437_v48, %v433_v47  ;;  %v334_v51 = vmul.f32 0.2, %v118_v37  ;;  %vm223_vm11 = vcmp.ge.f32.partialorder %v115_v41, 0.0 }
  0x5f   :  { %v440_v50 = vsel %vm224_vm9, %v116_v33, %v332_v44  ;;  %652 = vmatpush1.bf16.msra.mxu0 %v651_v46  ;;  %v331_v52 = vmul.f32 0.2, %v115_v41  ;;  %vm225_vm12 = vcmp.ge.f32.partialorder %v117_v45, 0.0  ;;  %v333_v53 = vmul.f32 0.2, %v117_v45 }
  0x60   :  { %704 = vmatpush1.bf16.msra.mxu1 %v703_v49  ;;  %501 = vmatprep.subr.mxu0 %v440_v50  ;;  %v442_v54 = vsel %vm226_vm10, %v118_v37, %v334_v51 }
  0x61   :  { %572 = vmatprep.subr.mxu1 %v442_v54  ;;  %v439_v55 = vsel %vm223_vm11, %v115_v41, %v331_v52  ;;  %v441_v56 = vsel %vm225_vm12, %v117_v45, %v333_v53 }
  0x63   :  { %502 = vmatpush1.msra.mxu0 %v439_v55 }
  0x64   :  { %573 = vmatpush1.msra.mxu1 %v441_v56  ;;  %514 = vmatmul.mubr.f32.vlgmr.msra.gmra.mrb[0].mxu0 %v443_v57 }
  0x65   :  { %585 = vmatmul.mubr.f32.vlgmr.msra.gmra.mrb[0].mxu1 %v443_v57 }
 0x137   :  { %v515_v58 = vpop.f32.mrb[0].mxu0 }
 0x138   :  { %591 = vst [vmem:[%s1108_s2] sm:$0xff] %v515_v58  ;;  %v586_v59 = vpop.f32.mrb[0].mxu1  ;;  %v517_v60 = vpop.f32.mrb[1].mxu0 }
 0x139   :  { %593 = vst [vmem:[%s1108_s2 + $0x10] sm:$0xff] %v586_v59  ;;  %592 = vst [vmem:[%s1108_s2 + $0x8] sm:$0xff] %v517_v60  ;;  %v588_v61 = vpop.f32.mrb[1].mxu1 }
 0x13a   :  { %594 = vst [vmem:[%s1108_s2 + $0x18] sm:$0xff] %v588_v61 }

// kernel: wavlet_forward.24
= control target key start
LH: loop header
LB: loop body
LE: loop exit
PB: predicated region body
PF: predicated region fallthrough
CT: control target
= control target key end

     0   :  { %s1142_s1 = inlined_call_operand.vmem [shape: f32[216,512], index: 1, kind: input, shape index: {}]   ;;  %s1143_s0 = inlined_call_operand.vmem [shape: f32[8,216], index: 0, kind: input, shape index: {}]   ;;  %s1144_s2 = inlined_call_operand.vmem [shape: f32[8,512], index: 2, kind: input, shape index: {}]   ;;  %s1145_s3 = inlined_call_operand.vmem [shape: f32[8,512], index: 3, kind: output, shape index: {}]  }
   0x1   :  { %v15_v0 = vld [vmem:[%s1142_s1 + $0x8] sm:$0xff]  ;;  %v17_v2 = vld [vmem:[%s1142_s1 + $0x18] sm:$0xff]  ;;  %v14_v7 = vld [vmem:[%s1142_s1] sm:$0xff] }
   0x2   :  { %v19_v1 = vld [vmem:[%s1142_s1 + $0x28] sm:$0xff]  ;;  %vm123_vm0 = vcmp.ge.f32.partialorder %v15_v0, 0.0  ;;  %v231_v3 = vmul.f32 0.2, %v15_v0  ;;  %v21_v5 = vld [vmem:[%s1142_s1 + $0x38] sm:$0xff]  ;;  %vm125_vm2 = vcmp.ge.f32.partialorder %v17_v2, 0.0 }
   0x3   :  { %vm127_vm1 = vcmp.ge.f32.partialorder %v19_v1, 0.0  ;;  %v235_v4 = vmul.f32 0.2, %v19_v1  ;;  %v233_v6 = vmul.f32 0.2, %v17_v2  ;;  %v18_v8 = vld [vmem:[%s1142_s1 + $0x20] sm:$0xff] }
   0x4   :  { %v339_v9 = vsel %vm123_vm0, %v15_v0, %v231_v3  ;;  %vm129_vm3 = vcmp.ge.f32.partialorder %v21_v5, 0.0  ;;  %v237_v11 = vmul.f32 0.2, %v21_v5  ;;  %v16_v12 = vld [vmem:[%s1142_s1 + $0x10] sm:$0xff]  ;;  %vm122_vm4 = vcmp.ge.f32.partialorder %v14_v7, 0.0  ;;  %v23_v16 = vld [vmem:[%s1142_s1 + $0x48] sm:$0xff] }
   0x5   :  { %v343_v10 = vsel %vm127_vm1, %v19_v1, %v235_v4  ;;  %v20_v13 = vld [vmem:[%s1142_s1 + $0x30] sm:$0xff]  ;;  %v341_v15 = vsel %vm125_vm2, %v17_v2, %v233_v6  ;;  %vm126_vm5 = vcmp.ge.f32.partialorder %v18_v8, 0.0  ;;  %v27_v17 = vld [vmem:[%s1142_s1 + $0x68] sm:$0xff]  ;;  %v230_v19 = vmul.f32 0.2, %v14_v7  ;;  %v25_v21 = vld [vmem:[%s1142_s1 + $0x58] sm:$0xff] }
   0x6   :  { %v620_v14 = vpack.c.bf16 %v343_v10, %v339_v9  ;;  %v345_v18 = vsel %vm129_vm3, %v21_v5, %v237_v11  ;;  %v234_v20 = vmul.f32 0.2, %v18_v8  ;;  %vm124_vm6 = vcmp.ge.f32.partialorder %v16_v12, 0.0  ;;  %v29_v25 = vld [vmem:[%s1142_s1 + $0x78] sm:$0xff]  ;;  %v22_v28 = vld [vmem:[%s1142_s1 + $0x40] sm:$0xff]  ;;  %v24_v36 = vld [vmem:[%s1142_s1 + $0x50] sm:$0xff] }
   0x7   :  { %v672_v22 = vpack.c.bf16 %v345_v18, %v341_v15  ;;  %vm128_vm7 = vcmp.ge.f32.partialorder %v20_v13, 0.0  ;;  %v232_v23 = vmul.f32 0.2, %v16_v12  ;;  %v236_v24 = vmul.f32 0.2, %v20_v13  ;;  %v26_v33 = vld [vmem:[%s1142_s1 + $0x60] sm:$0xff] }
   0x8   :  { %621 = vmatprep.subr.bf16.mxu0 %v620_v14  ;;  %v338_v26 = vsel %vm122_vm4, %v14_v7, %v230_v19  ;;  %v342_v27 = vsel %vm126_vm5, %v18_v8, %v234_v20  ;;  %vm131_vm8 = vcmp.ge.f32.partialorder %v23_v16, 0.0  ;;  %vm135_vm9 = vcmp.ge.f32.partialorder %v27_v17, 0.0  ;;  %v28_v40 = vld [vmem:[%s1142_s1 + $0x70] sm:$0xff]  ;;  %v31_v44 = vld [vmem:[%s1142_s1 + $0x88] sm:$0xff]  ;;  %v33_v49 = vld [vmem:[%s1142_s1 + $0x98] sm:$0xff] }
   0x9   :  { %673 = vmatprep.subr.bf16.mxu1 %v672_v22  ;;  %v622_v29 = vpack.c.bf16 %v342_v27, %v338_v26  ;;  %v340_v30 = vsel %vm124_vm6, %v16_v12, %v232_v23  ;;  %v344_v31 = vsel %vm128_vm7, %v20_v13, %v236_v24  ;;  %v239_v32 = vmul.f32 0.2, %v23_v16  ;;  %v35_v48 = vld [vmem:[%s1142_s1 + $0xa8] sm:$0xff]  ;;  %v37_v53 = vld [vmem:[%s1142_s1 + $0xb8] sm:$0xff]  ;;  %v30_v54 = vld [vmem:[%s1142_s1 + $0x80] sm:$0xff] }
   0xa   :  { %v674_v34 = vpack.c.bf16 %v344_v31, %v340_v30  ;;  %v243_v35 = vmul.f32 0.2, %v27_v17  ;;  %vm133_vm10 = vcmp.ge.f32.partialorder %v25_v21, 0.0  ;;  %vm137_vm11 = vcmp.ge.f32.partialorder %v29_v25, 0.0  ;;  %v34_v58 = vld [vmem:[%s1142_s1 + $0xa0] sm:$0xff]  ;;  %v32_v0 = vld [vmem:[%s1142_s1 + $0x90] sm:$0xff] }
   0xb   :  { %623 = vmatpush1.bf16.msra.mxu0 %v622_v29  ;;  %v347_v37 = vsel %vm131_vm8, %v23_v16, %v239_v32  ;;  %v241_v38 = vmul.f32 0.2, %v25_v21  ;;  %v245_v39 = vmul.f32 0.2, %v29_v25  ;;  %vm130_vm12 = vcmp.ge.f32.partialorder %v22_v28, 0.0  ;;  %v36_v5 = vld [vmem:[%s1142_s1 + $0xb0] sm:$0xff] }
   0xc   :  { %675 = vmatpush1.bf16.msra.mxu1 %v674_v34  ;;  %v351_v41 = vsel %vm135_vm9, %v27_v17, %v243_v35  ;;  %vm134_vm13 = vcmp.ge.f32.partialorder %v26_v33, 0.0  ;;  %v238_v42 = vmul.f32 0.2, %v22_v28  ;;  %v242_v43 = vmul.f32 0.2, %v26_v33  ;;  %v39_v8 = vld [vmem:[%s1142_s1 + $0xc8] sm:$0xff] }
   0xd   :  { %v624_v45 = vpack.c.bf16 %v351_v41, %v347_v37  ;;  %v349_v46 = vsel %vm133_vm10, %v25_v21, %v241_v38  ;;  %v353_v47 = vsel %vm137_vm11, %v29_v25, %v245_v39  ;;  %vm132_vm14 = vcmp.ge.f32.partialorder %v24_v36, 0.0  ;;  %v43_v9 = vld [vmem:[%s1142_s1 + $0xe8] sm:$0xff]  ;;  %v41_v13 = vld [vmem:[%s1142_s1 + $0xd8] sm:$0xff]  ;;  %v38_v20 = vld [vmem:[%s1142_s1 + $0xc0] sm:$0xff] }
   0xe   :  { %v676_v50 = vpack.c.bf16 %v353_v47, %v349_v46  ;;  %v346_v51 = vsel %vm130_vm12, %v22_v28, %v238_v42  ;;  %v350_v52 = vsel %vm134_vm13, %v26_v33, %v242_v43  ;;  %vm136_vm15 = vcmp.ge.f32.partialorder %v28_v40, 0.0  ;;  %v45_v17 = vld [vmem:[%s1142_s1 + $0xf8] sm:$0xff]  ;;  %v42_v25 = vld [vmem:[%s1142_s1 + $0xe0] sm:$0xff]  ;;  %v40_v28 = vld [vmem:[%s1142_s1 + $0xd0] sm:$0xff] }
   0xf   :  { %625 = vmatprep.subr.bf16.mxu0 %v624_v45  ;;  %v626_v55 = vpack.c.bf16 %v350_v52, %v346_v51  ;;  %v240_v56 = vmul.f32 0.2, %v24_v36  ;;  %v244_v57 = vmul.f32 0.2, %v28_v40  ;;  %vm139_vm0 = vcmp.ge.f32.partialorder %v31_v44, 0.0  ;;  %v44_v32 = vld [vmem:[%s1142_s1 + $0xf0] sm:$0xff] }
  0x10   :  { %677 = vmatprep.subr.bf16.mxu1 %v676_v50  ;;  %vm143_vm1 = vcmp.ge.f32.partialorder %v35_v48, 0.0  ;;  %v247_v59 = vmul.f32 0.2, %v31_v44  ;;  %v251_v60 = vmul.f32 0.2, %v35_v48  ;;  %vm141_vm2 = vcmp.ge.f32.partialorder %v33_v49, 0.0 }
  0x11   :  { %627 = vmatpush1.bf16.msra.mxu0 %v626_v55  ;;  %v348_v61 = vsel %vm132_vm14, %v24_v36, %v240_v56  ;;  %v352_v62 = vsel %vm136_vm15, %v28_v40, %v244_v57  ;;  %vm145_vm3 = vcmp.ge.f32.partialorder %v37_v53, 0.0  ;;  %v249_v63 = vmul.f32 0.2, %v33_v49  ;;  %v47_v36 = vld [vmem:[%s1142_s1 + $0x108] sm:$0xff]  ;;  %v49_v41 = vld [vmem:[%s1142_s1 + $0x118] sm:$0xff]  ;;  %v46_v46 = vld [vmem:[%s1142_s1 + $0x100] sm:$0xff] }
  0x12   :  { %v678_v1 = vpack.c.bf16 %v352_v62, %v348_v61  ;;  %v355_v2 = vsel %vm139_vm0, %v31_v44, %v247_v59  ;;  %v359_v3 = vsel %vm143_vm1, %v35_v48, %v251_v60  ;;  %v253_v4 = vmul.f32 0.2, %v37_v53  ;;  %v51_v40 = vld [vmem:[%s1142_s1 + $0x128] sm:$0xff]  ;;  %v53_v45 = vld [vmem:[%s1142_s1 + $0x138] sm:$0xff]  ;;  %v50_v50 = vld [vmem:[%s1142_s1 + $0x120] sm:$0xff] }
  0x13   :  { %v628_v6 = vpack.c.bf16 %v359_v3, %v355_v2  ;;  %v357_v7 = vsel %vm141_vm2, %v33_v49, %v249_v63  ;;  %vm138_vm4 = vcmp.ge.f32.partialorder %v30_v54, 0.0  ;;  %vm142_vm5 = vcmp.ge.f32.partialorder %v34_v58, 0.0  ;;  %v48_v56 = vld [vmem:[%s1142_s1 + $0x110] sm:$0xff] }
  0x14   :  { %679 = vmatpush1.bf16.msra.mxu1 %v678_v1  ;;  %v361_v10 = vsel %vm145_vm3, %v37_v53, %v253_v4  ;;  %v246_v11 = vmul.f32 0.2, %v30_v54  ;;  %v250_v12 = vmul.f32 0.2, %v34_v58  ;;  %vm140_vm6 = vcmp.ge.f32.partialorder %v32_v0, 0.0  ;;  %v52_v61 = vld [vmem:[%s1142_s1 + $0x130] sm:$0xff] }
  0x15   :  { %629 = vmatprep.subr.bf16.mxu0 %v628_v6  ;;  %v680_v14 = vpack.c.bf16 %v361_v10, %v357_v7  ;;  %vm144_vm7 = vcmp.ge.f32.partialorder %v36_v5, 0.0  ;;  %v248_v15 = vmul.f32 0.2, %v32_v0  ;;  %v252_v16 = vmul.f32 0.2, %v36_v5  ;;  %v59_v1 = vld [vmem:[%s1142_s1 + $0x168] sm:$0xff] }
  0x16   :  { %v354_v18 = vsel %vm138_vm4, %v30_v54, %v246_v11  ;;  %v358_v19 = vsel %vm142_vm5, %v34_v58, %v250_v12  ;;  %vm147_vm8 = vcmp.ge.f32.partialorder %v39_v8, 0.0  ;;  %vm151_vm9 = vcmp.ge.f32.partialorder %v43_v9, 0.0  ;;  %v54_v12 = vld [vmem:[%s1142_s1 + $0x140] sm:$0xff] }
  0x17   :  { %681 = vmatprep.subr.bf16.mxu1 %v680_v14  ;;  %v630_v21 = vpack.c.bf16 %v358_v19, %v354_v18  ;;  %v356_v22 = vsel %vm140_vm6, %v32_v0, %v248_v15  ;;  %v360_v23 = vsel %vm144_vm7, %v36_v5, %v252_v16  ;;  %v255_v24 = vmul.f32 0.2, %v39_v8  ;;  %v55_v0 = vld [vmem:[%s1142_s1 + $0x148] sm:$0xff]  ;;  %v57_v5 = vld [vmem:[%s1142_s1 + $0x158] sm:$0xff] }
  0x18   :  { %v682_v26 = vpack.c.bf16 %v360_v23, %v356_v22  ;;  %v259_v27 = vmul.f32 0.2, %v43_v9  ;;  %vm149_vm10 = vcmp.ge.f32.partialorder %v41_v13, 0.0  ;;  %vm153_vm11 = vcmp.ge.f32.partialorder %v45_v17, 0.0 }
  0x19   :  { %631 = vmatpush1.bf16.msra.mxu0 %v630_v21  ;;  %v363_v29 = vsel %vm147_vm8, %v39_v8, %v255_v24  ;;  %v257_v30 = vmul.f32 0.2, %v41_v13  ;;  %v261_v31 = vmul.f32 0.2, %v45_v17  ;;  %vm146_vm12 = vcmp.ge.f32.partialorder %v38_v20, 0.0  ;;  %v60_v24 = vld [vmem:[%s1142_s1 + $0x170] sm:$0xff] }
  0x1a   :  { %683 = vmatpush1.bf16.msra.mxu1 %v682_v26  ;;  %v367_v33 = vsel %vm151_vm9, %v43_v9, %v259_v27  ;;  %vm150_vm13 = vcmp.ge.f32.partialorder %v42_v25, 0.0  ;;  %v254_v34 = vmul.f32 0.2, %v38_v20  ;;  %v258_v35 = vmul.f32 0.2, %v42_v25  ;;  %v61_v9 = vld [vmem:[%s1142_s1 + $0x178] sm:$0xff] }
  0x1b   :  { %v632_v37 = vpack.c.bf16 %v367_v33, %v363_v29  ;;  %v365_v38 = vsel %vm149_vm10, %v41_v13, %v257_v30  ;;  %v369_v39 = vsel %vm153_vm11, %v45_v17, %v261_v31  ;;  %vm148_vm14 = vcmp.ge.f32.partialorder %v40_v28, 0.0  ;;  %v58_v17 = vld [vmem:[%s1142_s1 + $0x160] sm:$0xff]  ;;  %v65_v33 = vld [vmem:[%s1142_s1 + $0x198] sm:$0xff] }
  0x1c   :  { %v684_v42 = vpack.c.bf16 %v369_v39, %v365_v38  ;;  %v362_v43 = vsel %vm146_vm12, %v38_v20, %v254_v34  ;;  %v366_v44 = vsel %vm150_vm13, %v42_v25, %v258_v35  ;;  %vm152_vm15 = vcmp.ge.f32.partialorder %v44_v32, 0.0  ;;  %v56_v20 = vld [vmem:[%s1142_s1 + $0x150] sm:$0xff]  ;;  %v62_v38 = vld [vmem:[%s1142_s1 + $0x180] sm:$0xff] }
  0x1d   :  { %633 = vmatprep.subr.bf16.mxu0 %v632_v37  ;;  %v634_v47 = vpack.c.bf16 %v366_v44, %v362_v43  ;;  %v256_v48 = vmul.f32 0.2, %v40_v28  ;;  %v260_v49 = vmul.f32 0.2, %v44_v32  ;;  %vm155_vm0 = vcmp.ge.f32.partialorder %v47_v36, 0.0  ;;  %v69_v37 = vld [vmem:[%s1142_s1 + $0x1b8] sm:$0xff] }
  0x1e   :  { %685 = vmatprep.subr.bf16.mxu1 %v684_v42  ;;  %vm159_vm1 = vcmp.ge.f32.partialorder %v51_v40, 0.0  ;;  %v263_v51 = vmul.f32 0.2, %v47_v36  ;;  %v267_v52 = vmul.f32 0.2, %v51_v40  ;;  %vm157_vm2 = vcmp.ge.f32.partialorder %v49_v41, 0.0 }
  0x1f   :  { %635 = vmatpush1.bf16.msra.mxu0 %v634_v47  ;;  %v364_v53 = vsel %vm148_vm14, %v40_v28, %v256_v48  ;;  %v368_v54 = vsel %vm152_vm15, %v44_v32, %v260_v49  ;;  %vm161_vm3 = vcmp.ge.f32.partialorder %v53_v45, 0.0  ;;  %v265_v55 = vmul.f32 0.2, %v49_v41  ;;  %v63_v28 = vld [vmem:[%s1142_s1 + $0x188] sm:$0xff]  ;;  %v66_v42 = vld [vmem:[%s1142_s1 + $0x1a0] sm:$0xff]  ;;  %v64_v48 = vld [vmem:[%s1142_s1 + $0x190] sm:$0xff] }
  0x20   :  { %v686_v57 = vpack.c.bf16 %v368_v54, %v364_v53  ;;  %v371_v58 = vsel %vm155_vm0, %v47_v36, %v263_v51  ;;  %v375_v59 = vsel %vm159_vm1, %v51_v40, %v267_v52  ;;  %v269_v60 = vmul.f32 0.2, %v53_v45  ;;  %v67_v32 = vld [vmem:[%s1142_s1 + $0x1a8] sm:$0xff]  ;;  %v68_v53 = vld [vmem:[%s1142_s1 + $0x1b0] sm:$0xff] }
  0x21   :  { %v636_v62 = vpack.c.bf16 %v375_v59, %v371_v58  ;;  %v373_v63 = vsel %vm157_vm2, %v49_v41, %v265_v55  ;;  %vm154_vm4 = vcmp.ge.f32.partialorder %v46_v46, 0.0  ;;  %vm158_vm5 = vcmp.ge.f32.partialorder %v50_v50, 0.0 }
  0x22   :  { %687 = vmatpush1.bf16.msra.mxu1 %v686_v57  ;;  %v377_v2 = vsel %vm161_vm3, %v53_v45, %v269_v60  ;;  %v262_v3 = vmul.f32 0.2, %v46_v46  ;;  %v266_v4 = vmul.f32 0.2, %v50_v50  ;;  %vm156_vm6 = vcmp.ge.f32.partialorder %v48_v56, 0.0  ;;  %v75_v57 = vld [vmem:[%s1142_s1 + $0x1e8] sm:$0xff] }
  0x23   :  { %637 = vmatprep.subr.bf16.mxu0 %v636_v62  ;;  %v688_v6 = vpack.c.bf16 %v377_v2, %v373_v63  ;;  %vm160_vm7 = vcmp.ge.f32.partialorder %v52_v61, 0.0  ;;  %v264_v7 = vmul.f32 0.2, %v48_v56  ;;  %v268_v8 = vmul.f32 0.2, %v52_v61 }
  0x24   :  { %v370_v10 = vsel %vm154_vm4, %v46_v46, %v262_v3  ;;  %v374_v11 = vsel %vm158_vm5, %v50_v50, %v266_v4  ;;  %vm163_vm8 = vcmp.ge.f32.partialorder %v55_v0, 0.0  ;;  %vm167_vm9 = vcmp.ge.f32.partialorder %v59_v1, 0.0  ;;  %v70_v4 = vld [vmem:[%s1142_s1 + $0x1c0] sm:$0xff] }
  0x25   :  { %689 = vmatprep.subr.bf16.mxu1 %v688_v6  ;;  %v638_v13 = vpack.c.bf16 %v374_v11, %v370_v10  ;;  %v372_v14 = vsel %vm156_vm6, %v48_v56, %v264_v7  ;;  %v376_v15 = vsel %vm160_vm7, %v52_v61, %v268_v8  ;;  %v271_v16 = vmul.f32 0.2, %v55_v0  ;;  %v71_v56 = vld [vmem:[%s1142_s1 + $0x1c8] sm:$0xff]  ;;  %v73_v61 = vld [vmem:[%s1142_s1 + $0x1d8] sm:$0xff] }
  0x26   :  { %v690_v18 = vpack.c.bf16 %v376_v15, %v372_v14  ;;  %v275_v19 = vmul.f32 0.2, %v59_v1  ;;  %vm165_vm10 = vcmp.ge.f32.partialorder %v57_v5, 0.0  ;;  %vm169_vm11 = vcmp.ge.f32.partialorder %v61_v9, 0.0 }
  0x27   :  { %639 = vmatpush1.bf16.msra.mxu0 %v638_v13  ;;  %v379_v21 = vsel %vm163_vm8, %v55_v0, %v271_v16  ;;  %v273_v22 = vmul.f32 0.2, %v57_v5  ;;  %v277_v23 = vmul.f32 0.2, %v61_v9  ;;  %vm162_vm12 = vcmp.ge.f32.partialorder %v54_v12, 0.0  ;;  %v76_v13 = vld [vmem:[%s1142_s1 + $0x1f0] sm:$0xff] }
  0x28   :  { %691 = vmatpush1.bf16.msra.mxu1 %v690_v18  ;;  %v383_v25 = vsel %vm167_vm9, %v59_v1, %v275_v19  ;;  %vm166_vm13 = vcmp.ge.f32.partialorder %v58_v17, 0.0  ;;  %v270_v26 = vmul.f32 0.2, %v54_v12  ;;  %v274_v27 = vmul.f32 0.2, %v58_v17  ;;  %v77_v1 = vld [vmem:[%s1142_s1 + $0x1f8] sm:$0xff] }
  0x29   :  { %v640_v29 = vpack.c.bf16 %v383_v25, %v379_v21  ;;  %v381_v30 = vsel %vm165_vm10, %v57_v5, %v273_v22  ;;  %v385_v31 = vsel %vm169_vm11, %v61_v9, %v277_v23  ;;  %vm164_vm14 = vcmp.ge.f32.partialorder %v56_v20, 0.0  ;;  %v74_v9 = vld [vmem:[%s1142_s1 + $0x1e0] sm:$0xff]  ;;  %v447_v21 = vld [vmem:[%s1143_s0 + $0x8] sm:$0xff] }
  0x2a   :  { %v692_v34 = vpack.c.bf16 %v385_v31, %v381_v30  ;;  %v378_v35 = vsel %vm162_vm12, %v54_v12, %v270_v26  ;;  %v382_v36 = vsel %vm166_vm13, %v58_v17, %v274_v27  ;;  %vm168_vm15 = vcmp.ge.f32.partialorder %v60_v24, 0.0  ;;  %v72_v12 = vld [vmem:[%s1142_s1 + $0x1d0] sm:$0xff]  ;;  %v79_v17 = vld [vmem:[%s1142_s1 + $0x208] sm:$0xff]  ;;  %v81_v26 = vld [vmem:[%s1142_s1 + $0x218] sm:$0xff] }
  0x2b   :  { %641 = vmatprep.subr.bf16.mxu0 %v640_v29  ;;  %v642_v39 = vpack.c.bf16 %v382_v36, %v378_v35  ;;  %v272_v40 = vmul.f32 0.2, %v56_v20  ;;  %v276_v41 = vmul.f32 0.2, %v60_v24  ;;  %vm171_vm0 = vcmp.ge.f32.partialorder %v63_v28, 0.0  ;;  %v83_v25 = vld [vmem:[%s1142_s1 + $0x228] sm:$0xff] }
  0x2c   :  { %693 = vmatprep.subr.bf16.mxu1 %v692_v34  ;;  %vm175_vm1 = vcmp.ge.f32.partialorder %v67_v32, 0.0  ;;  %v279_v43 = vmul.f32 0.2, %v63_v28  ;;  %v283_v44 = vmul.f32 0.2, %v67_v32  ;;  %vm173_vm2 = vcmp.ge.f32.partialorder %v65_v33, 0.0 }
  0x2d   :  { %vm452_vm3 = vcmask 719872   ;;  %643 = vmatpush1.bf16.msra.mxu0 %v642_v39  ;;  %v380_v45 = vsel %vm164_vm14, %v56_v20, %v272_v40  ;;  %v384_v46 = vsel %vm168_vm15, %v60_v24, %v276_v41  ;;  %vm177_vm4 = vcmp.ge.f32.partialorder %v69_v37, 0.0  ;;  %v85_v30 = vld [vmem:[%s1142_s1 + $0x238] sm:$0xff]  ;;  %v78_v31 = vld [vmem:[%s1142_s1 + $0x200] sm:$0xff]  ;;  %v80_v41 = vld [vmem:[%s1142_s1 + $0x210] sm:$0xff] }
  0x2e   :  { %v281_v47 = vmul.f32 0.2, %v65_v33  ;;  %v694_v49 = vpack.c.bf16 %v384_v46, %v380_v45  ;;  %v387_v50 = vsel %vm171_vm0, %v63_v28, %v279_v43  ;;  %v391_v51 = vsel %vm175_vm1, %v67_v32, %v283_v44  ;;  %618 = vmatprep.mubr.msk.f32.mxu0 %vm452_vm3, %v447_v21  ;;  %619 = vmatprep.mubr.msk.f32.mxu1 %vm452_vm3, %v447_v21  ;;  %v82_v35 = vld [vmem:[%s1142_s1 + $0x220] sm:$0xff]  ;;  %v84_v46 = vld [vmem:[%s1142_s1 + $0x230] sm:$0xff] }
  0x2f   :  { %v285_v52 = vmul.f32 0.2, %v69_v37  ;;  %v644_v54 = vpack.c.bf16 %v391_v51, %v387_v50  ;;  %vm170_vm5 = vcmp.ge.f32.partialorder %v62_v38, 0.0  ;;  %vm174_vm6 = vcmp.ge.f32.partialorder %v66_v42, 0.0  ;;  %v91_v50 = vld [vmem:[%s1142_s1 + $0x268] sm:$0xff] }
  0x30   :  { %v389_v55 = vsel %vm173_vm2, %v65_v33, %v281_v47  ;;  %695 = vmatpush1.bf16.msra.mxu1 %v694_v49  ;;  %v278_v59 = vmul.f32 0.2, %v62_v38  ;;  %v282_v60 = vmul.f32 0.2, %v66_v42  ;;  %vm172_vm7 = vcmp.ge.f32.partialorder %v64_v48, 0.0  ;;  %v87_v49 = vld [vmem:[%s1142_s1 + $0x248] sm:$0xff] }
  0x31   :  { %v393_v58 = vsel %vm177_vm4, %v69_v37, %v285_v52  ;;  %645 = vmatprep.subr.bf16.mxu0 %v644_v54  ;;  %vm176_vm8 = vcmp.ge.f32.partialorder %v68_v53, 0.0  ;;  %v280_v63 = vmul.f32 0.2, %v64_v48  ;;  %v284_v0 = vmul.f32 0.2, %v68_v53  ;;  %v89_v54 = vld [vmem:[%s1142_s1 + $0x258] sm:$0xff] }
  0x32   :  { %v696_v62 = vpack.c.bf16 %v393_v58, %v389_v55  ;;  %v386_v2 = vsel %vm170_vm5, %v62_v38, %v278_v59  ;;  %v390_v3 = vsel %vm174_vm6, %v66_v42, %v282_v60  ;;  %vm179_vm9 = vcmp.ge.f32.partialorder %v71_v56, 0.0  ;;  %v93_v58 = vld [vmem:[%s1142_s1 + $0x278] sm:$0xff] }
  0x33   :  { %vm183_vm10 = vcmp.ge.f32.partialorder %v75_v57, 0.0  ;;  %v646_v5 = vpack.c.bf16 %v390_v3, %v386_v2  ;;  %v388_v6 = vsel %vm172_vm7, %v64_v48, %v280_v63  ;;  %v392_v7 = vsel %vm176_vm8, %v68_v53, %v284_v0  ;;  %v90_v2 = vld [vmem:[%s1142_s1 + $0x260] sm:$0xff] }
  0x34   :  { %697 = vmatprep.subr.bf16.mxu1 %v696_v62  ;;  %v287_v8 = vmul.f32 0.2, %v71_v56  ;;  %v698_v10 = vpack.c.bf16 %v392_v7, %v388_v6  ;;  %v291_v11 = vmul.f32 0.2, %v75_v57  ;;  %vm181_vm11 = vcmp.ge.f32.partialorder %v73_v61, 0.0 }
  0x35   :  { %vm185_vm12 = vcmp.ge.f32.partialorder %v77_v1, 0.0  ;;  %647 = vmatpush1.bf16.msra.mxu0 %v646_v5  ;;  %v289_v15 = vmul.f32 0.2, %v73_v61  ;;  %v293_v16 = vmul.f32 0.2, %v77_v1  ;;  %vm178_vm13 = vcmp.ge.f32.partialorder %v70_v4, 0.0 }
  0x36   :  { %v395_v14 = vsel %vm179_vm9, %v71_v56, %v287_v8  ;;  %699 = vmatpush1.bf16.msra.mxu1 %v698_v10  ;;  %v399_v18 = vsel %vm183_vm10, %v75_v57, %v291_v11  ;;  %vm182_vm14 = vcmp.ge.f32.partialorder %v74_v9, 0.0  ;;  %v286_v19 = vmul.f32 0.2, %v70_v4  ;;  %v88_v5 = vld [vmem:[%s1142_s1 + $0x250] sm:$0xff] }
  0x37   :  { %v290_v20 = vmul.f32 0.2, %v74_v9  ;;  %v648_v22 = vpack.c.bf16 %v399_v18, %v395_v14  ;;  %v397_v23 = vsel %vm181_vm11, %v73_v61, %v289_v15  ;;  %v401_v24 = vsel %vm185_vm12, %v77_v1, %v293_v16  ;;  %v86_v61 = vld [vmem:[%s1142_s1 + $0x240] sm:$0xff]  ;;  %v97_v18 = vld [vmem:[%s1142_s1 + $0x298] sm:$0xff] }
  0x38   :  { %vm180_vm15 = vcmp.ge.f32.partialorder %v72_v12, 0.0  ;;  %v700_v27 = vpack.c.bf16 %v401_v24, %v397_v23  ;;  %v394_v28 = vsel %vm178_vm13, %v70_v4, %v286_v19  ;;  %vm184_vm0 = vcmp.ge.f32.partialorder %v76_v13, 0.0  ;;  %v94_v23 = vld [vmem:[%s1142_s1 + $0x280] sm:$0xff] }
  0x39   :  { %v398_v29 = vsel %vm182_vm14, %v74_v9, %v290_v20  ;;  %649 = vmatprep.subr.bf16.mxu0 %v648_v22  ;;  %v288_v33 = vmul.f32 0.2, %v72_v12  ;;  %v292_v34 = vmul.f32 0.2, %v76_v13  ;;  %vm187_vm1 = vcmp.ge.f32.partialorder %v79_v17, 0.0  ;;  %v92_v9 = vld [vmem:[%s1142_s1 + $0x270] sm:$0xff] }
  0x3a   :  { %v650_v32 = vpack.c.bf16 %v398_v29, %v394_v28  ;;  %701 = vmatprep.subr.bf16.mxu1 %v700_v27  ;;  %vm191_vm2 = vcmp.ge.f32.partialorder %v83_v25, 0.0  ;;  %v295_v36 = vmul.f32 0.2, %v79_v17  ;;  %v299_v37 = vmul.f32 0.2, %v83_v25  ;;  %v101_v22 = vld [vmem:[%s1142_s1 + $0x2b8] sm:$0xff] }
  0x3b   :  { %vm189_vm3 = vcmp.ge.f32.partialorder %v81_v26, 0.0  ;;  %v396_v38 = vsel %vm180_vm15, %v72_v12, %v288_v33  ;;  %v400_v39 = vsel %vm184_vm0, %v76_v13, %v292_v34  ;;  %vm193_vm4 = vcmp.ge.f32.partialorder %v85_v30, 0.0  ;;  %v95_v13 = vld [vmem:[%s1142_s1 + $0x288] sm:$0xff]  ;;  %v98_v27 = vld [vmem:[%s1142_s1 + $0x2a0] sm:$0xff]  ;;  %v96_v33 = vld [vmem:[%s1142_s1 + $0x290] sm:$0xff] }
  0x3c   :  { %651 = vmatpush1.bf16.msra.mxu0 %v650_v32  ;;  %v297_v40 = vmul.f32 0.2, %v81_v26  ;;  %v702_v42 = vpack.c.bf16 %v400_v39, %v396_v38  ;;  %v403_v43 = vsel %vm187_vm1, %v79_v17, %v295_v36  ;;  %v407_v44 = vsel %vm191_vm2, %v83_v25, %v299_v37  ;;  %v99_v17 = vld [vmem:[%s1142_s1 + $0x2a8] sm:$0xff]  ;;  %v100_v38 = vld [vmem:[%s1142_s1 + $0x2b0] sm:$0xff] }
  0x3d   :  { %v301_v45 = vmul.f32 0.2, %v85_v30  ;;  %v652_v47 = vpack.c.bf16 %v407_v44, %v403_v43  ;;  %vm186_vm5 = vcmp.ge.f32.partialorder %v78_v31, 0.0  ;;  %vm190_vm6 = vcmp.ge.f32.partialorder %v82_v35, 0.0 }
  0x3e   :  { %v405_v48 = vsel %vm189_vm3, %v81_v26, %v297_v40  ;;  %703 = vmatpush1.bf16.msra.mxu1 %v702_v42  ;;  %v294_v52 = vmul.f32 0.2, %v78_v31  ;;  %v298_v53 = vmul.f32 0.2, %v82_v35  ;;  %vm188_vm7 = vcmp.ge.f32.partialorder %v80_v41, 0.0  ;;  %v107_v42 = vld [vmem:[%s1142_s1 + $0x2e8] sm:$0xff] }
  0x3f   :  { %v409_v51 = vsel %vm193_vm4, %v85_v30, %v301_v45  ;;  %653 = vmatprep.subr.bf16.mxu0 %v652_v47  ;;  %vm192_vm8 = vcmp.ge.f32.partialorder %v84_v46, 0.0  ;;  %v296_v56 = vmul.f32 0.2, %v80_v41  ;;  %v300_v57 = vmul.f32 0.2, %v84_v46 }
  0x40   :  { %v704_v55 = vpack.c.bf16 %v409_v51, %v405_v48  ;;  %v402_v59 = vsel %vm186_vm5, %v78_v31, %v294_v52  ;;  %v406_v60 = vsel %vm190_vm6, %v82_v35, %v298_v53  ;;  %vm195_vm9 = vcmp.ge.f32.partialorder %v87_v49, 0.0  ;;  %v102_v53 = vld [vmem:[%s1142_s1 + $0x2c0] sm:$0xff] }
  0x41   :  { %vm199_vm10 = vcmp.ge.f32.partialorder %v91_v50, 0.0  ;;  %v654_v62 = vpack.c.bf16 %v406_v60, %v402_v59  ;;  %v404_v63 = vsel %vm188_vm7, %v80_v41, %v296_v56  ;;  %v408_v0 = vsel %vm192_vm8, %v84_v46, %v300_v57  ;;  %v103_v41 = vld [vmem:[%s1142_s1 + $0x2c8] sm:$0xff]  ;;  %v105_v46 = vld [vmem:[%s1142_s1 + $0x2d8] sm:$0xff] }
  0x42   :  { %705 = vmatprep.subr.bf16.mxu1 %v704_v55  ;;  %v303_v1 = vmul.f32 0.2, %v87_v49  ;;  %v706_v3 = vpack.c.bf16 %v408_v0, %v404_v63  ;;  %v307_v4 = vmul.f32 0.2, %v91_v50  ;;  %vm197_vm11 = vcmp.ge.f32.partialorder %v89_v54, 0.0 }
  0x43   :  { %vm201_vm12 = vcmp.ge.f32.partialorder %v93_v58, 0.0  ;;  %655 = vmatpush1.bf16.msra.mxu0 %v654_v62  ;;  %v305_v7 = vmul.f32 0.2, %v89_v54  ;;  %v309_v8 = vmul.f32 0.2, %v93_v58  ;;  %vm194_vm13 = vcmp.ge.f32.partialorder %v86_v61, 0.0 }
  0x44   :  { %v411_v6 = vsel %vm195_vm9, %v87_v49, %v303_v1  ;;  %707 = vmatpush1.bf16.msra.mxu1 %v706_v3  ;;  %v415_v10 = vsel %vm199_vm10, %v91_v50, %v307_v4  ;;  %vm198_vm14 = vcmp.ge.f32.partialorder %v90_v2, 0.0  ;;  %v302_v11 = vmul.f32 0.2, %v86_v61  ;;  %v109_v50 = vld [vmem:[%s1142_s1 + $0x2f8] sm:$0xff]  ;;  %v108_v1 = vld [vmem:[%s1142_s1 + $0x2f0] sm:$0xff] }
  0x45   :  { %v306_v12 = vmul.f32 0.2, %v90_v2  ;;  %v656_v14 = vpack.c.bf16 %v415_v10, %v411_v6  ;;  %v413_v15 = vsel %vm197_vm11, %v89_v54, %v305_v7  ;;  %v417_v16 = vsel %vm201_vm12, %v93_v58, %v309_v8  ;;  %v106_v58 = vld [vmem:[%s1142_s1 + $0x2e0] sm:$0xff]  ;;  %v113_v10 = vld [vmem:[%s1142_s1 + $0x318] sm:$0xff] }
  0x46   :  { %vm196_vm15 = vcmp.ge.f32.partialorder %v88_v5, 0.0  ;;  %v708_v19 = vpack.c.bf16 %v417_v16, %v413_v15  ;;  %v410_v20 = vsel %vm194_vm13, %v86_v61, %v302_v11  ;;  %vm200_vm0 = vcmp.ge.f32.partialorder %v92_v9, 0.0  ;;  %v104_v61 = vld [vmem:[%s1142_s1 + $0x2d0] sm:$0xff]  ;;  %v110_v15 = vld [vmem:[%s1142_s1 + $0x300] sm:$0xff] }
  0x47   :  { %v414_v21 = vsel %vm198_vm14, %v90_v2, %v306_v12  ;;  %657 = vmatprep.subr.bf16.mxu0 %v656_v14  ;;  %v304_v25 = vmul.f32 0.2, %v88_v5  ;;  %v308_v26 = vmul.f32 0.2, %v92_v9  ;;  %vm203_vm1 = vcmp.ge.f32.partialorder %v95_v13, 0.0  ;;  %v117_v14 = vld [vmem:[%s1142_s1 + $0x338] sm:$0xff] }
  0x48   :  { %v658_v24 = vpack.c.bf16 %v414_v21, %v410_v20  ;;  %709 = vmatprep.subr.bf16.mxu1 %v708_v19  ;;  %vm207_vm2 = vcmp.ge.f32.partialorder %v99_v17, 0.0  ;;  %v311_v28 = vmul.f32 0.2, %v95_v13  ;;  %v315_v29 = vmul.f32 0.2, %v99_v17  ;;  %v114_v19 = vld [vmem:[%s1142_s1 + $0x320] sm:$0xff] }
  0x49   :  { %vm205_vm3 = vcmp.ge.f32.partialorder %v97_v18, 0.0  ;;  %v412_v30 = vsel %vm196_vm15, %v88_v5, %v304_v25  ;;  %v416_v31 = vsel %vm200_vm0, %v92_v9, %v308_v26  ;;  %vm209_vm4 = vcmp.ge.f32.partialorder %v101_v22, 0.0  ;;  %v111_v5 = vld [vmem:[%s1142_s1 + $0x308] sm:$0xff]  ;;  %v112_v25 = vld [vmem:[%s1142_s1 + $0x310] sm:$0xff] }
  0x4a   :  { %659 = vmatpush1.bf16.msra.mxu0 %v658_v24  ;;  %v313_v32 = vmul.f32 0.2, %v97_v18  ;;  %v710_v34 = vpack.c.bf16 %v416_v31, %v412_v30  ;;  %v419_v35 = vsel %vm203_vm1, %v95_v13, %v311_v28  ;;  %v423_v36 = vsel %vm207_vm2, %v99_v17, %v315_v29  ;;  %v115_v9 = vld [vmem:[%s1142_s1 + $0x328] sm:$0xff]  ;;  %v116_v30 = vld [vmem:[%s1142_s1 + $0x330] sm:$0xff] }
  0x4b   :  { %v317_v37 = vmul.f32 0.2, %v101_v22  ;;  %v660_v39 = vpack.c.bf16 %v423_v36, %v419_v35  ;;  %vm202_vm5 = vcmp.ge.f32.partialorder %v94_v23, 0.0  ;;  %vm206_vm6 = vcmp.ge.f32.partialorder %v98_v27, 0.0 }
  0x4c   :  { %v421_v40 = vsel %vm205_vm3, %v97_v18, %v313_v32  ;;  %711 = vmatpush1.bf16.msra.mxu1 %v710_v34  ;;  %v310_v44 = vmul.f32 0.2, %v94_v23  ;;  %v314_v45 = vmul.f32 0.2, %v98_v27  ;;  %vm204_vm7 = vcmp.ge.f32.partialorder %v96_v33, 0.0 }
  0x4d   :  { %v425_v43 = vsel %vm209_vm4, %v101_v22, %v317_v37  ;;  %661 = vmatprep.subr.bf16.mxu0 %v660_v39  ;;  %vm208_vm8 = vcmp.ge.f32.partialorder %v100_v38, 0.0  ;;  %v312_v48 = vmul.f32 0.2, %v96_v33  ;;  %v316_v49 = vmul.f32 0.2, %v100_v38  ;;  %v121_v37 = vld [vmem:[%s1142_s1 + $0x358] sm:$0xff] }
  0x4e   :  { %v712_v47 = vpack.c.bf16 %v425_v43, %v421_v40  ;;  %v418_v51 = vsel %vm202_vm5, %v94_v23, %v310_v44  ;;  %v422_v52 = vsel %vm206_vm6, %v98_v27, %v314_v45  ;;  %vm211_vm9 = vcmp.ge.f32.partialorder %v103_v41, 0.0  ;;  %v120_v45 = vld [vmem:[%s1142_s1 + $0x350] sm:$0xff] }
  0x4f   :  { %vm215_vm10 = vcmp.ge.f32.partialorder %v107_v42, 0.0  ;;  %v662_v54 = vpack.c.bf16 %v422_v52, %v418_v51  ;;  %v420_v55 = vsel %vm204_vm7, %v96_v33, %v312_v48  ;;  %v424_v56 = vsel %vm208_vm8, %v100_v38, %v316_v49  ;;  %v119_v33 = vld [vmem:[%s1142_s1 + $0x348] sm:$0xff] }
  0x50   :  { %713 = vmatprep.subr.bf16.mxu1 %v712_v47  ;;  %v319_v57 = vmul.f32 0.2, %v103_v41  ;;  %v714_v59 = vpack.c.bf16 %v424_v56, %v420_v55  ;;  %v323_v60 = vmul.f32 0.2, %v107_v42  ;;  %vm213_vm11 = vcmp.ge.f32.partialorder %v105_v46, 0.0 }
  0x51   :  { %vm217_vm12 = vcmp.ge.f32.partialorder %v109_v50, 0.0  ;;  %663 = vmatpush1.bf16.msra.mxu0 %v662_v54  ;;  %v321_v63 = vmul.f32 0.2, %v105_v46  ;;  %v325_v0 = vmul.f32 0.2, %v109_v50  ;;  %vm210_vm13 = vcmp.ge.f32.partialorder %v102_v53, 0.0 }
  0x52   :  { %v427_v62 = vsel %vm211_vm9, %v103_v41, %v319_v57  ;;  %715 = vmatpush1.bf16.msra.mxu1 %v714_v59  ;;  %v431_v2 = vsel %vm215_vm10, %v107_v42, %v323_v60  ;;  %vm214_vm14 = vcmp.ge.f32.partialorder %v106_v58, 0.0  ;;  %v318_v3 = vmul.f32 0.2, %v102_v53  ;;  %v118_v41 = vld [vmem:[%s1142_s1 + $0x340] sm:$0xff]  ;;  %v450_v59 = vld [vmem:[%s1144_s2 + $0x10] sm:$0xff]  ;;  %v449_v60 = vld [vmem:[%s1144_s2 + $0x8] sm:$0xff] }
  0x53   :  { %v322_v4 = vmul.f32 0.2, %v106_v58  ;;  %v664_v6 = vpack.c.bf16 %v431_v2, %v427_v62  ;;  %v429_v7 = vsel %vm213_vm11, %v105_v46, %v321_v63  ;;  %v433_v8 = vsel %vm217_vm12, %v109_v50, %v325_v0  ;;  %v446_v57 = vld [vmem:[%s1143_s0] sm:$0xff]  ;;  %v451_v62 = vld [vmem:[%s1144_s2 + $0x18] sm:$0xff] }
  0x54   :  { %vm212_vm15 = vcmp.ge.f32.partialorder %v104_v61, 0.0  ;;  %v716_v11 = vpack.c.bf16 %v433_v8, %v429_v7  ;;  %v426_v12 = vsel %vm210_vm13, %v102_v53, %v318_v3  ;;  %vm216_vm0 = vcmp.ge.f32.partialorder %v108_v1, 0.0 }
  0x55   :  { %v430_v13 = vsel %vm214_vm14, %v106_v58, %v322_v4  ;;  %665 = vmatprep.subr.bf16.mxu0 %v664_v6  ;;  %v320_v17 = vmul.f32 0.2, %v104_v61  ;;  %v324_v18 = vmul.f32 0.2, %v108_v1  ;;  %vm219_vm1 = vcmp.ge.f32.partialorder %v111_v5, 0.0  ;;  %v448_v58 = vld [vmem:[%s1144_s2] sm:$0xff] }
  0x56   :  { %v666_v16 = vpack.c.bf16 %v430_v13, %v426_v12  ;;  %717 = vmatprep.subr.bf16.mxu1 %v716_v11  ;;  %vm223_vm2 = vcmp.ge.f32.partialorder %v115_v9, 0.0  ;;  %v327_v20 = vmul.f32 0.2, %v111_v5  ;;  %v331_v21 = vmul.f32 0.2, %v115_v9 }
  0x57   :  { %vm221_vm3 = vcmp.ge.f32.partialorder %v113_v10, 0.0  ;;  %v428_v22 = vsel %vm212_vm15, %v104_v61, %v320_v17  ;;  %v432_v23 = vsel %vm216_vm0, %v108_v1, %v324_v18  ;;  %vm225_vm4 = vcmp.ge.f32.partialorder %v117_v14, 0.0 }
  0x58   :  { %667 = vmatpush1.bf16.msra.mxu0 %v666_v16  ;;  %v329_v24 = vmul.f32 0.2, %v113_v10  ;;  %v718_v26 = vpack.c.bf16 %v432_v23, %v428_v22  ;;  %v435_v27 = vsel %vm219_vm1, %v111_v5, %v327_v20  ;;  %v439_v28 = vsel %vm223_vm2, %v115_v9, %v331_v21 }
  0x59   :  { %v333_v29 = vmul.f32 0.2, %v117_v14  ;;  %v668_v31 = vpack.c.bf16 %v439_v28, %v435_v27  ;;  %vm218_vm5 = vcmp.ge.f32.partialorder %v110_v15, 0.0  ;;  %vm222_vm6 = vcmp.ge.f32.partialorder %v114_v19, 0.0 }
  0x5a   :  { %v437_v32 = vsel %vm221_vm3, %v113_v10, %v329_v24  ;;  %719 = vmatpush1.bf16.msra.mxu1 %v718_v26  ;;  %v326_v35 = vmul.f32 0.2, %v110_v15  ;;  %v330_v36 = vmul.f32 0.2, %v114_v19  ;;  %vm220_vm7 = vcmp.ge.f32.partialorder %v112_v25, 0.0 }
  0x5b   :  { %v441_v34 = vsel %vm225_vm4, %v117_v14, %v333_v29  ;;  %669 = vmatprep.subr.bf16.mxu0 %v668_v31  ;;  %vm224_vm8 = vcmp.ge.f32.partialorder %v116_v30, 0.0  ;;  %v328_v39 = vmul.f32 0.2, %v112_v25  ;;  %v332_v40 = vmul.f32 0.2, %v116_v30 }
  0x5c   :  { %v720_v38 = vpack.c.bf16 %v441_v34, %v437_v32  ;;  %v434_v42 = vsel %vm218_vm5, %v110_v15, %v326_v35  ;;  %v438_v43 = vsel %vm222_vm6, %v114_v19, %v330_v36  ;;  %vm227_vm9 = vcmp.ge.f32.partialorder %v119_v33, 0.0 }
  0x5d   :  { %v335_v44 = vmul.f32 0.2, %v119_v33  ;;  %v670_v46 = vpack.c.bf16 %v438_v43, %v434_v42  ;;  %v436_v47 = vsel %vm220_vm7, %v112_v25, %v328_v39  ;;  %v440_v48 = vsel %vm224_vm8, %v116_v30, %v332_v40 }
  0x5e   :  { %721 = vmatprep.subr.bf16.mxu1 %v720_v38  ;;  %vm229_vm10 = vcmp.ge.f32.partialorder %v121_v37, 0.0  ;;  %v722_v49 = vpack.c.bf16 %v440_v48, %v436_v47  ;;  %v337_v51 = vmul.f32 0.2, %v121_v37  ;;  %vm226_vm11 = vcmp.ge.f32.partialorder %v118_v41, 0.0 }
  0x5f   :  { %v443_v50 = vsel %vm227_vm9, %v119_v33, %v335_v44  ;;  %671 = vmatpush1.bf16.msra.mxu0 %v670_v46  ;;  %v334_v52 = vmul.f32 0.2, %v118_v41  ;;  %vm228_vm12 = vcmp.ge.f32.partialorder %v120_v45, 0.0  ;;  %v336_v53 = vmul.f32 0.2, %v120_v45 }
  0x60   :  { %723 = vmatpush1.bf16.msra.mxu1 %v722_v49  ;;  %508 = vmatprep.subr.mxu0 %v443_v50  ;;  %v445_v54 = vsel %vm229_vm10, %v121_v37, %v337_v51 }
  0x61   :  { %579 = vmatprep.subr.mxu1 %v445_v54  ;;  %v442_v55 = vsel %vm226_vm11, %v118_v41, %v334_v52  ;;  %v444_v56 = vsel %vm228_vm12, %v120_v45, %v336_v53 }
  0x63   :  { %509 = vmatpush1.msra.mxu0 %v442_v55 }
  0x64   :  { %580 = vmatpush1.msra.mxu1 %v444_v56  ;;  %521 = vmatmul.mubr.f32.vlgmr.msra.gmra.mrb[0].mxu0 %v446_v57 }
  0x65   :  { %592 = vmatmul.mubr.f32.vlgmr.msra.gmra.mrb[0].mxu1 %v446_v57 }
 0x137   :  { %v522_v61 = vpop.f32.mrb[0].mxu0 }
 0x138   :  { %v523_v63 = vadd.f32 %v522_v61, %v448_v58  ;;  %v593_v0 = vpop.f32.mrb[0].mxu1  ;;  %v524_v1 = vpop.f32.mrb[1].mxu0 }
 0x139   :  { %v594_v2 = vadd.f32 %v593_v0, %v450_v59  ;;  %v525_v3 = vadd.f32 %v524_v1, %v449_v60  ;;  %v595_v4 = vpop.f32.mrb[1].mxu1 }
 0x13a   :  { %vm598_vm13 = vcmp.ge.f32.partialorder %v523_v63, 0.0  ;;  %v602_v5 = vmul.f32 0.2, %v523_v63  ;;  %v596_v6 = vadd.f32 %v595_v4, %v451_v62 }
 0x13b   :  { %vm600_vm14 = vcmp.ge.f32.partialorder %v594_v2, 0.0  ;;  %v604_v7 = vmul.f32 0.2, %v594_v2  ;;  %vm599_vm15 = vcmp.ge.f32.partialorder %v525_v3, 0.0  ;;  %v603_v8 = vmul.f32 0.2, %v525_v3 }
 0x13c   :  { %v606_v9 = vsel %vm598_vm13, %v523_v63, %v602_v5  ;;  %vm601_vm0 = vcmp.ge.f32.partialorder %v596_v6, 0.0  ;;  %v605_v10 = vmul.f32 0.2, %v596_v6 }
 0x13d   :  { %610 = vst [vmem:[%s1145_s3] sm:$0xff] %v606_v9  ;;  %v608_v11 = vsel %vm600_vm14, %v594_v2, %v604_v7  ;;  %v607_v12 = vsel %vm599_vm15, %v525_v3, %v603_v8 }
 0x13e   :  { %612 = vst [vmem:[%s1145_s3 + $0x10] sm:$0xff] %v608_v11  ;;  %611 = vst [vmem:[%s1145_s3 + $0x8] sm:$0xff] %v607_v12  ;;  %v609_v13 = vsel %vm601_vm0, %v596_v6, %v605_v10 }
 0x13f   :  { %613 = vst [vmem:[%s1145_s3 + $0x18] sm:$0xff] %v609_v13 }

// kernel: wavlet_forward.25
= control target key start
LH: loop header
LB: loop body
LE: loop exit
PB: predicated region body
PF: predicated region fallthrough
CT: control target
= control target key end

     0   :  { %v162_v0 = vmov 0.0|0.0   ;;  %vm40_vm0 = vcmask 719872   ;;  %v163_v41 = vmov 0.0   ;;  %vm114_vm1 = vcmask 523264   ;;  %s282_s1 = inlined_call_operand.vmem [shape: f32[216,64], index: 1, kind: input, shape index: {}]   ;;  %s283_s0 = inlined_call_operand.vmem [shape: f32[8,216], index: 0, kind: input, shape index: {}]   ;;  %s284_s2 = inlined_call_operand.vmem [shape: f32[8,64], index: 2, kind: output, shape index: {}]  }
   0x1   :  { %121 = vmatprep.subr.bf16.mxu0 %v162_v0  ;;  %v11_v1 = vld [vmem:[%s282_s1] sm:$0xff]  ;;  %v12_v2 = vld [vmem:[%s282_s1 + $0x8] sm:$0xff]  ;;  %v13_v3 = vld [vmem:[%s282_s1 + $0x10] sm:$0xff] }
   0x2   :  { %v122_v4 = vpack.c.bf16 %v12_v2, %v11_v1  ;;  %v14_v5 = vld [vmem:[%s282_s1 + $0x18] sm:$0xff]  ;;  %v15_v7 = vld [vmem:[%s282_s1 + $0x20] sm:$0xff]  ;;  %v16_v8 = vld [vmem:[%s282_s1 + $0x28] sm:$0xff] }
   0x3   :  { %v125_v6 = vpack.c.bf16 %v14_v5, %v13_v3  ;;  %v128_v9 = vpack.c.bf16 %v16_v8, %v15_v7  ;;  %v17_v10 = vld [vmem:[%s282_s1 + $0x30] sm:$0xff]  ;;  %v18_v11 = vld [vmem:[%s282_s1 + $0x38] sm:$0xff]  ;;  %v39_v12 = vld [vmem:[%s283_s0 + $0x8] sm:$0xff] }
   0x4   :  { %123 = vmatpush1.bf16.msra.mxu0 %v122_v4  ;;  %120 = vmatprep.mubr.msk.f32.mxu0 %vm40_vm0, %v39_v12  ;;  %v131_v13 = vpack.c.bf16 %v18_v11, %v17_v10  ;;  %v19_v14 = vld [vmem:[%s282_s1 + $0x40] sm:$0xff]  ;;  %v20_v15 = vld [vmem:[%s282_s1 + $0x48] sm:$0xff]  ;;  %v21_v17 = vld [vmem:[%s282_s1 + $0x50] sm:$0xff] }
   0x5   :  { %124 = vmatprep.subr.bf16.mxu0 %v162_v0  ;;  %v134_v16 = vpack.c.bf16 %v20_v15, %v19_v14  ;;  %v22_v18 = vld [vmem:[%s282_s1 + $0x58] sm:$0xff]  ;;  %v23_v20 = vld [vmem:[%s282_s1 + $0x60] sm:$0xff]  ;;  %v24_v21 = vld [vmem:[%s282_s1 + $0x68] sm:$0xff] }
   0x6   :  { %v137_v19 = vpack.c.bf16 %v22_v18, %v21_v17  ;;  %v140_v22 = vpack.c.bf16 %v24_v21, %v23_v20  ;;  %v25_v23 = vld [vmem:[%s282_s1 + $0x70] sm:$0xff]  ;;  %v26_v24 = vld [vmem:[%s282_s1 + $0x78] sm:$0xff]  ;;  %v27_v26 = vld [vmem:[%s282_s1 + $0x80] sm:$0xff] }
   0x7   :  { %v143_v25 = vpack.c.bf16 %v26_v24, %v25_v23  ;;  %v28_v27 = vld [vmem:[%s282_s1 + $0x88] sm:$0xff]  ;;  %v29_v29 = vld [vmem:[%s282_s1 + $0x90] sm:$0xff]  ;;  %v30_v30 = vld [vmem:[%s282_s1 + $0x98] sm:$0xff] }
   0x8   :  { %126 = vmatpush1.bf16.msra.mxu0 %v125_v6  ;;  %v146_v28 = vpack.c.bf16 %v28_v27, %v27_v26  ;;  %v149_v31 = vpack.c.bf16 %v30_v30, %v29_v29  ;;  %v31_v32 = vld [vmem:[%s282_s1 + $0xa0] sm:$0xff]  ;;  %v32_v33 = vld [vmem:[%s282_s1 + $0xa8] sm:$0xff]  ;;  %v33_v35 = vld [vmem:[%s282_s1 + $0xb0] sm:$0xff] }
   0x9   :  { %127 = vmatprep.subr.bf16.mxu0 %v162_v0  ;;  %v152_v34 = vpack.c.bf16 %v32_v33, %v31_v32  ;;  %v34_v36 = vld [vmem:[%s282_s1 + $0xb8] sm:$0xff]  ;;  %v35_v38 = vld [vmem:[%s282_s1 + $0xc0] sm:$0xff]  ;;  %v36_v39 = vld [vmem:[%s282_s1 + $0xc8] sm:$0xff] }
   0xa   :  { %v155_v37 = vpack.c.bf16 %v34_v36, %v33_v35  ;;  %v158_v40 = vpack.c.bf16 %v36_v39, %v35_v38  ;;  %v37_v42 = vld [vmem:[%s282_s1 + $0xd0] sm:$0xff]  ;;  %v38_v43 = vld [vmem:[%s283_s0] sm:$0xff] }
   0xc   :  { %129 = vmatpush1.bf16.msra.mxu0 %v128_v9 }
   0xd   :  { %130 = vmatprep.subr.bf16.mxu0 %v162_v0 }
  0x10   :  { %132 = vmatpush1.bf16.msra.mxu0 %v131_v13 }
  0x11   :  { %133 = vmatprep.subr.bf16.mxu0 %v162_v0 }
  0x14   :  { %135 = vmatpush1.bf16.msra.mxu0 %v134_v16 }
  0x15   :  { %136 = vmatprep.subr.bf16.mxu0 %v162_v0 }
  0x18   :  { %138 = vmatpush1.bf16.msra.mxu0 %v137_v19 }
  0x19   :  { %139 = vmatprep.subr.bf16.mxu0 %v162_v0 }
  0x1c   :  { %141 = vmatpush1.bf16.msra.mxu0 %v140_v22 }
  0x1d   :  { %142 = vmatprep.subr.bf16.mxu0 %v162_v0 }
  0x20   :  { %144 = vmatpush1.bf16.msra.mxu0 %v143_v25 }
  0x21   :  { %145 = vmatprep.subr.bf16.mxu0 %v162_v0 }
  0x24   :  { %147 = vmatpush1.bf16.msra.mxu0 %v146_v28 }
  0x25   :  { %148 = vmatprep.subr.bf16.mxu0 %v162_v0 }
  0x28   :  { %150 = vmatpush1.bf16.msra.mxu0 %v149_v31 }
  0x29   :  { %151 = vmatprep.subr.bf16.mxu0 %v162_v0 }
  0x2c   :  { %153 = vmatpush1.bf16.msra.mxu0 %v152_v34 }
  0x2d   :  { %154 = vmatprep.subr.bf16.mxu0 %v162_v0 }
  0x30   :  { %156 = vmatpush1.bf16.msra.mxu0 %v155_v37 }
  0x31   :  { %157 = vmatprep.subr.bf16.mxu0 %v162_v0 }
  0x34   :  { %159 = vmatpush1.bf16.msra.mxu0 %v158_v40 }
  0x35   :  { %96 = vmatprep.subr.mxu0 %v163_v41 }
  0x38   :  { %97 = vmatpush1.msra.mxu0 %v37_v42 }
  0x39   :  { %109 = vmatmul.mubr.f32.vlgmr.msra.gmra.mrb[0].mxu0 %v38_v43 }
 0x10c   :  { %v110_v44 = vpop.f32.mrb[0].mxu0 }
 0x10d   :  { %115 = vst.msk [vmem:[%s284_s2] sm:$0xff] %vm114_vm1, %v110_v44  ;;  %v112_v45 = vpop.f32.mrb[1].mxu0 }

// kernel: wavlet_forward.26
= control target key start
LH: loop header
LB: loop body
LE: loop exit
PB: predicated region body
PF: predicated region fallthrough
CT: control target
= control target key end

     0   :  { %v243_v0 = vmov 0.0|0.0   ;;  %vm121_vm8 = vcmask 719872   ;;  %s363_s1 = inlined_call_operand.vmem [shape: f32[216,64], index: 1, kind: input, shape index: {}]   ;;  %s364_s0 = inlined_call_operand.vmem [shape: f32[8,216], index: 0, kind: input, shape index: {}]   ;;  %s365_s2 = inlined_call_operand.vmem [shape: f32[8,64], index: 2, kind: output, shape index: {}]  }
   0x1   :  { %202 = vmatprep.subr.bf16.mxu0 %v243_v0  ;;  %v11_v1 = vld [vmem:[%s363_s1] sm:$0xff]  ;;  %v12_v2 = vld [vmem:[%s363_s1 + $0x8] sm:$0xff]  ;;  %v13_v3 = vld [vmem:[%s363_s1 + $0x10] sm:$0xff] }
   0x2   :  { %vm38_vm0 = vcmp.ge.f32.partialorder %v11_v1, 0.0  ;;  %vm39_vm1 = vcmp.ge.f32.partialorder %v12_v2, 0.0  ;;  %v65_v4 = vmul.f32 0.2, %v11_v1  ;;  %v66_v5 = vmul.f32 0.2, %v12_v2 }
   0x3   :  { %v14_v6 = vld [vmem:[%s363_s1 + $0x18] sm:$0xff]  ;;  %vm40_vm2 = vcmp.ge.f32.partialorder %v13_v3, 0.0  ;;  %v67_v7 = vmul.f32 0.2, %v13_v3  ;;  %v15_v8 = vld [vmem:[%s363_s1 + $0x20] sm:$0xff]  ;;  %v16_v9 = vld [vmem:[%s363_s1 + $0x28] sm:$0xff] }
   0x4   :  { %v92_v10 = vsel %vm38_vm0, %v11_v1, %v65_v4  ;;  %v93_v11 = vsel %vm39_vm1, %v12_v2, %v66_v5  ;;  %vm41_vm3 = vcmp.ge.f32.partialorder %v14_v6, 0.0  ;;  %v68_v12 = vmul.f32 0.2, %v14_v6  ;;  %v17_v15 = vld [vmem:[%s363_s1 + $0x30] sm:$0xff]  ;;  %v18_v16 = vld [vmem:[%s363_s1 + $0x38] sm:$0xff]  ;;  %v19_v25 = vld [vmem:[%s363_s1 + $0x40] sm:$0xff] }
   0x5   :  { %v203_v13 = vpack.c.bf16 %v93_v11, %v92_v10  ;;  %v94_v14 = vsel %vm40_vm2, %v13_v3, %v67_v7  ;;  %vm42_vm4 = vcmp.ge.f32.partialorder %v15_v8, 0.0  ;;  %vm43_vm5 = vcmp.ge.f32.partialorder %v16_v9, 0.0  ;;  %v20_v26 = vld [vmem:[%s363_s1 + $0x48] sm:$0xff]  ;;  %v21_v32 = vld [vmem:[%s363_s1 + $0x50] sm:$0xff]  ;;  %v22_v33 = vld [vmem:[%s363_s1 + $0x58] sm:$0xff] }
   0x6   :  { %v95_v17 = vsel %vm41_vm3, %v14_v6, %v68_v12  ;;  %v69_v18 = vmul.f32 0.2, %v15_v8  ;;  %v70_v19 = vmul.f32 0.2, %v16_v9  ;;  %v71_v23 = vmul.f32 0.2, %v17_v15 }
   0x7   :  { %204 = vmatpush1.bf16.msra.mxu0 %v203_v13  ;;  %v206_v20 = vpack.c.bf16 %v95_v17, %v94_v14  ;;  %v72_v24 = vmul.f32 0.2, %v18_v16  ;;  %vm44_vm6 = vcmp.ge.f32.partialorder %v17_v15, 0.0  ;;  %vm45_vm7 = vcmp.ge.f32.partialorder %v18_v16, 0.0  ;;  %v120_v34 = vld [vmem:[%s364_s0 + $0x8] sm:$0xff]  ;;  %v23_v40 = vld [vmem:[%s363_s1 + $0x60] sm:$0xff] }
   0x8   :  { %205 = vmatprep.subr.bf16.mxu0 %v243_v0  ;;  %v96_v21 = vsel %vm42_vm4, %v15_v8, %v69_v18  ;;  %v97_v22 = vsel %vm43_vm5, %v16_v9, %v70_v19  ;;  %v98_v28 = vsel %vm44_vm6, %v17_v15, %v71_v23  ;;  %v73_v30 = vmul.f32 0.2, %v19_v25  ;;  %201 = vmatprep.mubr.msk.f32.mxu0 %vm121_vm8, %v120_v34  ;;  %v24_v41 = vld [vmem:[%s363_s1 + $0x68] sm:$0xff]  ;;  %v25_v47 = vld [vmem:[%s363_s1 + $0x70] sm:$0xff]  ;;  %v26_v48 = vld [vmem:[%s363_s1 + $0x78] sm:$0xff] }
   0x9   :  { %v209_v27 = vpack.c.bf16 %v97_v22, %v96_v21  ;;  %v99_v29 = vsel %vm45_vm7, %v18_v16, %v72_v24  ;;  %v74_v31 = vmul.f32 0.2, %v20_v26  ;;  %vm46_vm9 = vcmp.ge.f32.partialorder %v19_v25, 0.0  ;;  %v27_v54 = vld [vmem:[%s363_s1 + $0x80] sm:$0xff]  ;;  %v28_v55 = vld [vmem:[%s363_s1 + $0x88] sm:$0xff]  ;;  %v29_v61 = vld [vmem:[%s363_s1 + $0x90] sm:$0xff] }
   0xa   :  { %vm47_vm10 = vcmp.ge.f32.partialorder %v20_v26, 0.0  ;;  %v212_v35 = vpack.c.bf16 %v99_v29, %v98_v28  ;;  %v100_v36 = vsel %vm46_vm9, %v19_v25, %v73_v30  ;;  %v75_v38 = vmul.f32 0.2, %v21_v32  ;;  %v30_v62 = vld [vmem:[%s363_s1 + $0x98] sm:$0xff]  ;;  %v31_v5 = vld [vmem:[%s363_s1 + $0xa0] sm:$0xff]  ;;  %v32_v6 = vld [vmem:[%s363_s1 + $0xa8] sm:$0xff] }
   0xb   :  { %207 = vmatpush1.bf16.msra.mxu0 %v206_v20  ;;  %v101_v37 = vsel %vm47_vm10, %v20_v26, %v74_v31  ;;  %v76_v39 = vmul.f32 0.2, %v22_v33  ;;  %vm48_vm11 = vcmp.ge.f32.partialorder %v21_v32, 0.0  ;;  %vm49_vm12 = vcmp.ge.f32.partialorder %v22_v33, 0.0  ;;  %v33_v12 = vld [vmem:[%s363_s1 + $0xb0] sm:$0xff]  ;;  %v34_v13 = vld [vmem:[%s363_s1 + $0xb8] sm:$0xff] }
   0xc   :  { %208 = vmatprep.subr.bf16.mxu0 %v243_v0  ;;  %v215_v42 = vpack.c.bf16 %v101_v37, %v100_v36  ;;  %v102_v43 = vsel %vm48_vm11, %v21_v32, %v75_v38  ;;  %v77_v45 = vmul.f32 0.2, %v23_v40  ;;  %v78_v46 = vmul.f32 0.2, %v24_v41  ;;  %v35_v19 = vld [vmem:[%s363_s1 + $0xc0] sm:$0xff]  ;;  %v36_v20 = vld [vmem:[%s363_s1 + $0xc8] sm:$0xff] }
   0xd   :  { %v103_v44 = vsel %vm49_vm12, %v22_v33, %v76_v39  ;;  %vm50_vm13 = vcmp.ge.f32.partialorder %v23_v40, 0.0  ;;  %vm51_vm14 = vcmp.ge.f32.partialorder %v24_v41, 0.0  ;;  %v79_v52 = vmul.f32 0.2, %v25_v47  ;;  %v37_v29 = vld [vmem:[%s363_s1 + $0xd0] sm:$0xff]  ;;  %v119_v34 = vld [vmem:[%s364_s0] sm:$0xff] }
   0xe   :  { %v218_v49 = vpack.c.bf16 %v103_v44, %v102_v43  ;;  %v104_v50 = vsel %vm50_vm13, %v23_v40, %v77_v45  ;;  %v105_v51 = vsel %vm51_vm14, %v24_v41, %v78_v46  ;;  %v80_v53 = vmul.f32 0.2, %v26_v48 }
   0xf   :  { %210 = vmatpush1.bf16.msra.mxu0 %v209_v27  ;;  %vm52_vm15 = vcmp.ge.f32.partialorder %v25_v47, 0.0  ;;  %vm53_vm0 = vcmp.ge.f32.partialorder %v26_v48, 0.0  ;;  %v221_v56 = vpack.c.bf16 %v105_v51, %v104_v50  ;;  %v81_v59 = vmul.f32 0.2, %v27_v54 }
  0x10   :  { %211 = vmatprep.subr.bf16.mxu0 %v243_v0  ;;  %v106_v57 = vsel %vm52_vm15, %v25_v47, %v79_v52  ;;  %v107_v58 = vsel %vm53_vm0, %v26_v48, %v80_v53  ;;  %v82_v60 = vmul.f32 0.2, %v28_v55  ;;  %vm54_vm1 = vcmp.ge.f32.partialorder %v27_v54, 0.0 }
  0x11   :  { %vm55_vm2 = vcmp.ge.f32.partialorder %v28_v55, 0.0  ;;  %v224_v63 = vpack.c.bf16 %v107_v58, %v106_v57  ;;  %v108_v1 = vsel %vm54_vm1, %v27_v54, %v81_v59  ;;  %v83_v3 = vmul.f32 0.2, %v29_v61 }
  0x12   :  { %v109_v2 = vsel %vm55_vm2, %v28_v55, %v82_v60  ;;  %v84_v4 = vmul.f32 0.2, %v30_v62  ;;  %vm56_vm3 = vcmp.ge.f32.partialorder %v29_v61, 0.0  ;;  %vm57_vm4 = vcmp.ge.f32.partialorder %v30_v62, 0.0 }
  0x13   :  { %213 = vmatpush1.bf16.msra.mxu0 %v212_v35  ;;  %v227_v7 = vpack.c.bf16 %v109_v2, %v108_v1  ;;  %v110_v8 = vsel %vm56_vm3, %v29_v61, %v83_v3  ;;  %v85_v10 = vmul.f32 0.2, %v31_v5  ;;  %v86_v11 = vmul.f32 0.2, %v32_v6 }
  0x14   :  { %214 = vmatprep.subr.bf16.mxu0 %v243_v0  ;;  %v111_v9 = vsel %vm57_vm4, %v30_v62, %v84_v4  ;;  %vm58_vm5 = vcmp.ge.f32.partialorder %v31_v5, 0.0  ;;  %vm59_vm6 = vcmp.ge.f32.partialorder %v32_v6, 0.0  ;;  %v87_v17 = vmul.f32 0.2, %v33_v12 }
  0x15   :  { %v230_v14 = vpack.c.bf16 %v111_v9, %v110_v8  ;;  %v112_v15 = vsel %vm58_vm5, %v31_v5, %v85_v10  ;;  %v113_v16 = vsel %vm59_vm6, %v32_v6, %v86_v11  ;;  %v88_v18 = vmul.f32 0.2, %v34_v13 }
  0x16   :  { %vm60_vm7 = vcmp.ge.f32.partialorder %v33_v12, 0.0  ;;  %vm61_vm8 = vcmp.ge.f32.partialorder %v34_v13, 0.0  ;;  %v233_v21 = vpack.c.bf16 %v113_v16, %v112_v15  ;;  %v89_v24 = vmul.f32 0.2, %v35_v19 }
  0x17   :  { %216 = vmatpush1.bf16.msra.mxu0 %v215_v42  ;;  %v114_v22 = vsel %vm60_vm7, %v33_v12, %v87_v17  ;;  %v115_v23 = vsel %vm61_vm8, %v34_v13, %v88_v18  ;;  %v90_v25 = vmul.f32 0.2, %v36_v20  ;;  %vm62_vm9 = vcmp.ge.f32.partialorder %v35_v19, 0.0 }
  0x18   :  { %217 = vmatprep.subr.bf16.mxu0 %v243_v0  ;;  %vm63_vm10 = vcmp.ge.f32.partialorder %v36_v20, 0.0  ;;  %v236_v26 = vpack.c.bf16 %v115_v23, %v114_v22  ;;  %v116_v27 = vsel %vm62_vm9, %v35_v19, %v89_v24  ;;  %v91_v31 = vmul.f32 0.2, %v37_v29 }
  0x19   :  { %v117_v28 = vsel %vm63_vm10, %v36_v20, %v90_v25  ;;  %vm64_vm11 = vcmp.ge.f32.partialorder %v37_v29, 0.0  ;;  %v244_v32 = vmov 0.0   ;;  %vm195_vm12 = vcmask 523264  }
  0x1a   :  { %v239_v30 = vpack.c.bf16 %v117_v28, %v116_v27  ;;  %v118_v33 = vsel %vm64_vm11, %v37_v29, %v91_v31 }
  0x1b   :  { %219 = vmatpush1.bf16.msra.mxu0 %v218_v49 }
  0x1c   :  { %220 = vmatprep.subr.bf16.mxu0 %v243_v0 }
  0x1f   :  { %222 = vmatpush1.bf16.msra.mxu0 %v221_v56 }
  0x20   :  { %223 = vmatprep.subr.bf16.mxu0 %v243_v0 }
  0x23   :  { %225 = vmatpush1.bf16.msra.mxu0 %v224_v63 }
  0x24   :  { %226 = vmatprep.subr.bf16.mxu0 %v243_v0 }
  0x27   :  { %228 = vmatpush1.bf16.msra.mxu0 %v227_v7 }
  0x28   :  { %229 = vmatprep.subr.bf16.mxu0 %v243_v0 }
  0x2b   :  { %231 = vmatpush1.bf16.msra.mxu0 %v230_v14 }
  0x2c   :  { %232 = vmatprep.subr.bf16.mxu0 %v243_v0 }
  0x2f   :  { %234 = vmatpush1.bf16.msra.mxu0 %v233_v21 }
  0x30   :  { %235 = vmatprep.subr.bf16.mxu0 %v243_v0 }
  0x33   :  { %237 = vmatpush1.bf16.msra.mxu0 %v236_v26 }
  0x34   :  { %238 = vmatprep.subr.bf16.mxu0 %v243_v0 }
  0x37   :  { %240 = vmatpush1.bf16.msra.mxu0 %v239_v30 }
  0x38   :  { %177 = vmatprep.subr.mxu0 %v244_v32 }
  0x3b   :  { %178 = vmatpush1.msra.mxu0 %v118_v33 }
  0x3c   :  { %190 = vmatmul.mubr.f32.vlgmr.msra.gmra.mrb[0].mxu0 %v119_v34 }
 0x10f   :  { %v191_v35 = vpop.f32.mrb[0].mxu0 }
 0x110   :  { %196 = vst.msk [vmem:[%s365_s2] sm:$0xff] %vm195_vm12, %v191_v35  ;;  %v193_v36 = vpop.f32.mrb[1].mxu0 }

// kernel: wavlet_forward.27
= control target key start
LH: loop header
LB: loop body
LE: loop exit
PB: predicated region body
PF: predicated region fallthrough
CT: control target
= control target key end

     0   :  { %v250_v0 = vmov 0.0|0.0   ;;  %vm125_vm8 = vcmask 719872   ;;  %s378_s1 = inlined_call_operand.vmem [shape: f32[216,64], index: 1, kind: input, shape index: {}]   ;;  %s379_s0 = inlined_call_operand.vmem [shape: f32[8,216], index: 0, kind: input, shape index: {}]   ;;  %s380_s2 = inlined_call_operand.vmem [shape: f32[8,64], index: 2, kind: input, shape index: {}]   ;;  %s381_s3 = inlined_call_operand.vmem [shape: f32[8,64], index: 3, kind: output, shape index: {}]  }
   0x1   :  { %209 = vmatprep.subr.bf16.mxu0 %v250_v0  ;;  %v14_v1 = vld [vmem:[%s378_s1] sm:$0xff]  ;;  %v15_v2 = vld [vmem:[%s378_s1 + $0x8] sm:$0xff]  ;;  %v16_v3 = vld [vmem:[%s378_s1 + $0x10] sm:$0xff] }
   0x2   :  { %vm41_vm0 = vcmp.ge.f32.partialorder %v14_v1, 0.0  ;;  %vm42_vm1 = vcmp.ge.f32.partialorder %v15_v2, 0.0  ;;  %v68_v4 = vmul.f32 0.2, %v14_v1  ;;  %v69_v5 = vmul.f32 0.2, %v15_v2 }
   0x3   :  { %v17_v6 = vld [vmem:[%s378_s1 + $0x18] sm:$0xff]  ;;  %vm43_vm2 = vcmp.ge.f32.partialorder %v16_v3, 0.0  ;;  %v70_v7 = vmul.f32 0.2, %v16_v3  ;;  %v18_v8 = vld [vmem:[%s378_s1 + $0x20] sm:$0xff]  ;;  %v19_v9 = vld [vmem:[%s378_s1 + $0x28] sm:$0xff] }
   0x4   :  { %v95_v10 = vsel %vm41_vm0, %v14_v1, %v68_v4  ;;  %v96_v11 = vsel %vm42_vm1, %v15_v2, %v69_v5  ;;  %vm44_vm3 = vcmp.ge.f32.partialorder %v17_v6, 0.0  ;;  %v71_v12 = vmul.f32 0.2, %v17_v6  ;;  %v20_v15 = vld [vmem:[%s378_s1 + $0x30] sm:$0xff]  ;;  %v21_v16 = vld [vmem:[%s378_s1 + $0x38] sm:$0xff]  ;;  %v22_v25 = vld [vmem:[%s378_s1 + $0x40] sm:$0xff] }
   0x5   :  { %v210_v13 = vpack.c.bf16 %v96_v11, %v95_v10  ;;  %v97_v14 = vsel %vm43_vm2, %v16_v3, %v70_v7  ;;  %vm45_vm4 = vcmp.ge.f32.partialorder %v18_v8, 0.0  ;;  %vm46_vm5 = vcmp.ge.f32.partialorder %v19_v9, 0.0  ;;  %v23_v26 = vld [vmem:[%s378_s1 + $0x48] sm:$0xff]  ;;  %v24_v32 = vld [vmem:[%s378_s1 + $0x50] sm:$0xff]  ;;  %v25_v33 = vld [vmem:[%s378_s1 + $0x58] sm:$0xff] }
   0x6   :  { %v98_v17 = vsel %vm44_vm3, %v17_v6, %v71_v12  ;;  %v72_v18 = vmul.f32 0.2, %v18_v8  ;;  %v73_v19 = vmul.f32 0.2, %v19_v9  ;;  %v74_v23 = vmul.f32 0.2, %v20_v15 }
   0x7   :  { %211 = vmatpush1.bf16.msra.mxu0 %v210_v13  ;;  %v213_v20 = vpack.c.bf16 %v98_v17, %v97_v14  ;;  %v75_v24 = vmul.f32 0.2, %v21_v16  ;;  %vm47_vm6 = vcmp.ge.f32.partialorder %v20_v15, 0.0  ;;  %vm48_vm7 = vcmp.ge.f32.partialorder %v21_v16, 0.0  ;;  %v123_v34 = vld [vmem:[%s379_s0 + $0x8] sm:$0xff]  ;;  %v26_v40 = vld [vmem:[%s378_s1 + $0x60] sm:$0xff] }
   0x8   :  { %212 = vmatprep.subr.bf16.mxu0 %v250_v0  ;;  %v99_v21 = vsel %vm45_vm4, %v18_v8, %v72_v18  ;;  %v100_v22 = vsel %vm46_vm5, %v19_v9, %v73_v19  ;;  %v101_v28 = vsel %vm47_vm6, %v20_v15, %v74_v23  ;;  %v76_v30 = vmul.f32 0.2, %v22_v25  ;;  %208 = vmatprep.mubr.msk.f32.mxu0 %vm125_vm8, %v123_v34  ;;  %v27_v41 = vld [vmem:[%s378_s1 + $0x68] sm:$0xff]  ;;  %v28_v47 = vld [vmem:[%s378_s1 + $0x70] sm:$0xff]  ;;  %v29_v48 = vld [vmem:[%s378_s1 + $0x78] sm:$0xff] }
   0x9   :  { %v216_v27 = vpack.c.bf16 %v100_v22, %v99_v21  ;;  %v102_v29 = vsel %vm48_vm7, %v21_v16, %v75_v24  ;;  %v77_v31 = vmul.f32 0.2, %v23_v26  ;;  %vm49_vm9 = vcmp.ge.f32.partialorder %v22_v25, 0.0  ;;  %v30_v54 = vld [vmem:[%s378_s1 + $0x80] sm:$0xff]  ;;  %v31_v55 = vld [vmem:[%s378_s1 + $0x88] sm:$0xff]  ;;  %v32_v61 = vld [vmem:[%s378_s1 + $0x90] sm:$0xff] }
   0xa   :  { %vm50_vm10 = vcmp.ge.f32.partialorder %v23_v26, 0.0  ;;  %v219_v35 = vpack.c.bf16 %v102_v29, %v101_v28  ;;  %v103_v36 = vsel %vm49_vm9, %v22_v25, %v76_v30  ;;  %v78_v38 = vmul.f32 0.2, %v24_v32  ;;  %v33_v62 = vld [vmem:[%s378_s1 + $0x98] sm:$0xff]  ;;  %v34_v5 = vld [vmem:[%s378_s1 + $0xa0] sm:$0xff]  ;;  %v35_v6 = vld [vmem:[%s378_s1 + $0xa8] sm:$0xff] }
   0xb   :  { %214 = vmatpush1.bf16.msra.mxu0 %v213_v20  ;;  %v104_v37 = vsel %vm50_vm10, %v23_v26, %v77_v31  ;;  %v79_v39 = vmul.f32 0.2, %v25_v33  ;;  %vm51_vm11 = vcmp.ge.f32.partialorder %v24_v32, 0.0  ;;  %vm52_vm12 = vcmp.ge.f32.partialorder %v25_v33, 0.0  ;;  %v36_v12 = vld [vmem:[%s378_s1 + $0xb0] sm:$0xff]  ;;  %v37_v13 = vld [vmem:[%s378_s1 + $0xb8] sm:$0xff] }
   0xc   :  { %215 = vmatprep.subr.bf16.mxu0 %v250_v0  ;;  %v222_v42 = vpack.c.bf16 %v104_v37, %v103_v36  ;;  %v105_v43 = vsel %vm51_vm11, %v24_v32, %v78_v38  ;;  %v80_v45 = vmul.f32 0.2, %v26_v40  ;;  %v81_v46 = vmul.f32 0.2, %v27_v41  ;;  %v38_v19 = vld [vmem:[%s378_s1 + $0xc0] sm:$0xff]  ;;  %v39_v20 = vld [vmem:[%s378_s1 + $0xc8] sm:$0xff] }
   0xd   :  { %v106_v44 = vsel %vm52_vm12, %v25_v33, %v79_v39  ;;  %vm53_vm13 = vcmp.ge.f32.partialorder %v26_v40, 0.0  ;;  %vm54_vm14 = vcmp.ge.f32.partialorder %v27_v41, 0.0  ;;  %v82_v52 = vmul.f32 0.2, %v28_v47  ;;  %v40_v29 = vld [vmem:[%s378_s1 + $0xd0] sm:$0xff]  ;;  %v122_v34 = vld [vmem:[%s379_s0] sm:$0xff] }
   0xe   :  { %v225_v49 = vpack.c.bf16 %v106_v44, %v105_v43  ;;  %v107_v50 = vsel %vm53_vm13, %v26_v40, %v80_v45  ;;  %v108_v51 = vsel %vm54_vm14, %v27_v41, %v81_v46  ;;  %v83_v53 = vmul.f32 0.2, %v29_v48 }
   0xf   :  { %217 = vmatpush1.bf16.msra.mxu0 %v216_v27  ;;  %vm55_vm15 = vcmp.ge.f32.partialorder %v28_v47, 0.0  ;;  %vm56_vm0 = vcmp.ge.f32.partialorder %v29_v48, 0.0  ;;  %v228_v56 = vpack.c.bf16 %v108_v51, %v107_v50  ;;  %v84_v59 = vmul.f32 0.2, %v30_v54 }
  0x10   :  { %218 = vmatprep.subr.bf16.mxu0 %v250_v0  ;;  %v109_v57 = vsel %vm55_vm15, %v28_v47, %v82_v52  ;;  %v110_v58 = vsel %vm56_vm0, %v29_v48, %v83_v53  ;;  %v85_v60 = vmul.f32 0.2, %v31_v55  ;;  %vm57_vm1 = vcmp.ge.f32.partialorder %v30_v54, 0.0 }
  0x11   :  { %vm58_vm2 = vcmp.ge.f32.partialorder %v31_v55, 0.0  ;;  %v231_v63 = vpack.c.bf16 %v110_v58, %v109_v57  ;;  %v111_v1 = vsel %vm57_vm1, %v30_v54, %v84_v59  ;;  %v86_v3 = vmul.f32 0.2, %v32_v61 }
  0x12   :  { %v112_v2 = vsel %vm58_vm2, %v31_v55, %v85_v60  ;;  %v87_v4 = vmul.f32 0.2, %v33_v62  ;;  %vm59_vm3 = vcmp.ge.f32.partialorder %v32_v61, 0.0  ;;  %vm60_vm4 = vcmp.ge.f32.partialorder %v33_v62, 0.0 }
  0x13   :  { %220 = vmatpush1.bf16.msra.mxu0 %v219_v35  ;;  %v234_v7 = vpack.c.bf16 %v112_v2, %v111_v1  ;;  %v113_v8 = vsel %vm59_vm3, %v32_v61, %v86_v3  ;;  %v88_v10 = vmul.f32 0.2, %v34_v5  ;;  %v89_v11 = vmul.f32 0.2, %v35_v6  ;;  %v124_v35 = vld [vmem:[%s380_s2] sm:$0xff] }
  0x14   :  { %221 = vmatprep.subr.bf16.mxu0 %v250_v0  ;;  %v114_v9 = vsel %vm60_vm4, %v33_v62, %v87_v4  ;;  %vm61_vm5 = vcmp.ge.f32.partialorder %v34_v5, 0.0  ;;  %vm62_vm6 = vcmp.ge.f32.partialorder %v35_v6, 0.0  ;;  %v90_v17 = vmul.f32 0.2, %v36_v12 }
  0x15   :  { %v237_v14 = vpack.c.bf16 %v114_v9, %v113_v8  ;;  %v115_v15 = vsel %vm61_vm5, %v34_v5, %v88_v10  ;;  %v116_v16 = vsel %vm62_vm6, %v35_v6, %v89_v11  ;;  %v91_v18 = vmul.f32 0.2, %v37_v13 }
  0x16   :  { %vm63_vm7 = vcmp.ge.f32.partialorder %v36_v12, 0.0  ;;  %vm64_vm8 = vcmp.ge.f32.partialorder %v37_v13, 0.0  ;;  %v240_v21 = vpack.c.bf16 %v116_v16, %v115_v15  ;;  %v92_v24 = vmul.f32 0.2, %v38_v19 }
  0x17   :  { %223 = vmatpush1.bf16.msra.mxu0 %v222_v42  ;;  %v117_v22 = vsel %vm63_vm7, %v36_v12, %v90_v17  ;;  %v118_v23 = vsel %vm64_vm8, %v37_v13, %v91_v18  ;;  %v93_v25 = vmul.f32 0.2, %v39_v20  ;;  %vm65_vm9 = vcmp.ge.f32.partialorder %v38_v19, 0.0 }
  0x18   :  { %224 = vmatprep.subr.bf16.mxu0 %v250_v0  ;;  %vm66_vm10 = vcmp.ge.f32.partialorder %v39_v20, 0.0  ;;  %v243_v26 = vpack.c.bf16 %v118_v23, %v117_v22  ;;  %v119_v27 = vsel %vm65_vm9, %v38_v19, %v92_v24  ;;  %v94_v31 = vmul.f32 0.2, %v40_v29 }
  0x19   :  { %v120_v28 = vsel %vm66_vm10, %v39_v20, %v93_v25  ;;  %vm67_vm11 = vcmp.ge.f32.partialorder %v40_v29, 0.0  ;;  %v251_v32 = vmov 0.0   ;;  %vm202_vm13 = vcmask 523264  }
  0x1a   :  { %v246_v30 = vpack.c.bf16 %v120_v28, %v119_v27  ;;  %v121_v33 = vsel %vm67_vm11, %v40_v29, %v94_v31 }
  0x1b   :  { %226 = vmatpush1.bf16.msra.mxu0 %v225_v49 }
  0x1c   :  { %227 = vmatprep.subr.bf16.mxu0 %v250_v0 }
  0x1f   :  { %229 = vmatpush1.bf16.msra.mxu0 %v228_v56 }
  0x20   :  { %230 = vmatprep.subr.bf16.mxu0 %v250_v0 }
  0x23   :  { %232 = vmatpush1.bf16.msra.mxu0 %v231_v63 }
  0x24   :  { %233 = vmatprep.subr.bf16.mxu0 %v250_v0 }
  0x27   :  { %235 = vmatpush1.bf16.msra.mxu0 %v234_v7 }
  0x28   :  { %236 = vmatprep.subr.bf16.mxu0 %v250_v0 }
  0x2b   :  { %238 = vmatpush1.bf16.msra.mxu0 %v237_v14 }
  0x2c   :  { %239 = vmatprep.subr.bf16.mxu0 %v250_v0 }
  0x2f   :  { %241 = vmatpush1.bf16.msra.mxu0 %v240_v21 }
  0x30   :  { %242 = vmatprep.subr.bf16.mxu0 %v250_v0 }
  0x33   :  { %244 = vmatpush1.bf16.msra.mxu0 %v243_v26 }
  0x34   :  { %245 = vmatprep.subr.bf16.mxu0 %v250_v0 }
  0x37   :  { %247 = vmatpush1.bf16.msra.mxu0 %v246_v30 }
  0x38   :  { %181 = vmatprep.subr.mxu0 %v251_v32 }
  0x3b   :  { %182 = vmatpush1.msra.mxu0 %v121_v33 }
  0x3c   :  { %194 = vmatmul.mubr.f32.vlgmr.msra.gmra.mrb[0].mxu0 %v122_v34 }
 0x10f   :  { %v195_v36 = vpop.f32.mrb[0].mxu0 }
 0x110   :  { %v196_v37 = vadd.f32 %v195_v36, %v124_v35  ;;  %v197_v38 = vpop.f32.mrb[1].mxu0 }
 0x112   :  { %vm199_vm12 = vcmp.ge.f32.partialorder %v196_v37, 0.0  ;;  %v200_v0 = vmul.f32 0.2, %v196_v37 }
 0x114   :  { %v201_v39 = vsel %vm199_vm12, %v196_v37, %v200_v0 }
 0x115   :  { %203 = vst.msk [vmem:[%s381_s3] sm:$0xff] %vm202_vm13, %v201_v39 }

// kernel: wavlet_forward.28
= control target key start
LH: loop header
LB: loop body
LE: loop exit
PB: predicated region body
PF: predicated region fallthrough
CT: control target
= control target key end

     0   :  { %v162_v0 = vmov 0.0|0.0   ;;  %vm40_vm0 = vcmask 719872   ;;  %v163_v41 = vmov 0.0   ;;  %vm114_vm1 = vcmask 64512   ;;  %s282_s1 = inlined_call_operand.vmem [shape: f32[216,8], index: 1, kind: input, shape index: {}]   ;;  %s283_s0 = inlined_call_operand.vmem [shape: f32[8,216], index: 0, kind: input, shape index: {}]   ;;  %s284_s2 = inlined_call_operand.vmem [shape: f32[8,8], index: 2, kind: output, shape index: {}]  }
   0x1   :  { %121 = vmatprep.subr.bf16.mxu0 %v162_v0  ;;  %v11_v1 = vld [vmem:[%s282_s1] sm:$0xff]  ;;  %v12_v2 = vld [vmem:[%s282_s1 + $0x8] sm:$0xff]  ;;  %v13_v3 = vld [vmem:[%s282_s1 + $0x10] sm:$0xff] }
   0x2   :  { %v122_v4 = vpack.c.bf16 %v12_v2, %v11_v1  ;;  %v14_v5 = vld [vmem:[%s282_s1 + $0x18] sm:$0xff]  ;;  %v15_v7 = vld [vmem:[%s282_s1 + $0x20] sm:$0xff]  ;;  %v16_v8 = vld [vmem:[%s282_s1 + $0x28] sm:$0xff] }
   0x3   :  { %v125_v6 = vpack.c.bf16 %v14_v5, %v13_v3  ;;  %v128_v9 = vpack.c.bf16 %v16_v8, %v15_v7  ;;  %v17_v10 = vld [vmem:[%s282_s1 + $0x30] sm:$0xff]  ;;  %v18_v11 = vld [vmem:[%s282_s1 + $0x38] sm:$0xff]  ;;  %v39_v12 = vld [vmem:[%s283_s0 + $0x8] sm:$0xff] }
   0x4   :  { %123 = vmatpush1.bf16.msra.mxu0 %v122_v4  ;;  %120 = vmatprep.mubr.msk.f32.mxu0 %vm40_vm0, %v39_v12  ;;  %v131_v13 = vpack.c.bf16 %v18_v11, %v17_v10  ;;  %v19_v14 = vld [vmem:[%s282_s1 + $0x40] sm:$0xff]  ;;  %v20_v15 = vld [vmem:[%s282_s1 + $0x48] sm:$0xff]  ;;  %v21_v17 = vld [vmem:[%s282_s1 + $0x50] sm:$0xff] }
   0x5   :  { %124 = vmatprep.subr.bf16.mxu0 %v162_v0  ;;  %v134_v16 = vpack.c.bf16 %v20_v15, %v19_v14  ;;  %v22_v18 = vld [vmem:[%s282_s1 + $0x58] sm:$0xff]  ;;  %v23_v20 = vld [vmem:[%s282_s1 + $0x60] sm:$0xff]  ;;  %v24_v21 = vld [vmem:[%s282_s1 + $0x68] sm:$0xff] }
   0x6   :  { %v137_v19 = vpack.c.bf16 %v22_v18, %v21_v17  ;;  %v140_v22 = vpack.c.bf16 %v24_v21, %v23_v20  ;;  %v25_v23 = vld [vmem:[%s282_s1 + $0x70] sm:$0xff]  ;;  %v26_v24 = vld [vmem:[%s282_s1 + $0x78] sm:$0xff]  ;;  %v27_v26 = vld [vmem:[%s282_s1 + $0x80] sm:$0xff] }
   0x7   :  { %v143_v25 = vpack.c.bf16 %v26_v24, %v25_v23  ;;  %v28_v27 = vld [vmem:[%s282_s1 + $0x88] sm:$0xff]  ;;  %v29_v29 = vld [vmem:[%s282_s1 + $0x90] sm:$0xff]  ;;  %v30_v30 = vld [vmem:[%s282_s1 + $0x98] sm:$0xff] }
   0x8   :  { %126 = vmatpush1.bf16.msra.mxu0 %v125_v6  ;;  %v146_v28 = vpack.c.bf16 %v28_v27, %v27_v26  ;;  %v149_v31 = vpack.c.bf16 %v30_v30, %v29_v29  ;;  %v31_v32 = vld [vmem:[%s282_s1 + $0xa0] sm:$0xff]  ;;  %v32_v33 = vld [vmem:[%s282_s1 + $0xa8] sm:$0xff]  ;;  %v33_v35 = vld [vmem:[%s282_s1 + $0xb0] sm:$0xff] }
   0x9   :  { %127 = vmatprep.subr.bf16.mxu0 %v162_v0  ;;  %v152_v34 = vpack.c.bf16 %v32_v33, %v31_v32  ;;  %v34_v36 = vld [vmem:[%s282_s1 + $0xb8] sm:$0xff]  ;;  %v35_v38 = vld [vmem:[%s282_s1 + $0xc0] sm:$0xff]  ;;  %v36_v39 = vld [vmem:[%s282_s1 + $0xc8] sm:$0xff] }
   0xa   :  { %v155_v37 = vpack.c.bf16 %v34_v36, %v33_v35  ;;  %v158_v40 = vpack.c.bf16 %v36_v39, %v35_v38  ;;  %v37_v42 = vld [vmem:[%s282_s1 + $0xd0] sm:$0xff]  ;;  %v38_v43 = vld [vmem:[%s283_s0] sm:$0xff] }
   0xc   :  { %129 = vmatpush1.bf16.msra.mxu0 %v128_v9 }
   0xd   :  { %130 = vmatprep.subr.bf16.mxu0 %v162_v0 }
  0x10   :  { %132 = vmatpush1.bf16.msra.mxu0 %v131_v13 }
  0x11   :  { %133 = vmatprep.subr.bf16.mxu0 %v162_v0 }
  0x14   :  { %135 = vmatpush1.bf16.msra.mxu0 %v134_v16 }
  0x15   :  { %136 = vmatprep.subr.bf16.mxu0 %v162_v0 }
  0x18   :  { %138 = vmatpush1.bf16.msra.mxu0 %v137_v19 }
  0x19   :  { %139 = vmatprep.subr.bf16.mxu0 %v162_v0 }
  0x1c   :  { %141 = vmatpush1.bf16.msra.mxu0 %v140_v22 }
  0x1d   :  { %142 = vmatprep.subr.bf16.mxu0 %v162_v0 }
  0x20   :  { %144 = vmatpush1.bf16.msra.mxu0 %v143_v25 }
  0x21   :  { %145 = vmatprep.subr.bf16.mxu0 %v162_v0 }
  0x24   :  { %147 = vmatpush1.bf16.msra.mxu0 %v146_v28 }
  0x25   :  { %148 = vmatprep.subr.bf16.mxu0 %v162_v0 }
  0x28   :  { %150 = vmatpush1.bf16.msra.mxu0 %v149_v31 }
  0x29   :  { %151 = vmatprep.subr.bf16.mxu0 %v162_v0 }
  0x2c   :  { %153 = vmatpush1.bf16.msra.mxu0 %v152_v34 }
  0x2d   :  { %154 = vmatprep.subr.bf16.mxu0 %v162_v0 }
  0x30   :  { %156 = vmatpush1.bf16.msra.mxu0 %v155_v37 }
  0x31   :  { %157 = vmatprep.subr.bf16.mxu0 %v162_v0 }
  0x34   :  { %159 = vmatpush1.bf16.msra.mxu0 %v158_v40 }
  0x35   :  { %96 = vmatprep.subr.mxu0 %v163_v41 }
  0x38   :  { %97 = vmatpush1.msra.mxu0 %v37_v42 }
  0x39   :  { %109 = vmatmul.mubr.f32.vlgmr.msra.gmra.mrb[0].mxu0 %v38_v43 }
 0x10c   :  { %v110_v44 = vpop.f32.mrb[0].mxu0 }
 0x10d   :  { %115 = vst.msk [vmem:[%s284_s2] sm:$0xff] %vm114_vm1, %v110_v44  ;;  %v112_v45 = vpop.f32.mrb[1].mxu0 }

// kernel: wavlet_forward.29
= control target key start
LH: loop header
LB: loop body
LE: loop exit
PB: predicated region body
PF: predicated region fallthrough
CT: control target
= control target key end

     0   :  { %v243_v0 = vmov 0.0|0.0   ;;  %vm121_vm8 = vcmask 719872   ;;  %s363_s1 = inlined_call_operand.vmem [shape: f32[216,8], index: 1, kind: input, shape index: {}]   ;;  %s364_s0 = inlined_call_operand.vmem [shape: f32[8,216], index: 0, kind: input, shape index: {}]   ;;  %s365_s2 = inlined_call_operand.vmem [shape: f32[8,8], index: 2, kind: output, shape index: {}]  }
   0x1   :  { %202 = vmatprep.subr.bf16.mxu0 %v243_v0  ;;  %v11_v1 = vld [vmem:[%s363_s1] sm:$0xff]  ;;  %v12_v2 = vld [vmem:[%s363_s1 + $0x8] sm:$0xff]  ;;  %v13_v3 = vld [vmem:[%s363_s1 + $0x10] sm:$0xff] }
   0x2   :  { %vm38_vm0 = vcmp.ge.f32.partialorder %v11_v1, 0.0  ;;  %vm39_vm1 = vcmp.ge.f32.partialorder %v12_v2, 0.0  ;;  %v65_v4 = vmul.f32 0.2, %v11_v1  ;;  %v66_v5 = vmul.f32 0.2, %v12_v2 }
   0x3   :  { %v14_v6 = vld [vmem:[%s363_s1 + $0x18] sm:$0xff]  ;;  %vm40_vm2 = vcmp.ge.f32.partialorder %v13_v3, 0.0  ;;  %v67_v7 = vmul.f32 0.2, %v13_v3  ;;  %v15_v8 = vld [vmem:[%s363_s1 + $0x20] sm:$0xff]  ;;  %v16_v9 = vld [vmem:[%s363_s1 + $0x28] sm:$0xff] }
   0x4   :  { %v92_v10 = vsel %vm38_vm0, %v11_v1, %v65_v4  ;;  %v93_v11 = vsel %vm39_vm1, %v12_v2, %v66_v5  ;;  %vm41_vm3 = vcmp.ge.f32.partialorder %v14_v6, 0.0  ;;  %v68_v12 = vmul.f32 0.2, %v14_v6  ;;  %v17_v15 = vld [vmem:[%s363_s1 + $0x30] sm:$0xff]  ;;  %v18_v16 = vld [vmem:[%s363_s1 + $0x38] sm:$0xff]  ;;  %v19_v25 = vld [vmem:[%s363_s1 + $0x40] sm:$0xff] }
   0x5   :  { %v203_v13 = vpack.c.bf16 %v93_v11, %v92_v10  ;;  %v94_v14 = vsel %vm40_vm2, %v13_v3, %v67_v7  ;;  %vm42_vm4 = vcmp.ge.f32.partialorder %v15_v8, 0.0  ;;  %vm43_vm5 = vcmp.ge.f32.partialorder %v16_v9, 0.0  ;;  %v20_v26 = vld [vmem:[%s363_s1 + $0x48] sm:$0xff]  ;;  %v21_v32 = vld [vmem:[%s363_s1 + $0x50] sm:$0xff]  ;;  %v22_v33 = vld [vmem:[%s363_s1 + $0x58] sm:$0xff] }
   0x6   :  { %v95_v17 = vsel %vm41_vm3, %v14_v6, %v68_v12  ;;  %v69_v18 = vmul.f32 0.2, %v15_v8  ;;  %v70_v19 = vmul.f32 0.2, %v16_v9  ;;  %v71_v23 = vmul.f32 0.2, %v17_v15 }
   0x7   :  { %204 = vmatpush1.bf16.msra.mxu0 %v203_v13  ;;  %v206_v20 = vpack.c.bf16 %v95_v17, %v94_v14  ;;  %v72_v24 = vmul.f32 0.2, %v18_v16  ;;  %vm44_vm6 = vcmp.ge.f32.partialorder %v17_v15, 0.0  ;;  %vm45_vm7 = vcmp.ge.f32.partialorder %v18_v16, 0.0  ;;  %v120_v34 = vld [vmem:[%s364_s0 + $0x8] sm:$0xff]  ;;  %v23_v40 = vld [vmem:[%s363_s1 + $0x60] sm:$0xff] }
   0x8   :  { %205 = vmatprep.subr.bf16.mxu0 %v243_v0  ;;  %v96_v21 = vsel %vm42_vm4, %v15_v8, %v69_v18  ;;  %v97_v22 = vsel %vm43_vm5, %v16_v9, %v70_v19  ;;  %v98_v28 = vsel %vm44_vm6, %v17_v15, %v71_v23  ;;  %v73_v30 = vmul.f32 0.2, %v19_v25  ;;  %201 = vmatprep.mubr.msk.f32.mxu0 %vm121_vm8, %v120_v34  ;;  %v24_v41 = vld [vmem:[%s363_s1 + $0x68] sm:$0xff]  ;;  %v25_v47 = vld [vmem:[%s363_s1 + $0x70] sm:$0xff]  ;;  %v26_v48 = vld [vmem:[%s363_s1 + $0x78] sm:$0xff] }
   0x9   :  { %v209_v27 = vpack.c.bf16 %v97_v22, %v96_v21  ;;  %v99_v29 = vsel %vm45_vm7, %v18_v16, %v72_v24  ;;  %v74_v31 = vmul.f32 0.2, %v20_v26  ;;  %vm46_vm9 = vcmp.ge.f32.partialorder %v19_v25, 0.0  ;;  %v27_v54 = vld [vmem:[%s363_s1 + $0x80] sm:$0xff]  ;;  %v28_v55 = vld [vmem:[%s363_s1 + $0x88] sm:$0xff]  ;;  %v29_v61 = vld [vmem:[%s363_s1 + $0x90] sm:$0xff] }
   0xa   :  { %vm47_vm10 = vcmp.ge.f32.partialorder %v20_v26, 0.0  ;;  %v212_v35 = vpack.c.bf16 %v99_v29, %v98_v28  ;;  %v100_v36 = vsel %vm46_vm9, %v19_v25, %v73_v30  ;;  %v75_v38 = vmul.f32 0.2, %v21_v32  ;;  %v30_v62 = vld [vmem:[%s363_s1 + $0x98] sm:$0xff]  ;;  %v31_v5 = vld [vmem:[%s363_s1 + $0xa0] sm:$0xff]  ;;  %v32_v6 = vld [vmem:[%s363_s1 + $0xa8] sm:$0xff] }
   0xb   :  { %207 = vmatpush1.bf16.msra.mxu0 %v206_v20  ;;  %v101_v37 = vsel %vm47_vm10, %v20_v26, %v74_v31  ;;  %v76_v39 = vmul.f32 0.2, %v22_v33  ;;  %vm48_vm11 = vcmp.ge.f32.partialorder %v21_v32, 0.0  ;;  %vm49_vm12 = vcmp.ge.f32.partialorder %v22_v33, 0.0  ;;  %v33_v12 = vld [vmem:[%s363_s1 + $0xb0] sm:$0xff]  ;;  %v34_v13 = vld [vmem:[%s363_s1 + $0xb8] sm:$0xff] }
   0xc   :  { %208 = vmatprep.subr.bf16.mxu0 %v243_v0  ;;  %v215_v42 = vpack.c.bf16 %v101_v37, %v100_v36  ;;  %v102_v43 = vsel %vm48_vm11, %v21_v32, %v75_v38  ;;  %v77_v45 = vmul.f32 0.2, %v23_v40  ;;  %v78_v46 = vmul.f32 0.2, %v24_v41  ;;  %v35_v19 = vld [vmem:[%s363_s1 + $0xc0] sm:$0xff]  ;;  %v36_v20 = vld [vmem:[%s363_s1 + $0xc8] sm:$0xff] }
   0xd   :  { %v103_v44 = vsel %vm49_vm12, %v22_v33, %v76_v39  ;;  %vm50_vm13 = vcmp.ge.f32.partialorder %v23_v40, 0.0  ;;  %vm51_vm14 = vcmp.ge.f32.partialorder %v24_v41, 0.0  ;;  %v79_v52 = vmul.f32 0.2, %v25_v47  ;;  %v37_v29 = vld [vmem:[%s363_s1 + $0xd0] sm:$0xff]  ;;  %v119_v34 = vld [vmem:[%s364_s0] sm:$0xff] }
   0xe   :  { %v218_v49 = vpack.c.bf16 %v103_v44, %v102_v43  ;;  %v104_v50 = vsel %vm50_vm13, %v23_v40, %v77_v45  ;;  %v105_v51 = vsel %vm51_vm14, %v24_v41, %v78_v46  ;;  %v80_v53 = vmul.f32 0.2, %v26_v48 }
   0xf   :  { %210 = vmatpush1.bf16.msra.mxu0 %v209_v27  ;;  %vm52_vm15 = vcmp.ge.f32.partialorder %v25_v47, 0.0  ;;  %vm53_vm0 = vcmp.ge.f32.partialorder %v26_v48, 0.0  ;;  %v221_v56 = vpack.c.bf16 %v105_v51, %v104_v50  ;;  %v81_v59 = vmul.f32 0.2, %v27_v54 }
  0x10   :  { %211 = vmatprep.subr.bf16.mxu0 %v243_v0  ;;  %v106_v57 = vsel %vm52_vm15, %v25_v47, %v79_v52  ;;  %v107_v58 = vsel %vm53_vm0, %v26_v48, %v80_v53  ;;  %v82_v60 = vmul.f32 0.2, %v28_v55  ;;  %vm54_vm1 = vcmp.ge.f32.partialorder %v27_v54, 0.0 }
  0x11   :  { %vm55_vm2 = vcmp.ge.f32.partialorder %v28_v55, 0.0  ;;  %v224_v63 = vpack.c.bf16 %v107_v58, %v106_v57  ;;  %v108_v1 = vsel %vm54_vm1, %v27_v54, %v81_v59  ;;  %v83_v3 = vmul.f32 0.2, %v29_v61 }
  0x12   :  { %v109_v2 = vsel %vm55_vm2, %v28_v55, %v82_v60  ;;  %v84_v4 = vmul.f32 0.2, %v30_v62  ;;  %vm56_vm3 = vcmp.ge.f32.partialorder %v29_v61, 0.0  ;;  %vm57_vm4 = vcmp.ge.f32.partialorder %v30_v62, 0.0 }
  0x13   :  { %213 = vmatpush1.bf16.msra.mxu0 %v212_v35  ;;  %v227_v7 = vpack.c.bf16 %v109_v2, %v108_v1  ;;  %v110_v8 = vsel %vm56_vm3, %v29_v61, %v83_v3  ;;  %v85_v10 = vmul.f32 0.2, %v31_v5  ;;  %v86_v11 = vmul.f32 0.2, %v32_v6 }
  0x14   :  { %214 = vmatprep.subr.bf16.mxu0 %v243_v0  ;;  %v111_v9 = vsel %vm57_vm4, %v30_v62, %v84_v4  ;;  %vm58_vm5 = vcmp.ge.f32.partialorder %v31_v5, 0.0  ;;  %vm59_vm6 = vcmp.ge.f32.partialorder %v32_v6, 0.0  ;;  %v87_v17 = vmul.f32 0.2, %v33_v12 }
  0x15   :  { %v230_v14 = vpack.c.bf16 %v111_v9, %v110_v8  ;;  %v112_v15 = vsel %vm58_vm5, %v31_v5, %v85_v10  ;;  %v113_v16 = vsel %vm59_vm6, %v32_v6, %v86_v11  ;;  %v88_v18 = vmul.f32 0.2, %v34_v13 }
  0x16   :  { %vm60_vm7 = vcmp.ge.f32.partialorder %v33_v12, 0.0  ;;  %vm61_vm8 = vcmp.ge.f32.partialorder %v34_v13, 0.0  ;;  %v233_v21 = vpack.c.bf16 %v113_v16, %v112_v15  ;;  %v89_v24 = vmul.f32 0.2, %v35_v19 }
  0x17   :  { %216 = vmatpush1.bf16.msra.mxu0 %v215_v42  ;;  %v114_v22 = vsel %vm60_vm7, %v33_v12, %v87_v17  ;;  %v115_v23 = vsel %vm61_vm8, %v34_v13, %v88_v18  ;;  %v90_v25 = vmul.f32 0.2, %v36_v20  ;;  %vm62_vm9 = vcmp.ge.f32.partialorder %v35_v19, 0.0 }
  0x18   :  { %217 = vmatprep.subr.bf16.mxu0 %v243_v0  ;;  %vm63_vm10 = vcmp.ge.f32.partialorder %v36_v20, 0.0  ;;  %v236_v26 = vpack.c.bf16 %v115_v23, %v114_v22  ;;  %v116_v27 = vsel %vm62_vm9, %v35_v19, %v89_v24  ;;  %v91_v31 = vmul.f32 0.2, %v37_v29 }
  0x19   :  { %v117_v28 = vsel %vm63_vm10, %v36_v20, %v90_v25  ;;  %vm64_vm11 = vcmp.ge.f32.partialorder %v37_v29, 0.0  ;;  %v244_v32 = vmov 0.0   ;;  %vm195_vm12 = vcmask 64512  }
  0x1a   :  { %v239_v30 = vpack.c.bf16 %v117_v28, %v116_v27  ;;  %v118_v33 = vsel %vm64_vm11, %v37_v29, %v91_v31 }
  0x1b   :  { %219 = vmatpush1.bf16.msra.mxu0 %v218_v49 }
  0x1c   :  { %220 = vmatprep.subr.bf16.mxu0 %v243_v0 }
  0x1f   :  { %222 = vmatpush1.bf16.msra.mxu0 %v221_v56 }
  0x20   :  { %223 = vmatprep.subr.bf16.mxu0 %v243_v0 }
  0x23   :  { %225 = vmatpush1.bf16.msra.mxu0 %v224_v63 }
  0x24   :  { %226 = vmatprep.subr.bf16.mxu0 %v243_v0 }
  0x27   :  { %228 = vmatpush1.bf16.msra.mxu0 %v227_v7 }
  0x28   :  { %229 = vmatprep.subr.bf16.mxu0 %v243_v0 }
  0x2b   :  { %231 = vmatpush1.bf16.msra.mxu0 %v230_v14 }
  0x2c   :  { %232 = vmatprep.subr.bf16.mxu0 %v243_v0 }
  0x2f   :  { %234 = vmatpush1.bf16.msra.mxu0 %v233_v21 }
  0x30   :  { %235 = vmatprep.subr.bf16.mxu0 %v243_v0 }
  0x33   :  { %237 = vmatpush1.bf16.msra.mxu0 %v236_v26 }
  0x34   :  { %238 = vmatprep.subr.bf16.mxu0 %v243_v0 }
  0x37   :  { %240 = vmatpush1.bf16.msra.mxu0 %v239_v30 }
  0x38   :  { %177 = vmatprep.subr.mxu0 %v244_v32 }
  0x3b   :  { %178 = vmatpush1.msra.mxu0 %v118_v33 }
  0x3c   :  { %190 = vmatmul.mubr.f32.vlgmr.msra.gmra.mrb[0].mxu0 %v119_v34 }
 0x10f   :  { %v191_v35 = vpop.f32.mrb[0].mxu0 }
 0x110   :  { %196 = vst.msk [vmem:[%s365_s2] sm:$0xff] %vm195_vm12, %v191_v35  ;;  %v193_v36 = vpop.f32.mrb[1].mxu0 }

// kernel: wavlet_forward.33
= control target key start
LH: loop header
LB: loop body
LE: loop exit
PB: predicated region body
PF: predicated region fallthrough
CT: control target
= control target key end

     0   :  { %vm20_vm0 = vcmask 64512   ;;  %s277_s1 = inlined_call_operand.vmem [shape: f32[8,8], index: 1, kind: input, shape index: {}]   ;;  %s278_s0 = inlined_call_operand.vmem [shape: f32[64,8], index: 0, kind: input, shape index: {}]   ;;  %s279_s2 = inlined_call_operand.vmem [shape: f32[64,8], index: 2, kind: output, shape index: {}]  }
   0x1   :  { %v11_v0 = vld [vmem:[%s277_s1] sm:$0xff]  ;;  %v13_v3 = vld [vmem:[%s278_s0 + $0x8] sm:$0xff]  ;;  %v14_v5 = vld [vmem:[%s278_s0 + $0x10] sm:$0xff] }
   0x2   :  { %v12_v1 = vld [vmem:[%s278_s0] sm:$0xff]  ;;  %179 = vmatprep.subr.mxu0 %v11_v0  ;;  %193 = vmatprep.subr.mxu1 %v11_v0  ;;  %v17_v4 = vld [vmem:[%s278_s0 + $0x28] sm:$0xff]  ;;  %v18_v6 = vld [vmem:[%s278_s0 + $0x30] sm:$0xff] }
   0x3   :  { %v16_v2 = vld [vmem:[%s278_s0 + $0x20] sm:$0xff]  ;;  %180 = vmatpush3.msra.mxu0 %v11_v0  ;;  %194 = vmatpush3.msra.mxu1 %v11_v0  ;;  %v15_v7 = vld [vmem:[%s278_s0 + $0x18] sm:$0xff] }
   0x4   :  { %181 = vmatprep.mubr.msk.f32.mxu0 %vm20_vm0, %v12_v1  ;;  %187 = vmatprep.mubr.msk.f32.mxu1 %vm20_vm0, %v16_v2  ;;  %v19_v8 = vld [vmem:[%s278_s0 + $0x38] sm:$0xff] }
   0x5   :  { %182 = vmatmul.mubr.msk.f32.vlgmr.msra.gmra.mrb[0].mxu0 %vm20_vm0, %v13_v3  ;;  %188 = vmatmul.mubr.msk.f32.vlgmr.msra.gmra.mrb[0].mxu1 %vm20_vm0, %v17_v4 }
   0x6   :  { %184 = vmatprep.mubr.msk.f32.mxu0 %vm20_vm0, %v14_v5  ;;  %190 = vmatprep.mubr.msk.f32.mxu1 %vm20_vm0, %v18_v6 }
   0x9   :  { %185 = vmatmul.mubr.msk.f32.gmra.mrb[2].mxu0 %vm20_vm0, %v15_v7  ;;  %191 = vmatmul.mubr.msk.f32.gmra.mrb[2].mxu1 %vm20_vm0, %v19_v8 }
  0xd8   :  { %v183_v9 = vpop.f32.mrb[0].mxu0  ;;  %v189_v10 = vpop.f32.mrb[0].mxu1 }
  0xd9   :  { %151 = vst.msk [vmem:[%s279_s2 + $0x8] sm:$0xff] %vm20_vm0, %v183_v9  ;;  %155 = vst.msk [vmem:[%s279_s2 + $0x28] sm:$0xff] %vm20_vm0, %v189_v10  ;;  %v111_v11 = vpop.f32.mrb[1].mxu0  ;;  %v131_v12 = vpop.f32.mrb[1].mxu1 }
  0xda   :  { %150 = vst.msk [vmem:[%s279_s2] sm:$0xff] %vm20_vm0, %v111_v11  ;;  %154 = vst.msk [vmem:[%s279_s2 + $0x20] sm:$0xff] %vm20_vm0, %v131_v12 }
  0xdc   :  { %v186_v13 = vpop.f32.mrb[2].mxu0  ;;  %v192_v14 = vpop.f32.mrb[2].mxu1 }
  0xdd   :  { %153 = vst.msk [vmem:[%s279_s2 + $0x18] sm:$0xff] %vm20_vm0, %v186_v13  ;;  %157 = vst.msk [vmem:[%s279_s2 + $0x38] sm:$0xff] %vm20_vm0, %v192_v14  ;;  %v121_v15 = vpop.f32.mrb[3].mxu0  ;;  %v141_v16 = vpop.f32.mrb[3].mxu1 }
  0xde   :  { %152 = vst.msk [vmem:[%s279_s2 + $0x10] sm:$0xff] %vm20_vm0, %v121_v15  ;;  %156 = vst.msk [vmem:[%s279_s2 + $0x30] sm:$0xff] %vm20_vm0, %v141_v16 }

// kernel: wavlet_forward.30
= control target key start
LH: loop header
LB: loop body
LE: loop exit
PB: predicated region body
PF: predicated region fallthrough
CT: control target
= control target key end

     0   :  { %v250_v0 = vmov 0.0|0.0   ;;  %vm125_vm8 = vcmask 719872   ;;  %s378_s1 = inlined_call_operand.vmem [shape: f32[216,8], index: 1, kind: input, shape index: {}]   ;;  %s379_s0 = inlined_call_operand.vmem [shape: f32[8,216], index: 0, kind: input, shape index: {}]   ;;  %s380_s2 = inlined_call_operand.vmem [shape: f32[8,8], index: 2, kind: input, shape index: {}]   ;;  %s381_s3 = inlined_call_operand.vmem [shape: f32[8,8], index: 3, kind: output, shape index: {}]  }
   0x1   :  { %209 = vmatprep.subr.bf16.mxu0 %v250_v0  ;;  %v14_v1 = vld [vmem:[%s378_s1] sm:$0xff]  ;;  %v15_v2 = vld [vmem:[%s378_s1 + $0x8] sm:$0xff]  ;;  %v16_v3 = vld [vmem:[%s378_s1 + $0x10] sm:$0xff] }
   0x2   :  { %vm41_vm0 = vcmp.ge.f32.partialorder %v14_v1, 0.0  ;;  %vm42_vm1 = vcmp.ge.f32.partialorder %v15_v2, 0.0  ;;  %v68_v4 = vmul.f32 0.2, %v14_v1  ;;  %v69_v5 = vmul.f32 0.2, %v15_v2 }
   0x3   :  { %v17_v6 = vld [vmem:[%s378_s1 + $0x18] sm:$0xff]  ;;  %vm43_vm2 = vcmp.ge.f32.partialorder %v16_v3, 0.0  ;;  %v70_v7 = vmul.f32 0.2, %v16_v3  ;;  %v18_v8 = vld [vmem:[%s378_s1 + $0x20] sm:$0xff]  ;;  %v19_v9 = vld [vmem:[%s378_s1 + $0x28] sm:$0xff] }
   0x4   :  { %v95_v10 = vsel %vm41_vm0, %v14_v1, %v68_v4  ;;  %v96_v11 = vsel %vm42_vm1, %v15_v2, %v69_v5  ;;  %vm44_vm3 = vcmp.ge.f32.partialorder %v17_v6, 0.0  ;;  %v71_v12 = vmul.f32 0.2, %v17_v6  ;;  %v20_v15 = vld [vmem:[%s378_s1 + $0x30] sm:$0xff]  ;;  %v21_v16 = vld [vmem:[%s378_s1 + $0x38] sm:$0xff]  ;;  %v22_v25 = vld [vmem:[%s378_s1 + $0x40] sm:$0xff] }
   0x5   :  { %v210_v13 = vpack.c.bf16 %v96_v11, %v95_v10  ;;  %v97_v14 = vsel %vm43_vm2, %v16_v3, %v70_v7  ;;  %vm45_vm4 = vcmp.ge.f32.partialorder %v18_v8, 0.0  ;;  %vm46_vm5 = vcmp.ge.f32.partialorder %v19_v9, 0.0  ;;  %v23_v26 = vld [vmem:[%s378_s1 + $0x48] sm:$0xff]  ;;  %v24_v32 = vld [vmem:[%s378_s1 + $0x50] sm:$0xff]  ;;  %v25_v33 = vld [vmem:[%s378_s1 + $0x58] sm:$0xff] }
   0x6   :  { %v98_v17 = vsel %vm44_vm3, %v17_v6, %v71_v12  ;;  %v72_v18 = vmul.f32 0.2, %v18_v8  ;;  %v73_v19 = vmul.f32 0.2, %v19_v9  ;;  %v74_v23 = vmul.f32 0.2, %v20_v15 }
   0x7   :  { %211 = vmatpush1.bf16.msra.mxu0 %v210_v13  ;;  %v213_v20 = vpack.c.bf16 %v98_v17, %v97_v14  ;;  %v75_v24 = vmul.f32 0.2, %v21_v16  ;;  %vm47_vm6 = vcmp.ge.f32.partialorder %v20_v15, 0.0  ;;  %vm48_vm7 = vcmp.ge.f32.partialorder %v21_v16, 0.0  ;;  %v123_v34 = vld [vmem:[%s379_s0 + $0x8] sm:$0xff]  ;;  %v26_v40 = vld [vmem:[%s378_s1 + $0x60] sm:$0xff] }
   0x8   :  { %212 = vmatprep.subr.bf16.mxu0 %v250_v0  ;;  %v99_v21 = vsel %vm45_vm4, %v18_v8, %v72_v18  ;;  %v100_v22 = vsel %vm46_vm5, %v19_v9, %v73_v19  ;;  %v101_v28 = vsel %vm47_vm6, %v20_v15, %v74_v23  ;;  %v76_v30 = vmul.f32 0.2, %v22_v25  ;;  %208 = vmatprep.mubr.msk.f32.mxu0 %vm125_vm8, %v123_v34  ;;  %v27_v41 = vld [vmem:[%s378_s1 + $0x68] sm:$0xff]  ;;  %v28_v47 = vld [vmem:[%s378_s1 + $0x70] sm:$0xff]  ;;  %v29_v48 = vld [vmem:[%s378_s1 + $0x78] sm:$0xff] }
   0x9   :  { %v216_v27 = vpack.c.bf16 %v100_v22, %v99_v21  ;;  %v102_v29 = vsel %vm48_vm7, %v21_v16, %v75_v24  ;;  %v77_v31 = vmul.f32 0.2, %v23_v26  ;;  %vm49_vm9 = vcmp.ge.f32.partialorder %v22_v25, 0.0  ;;  %v30_v54 = vld [vmem:[%s378_s1 + $0x80] sm:$0xff]  ;;  %v31_v55 = vld [vmem:[%s378_s1 + $0x88] sm:$0xff]  ;;  %v32_v61 = vld [vmem:[%s378_s1 + $0x90] sm:$0xff] }
   0xa   :  { %vm50_vm10 = vcmp.ge.f32.partialorder %v23_v26, 0.0  ;;  %v219_v35 = vpack.c.bf16 %v102_v29, %v101_v28  ;;  %v103_v36 = vsel %vm49_vm9, %v22_v25, %v76_v30  ;;  %v78_v38 = vmul.f32 0.2, %v24_v32  ;;  %v33_v62 = vld [vmem:[%s378_s1 + $0x98] sm:$0xff]  ;;  %v34_v5 = vld [vmem:[%s378_s1 + $0xa0] sm:$0xff]  ;;  %v35_v6 = vld [vmem:[%s378_s1 + $0xa8] sm:$0xff] }
   0xb   :  { %214 = vmatpush1.bf16.msra.mxu0 %v213_v20  ;;  %v104_v37 = vsel %vm50_vm10, %v23_v26, %v77_v31  ;;  %v79_v39 = vmul.f32 0.2, %v25_v33  ;;  %vm51_vm11 = vcmp.ge.f32.partialorder %v24_v32, 0.0  ;;  %vm52_vm12 = vcmp.ge.f32.partialorder %v25_v33, 0.0  ;;  %v36_v12 = vld [vmem:[%s378_s1 + $0xb0] sm:$0xff]  ;;  %v37_v13 = vld [vmem:[%s378_s1 + $0xb8] sm:$0xff] }
   0xc   :  { %215 = vmatprep.subr.bf16.mxu0 %v250_v0  ;;  %v222_v42 = vpack.c.bf16 %v104_v37, %v103_v36  ;;  %v105_v43 = vsel %vm51_vm11, %v24_v32, %v78_v38  ;;  %v80_v45 = vmul.f32 0.2, %v26_v40  ;;  %v81_v46 = vmul.f32 0.2, %v27_v41  ;;  %v38_v19 = vld [vmem:[%s378_s1 + $0xc0] sm:$0xff]  ;;  %v39_v20 = vld [vmem:[%s378_s1 + $0xc8] sm:$0xff] }
   0xd   :  { %v106_v44 = vsel %vm52_vm12, %v25_v33, %v79_v39  ;;  %vm53_vm13 = vcmp.ge.f32.partialorder %v26_v40, 0.0  ;;  %vm54_vm14 = vcmp.ge.f32.partialorder %v27_v41, 0.0  ;;  %v82_v52 = vmul.f32 0.2, %v28_v47  ;;  %v40_v29 = vld [vmem:[%s378_s1 + $0xd0] sm:$0xff]  ;;  %v122_v34 = vld [vmem:[%s379_s0] sm:$0xff] }
   0xe   :  { %v225_v49 = vpack.c.bf16 %v106_v44, %v105_v43  ;;  %v107_v50 = vsel %vm53_vm13, %v26_v40, %v80_v45  ;;  %v108_v51 = vsel %vm54_vm14, %v27_v41, %v81_v46  ;;  %v83_v53 = vmul.f32 0.2, %v29_v48 }
   0xf   :  { %217 = vmatpush1.bf16.msra.mxu0 %v216_v27  ;;  %vm55_vm15 = vcmp.ge.f32.partialorder %v28_v47, 0.0  ;;  %vm56_vm0 = vcmp.ge.f32.partialorder %v29_v48, 0.0  ;;  %v228_v56 = vpack.c.bf16 %v108_v51, %v107_v50  ;;  %v84_v59 = vmul.f32 0.2, %v30_v54 }
  0x10   :  { %218 = vmatprep.subr.bf16.mxu0 %v250_v0  ;;  %v109_v57 = vsel %vm55_vm15, %v28_v47, %v82_v52  ;;  %v110_v58 = vsel %vm56_vm0, %v29_v48, %v83_v53  ;;  %v85_v60 = vmul.f32 0.2, %v31_v55  ;;  %vm57_vm1 = vcmp.ge.f32.partialorder %v30_v54, 0.0 }
  0x11   :  { %vm58_vm2 = vcmp.ge.f32.partialorder %v31_v55, 0.0  ;;  %v231_v63 = vpack.c.bf16 %v110_v58, %v109_v57  ;;  %v111_v1 = vsel %vm57_vm1, %v30_v54, %v84_v59  ;;  %v86_v3 = vmul.f32 0.2, %v32_v61 }
  0x12   :  { %v112_v2 = vsel %vm58_vm2, %v31_v55, %v85_v60  ;;  %v87_v4 = vmul.f32 0.2, %v33_v62  ;;  %vm59_vm3 = vcmp.ge.f32.partialorder %v32_v61, 0.0  ;;  %vm60_vm4 = vcmp.ge.f32.partialorder %v33_v62, 0.0 }
  0x13   :  { %220 = vmatpush1.bf16.msra.mxu0 %v219_v35  ;;  %v234_v7 = vpack.c.bf16 %v112_v2, %v111_v1  ;;  %v113_v8 = vsel %vm59_vm3, %v32_v61, %v86_v3  ;;  %v88_v10 = vmul.f32 0.2, %v34_v5  ;;  %v89_v11 = vmul.f32 0.2, %v35_v6  ;;  %v124_v35 = vld [vmem:[%s380_s2] sm:$0xff] }
  0x14   :  { %221 = vmatprep.subr.bf16.mxu0 %v250_v0  ;;  %v114_v9 = vsel %vm60_vm4, %v33_v62, %v87_v4  ;;  %vm61_vm5 = vcmp.ge.f32.partialorder %v34_v5, 0.0  ;;  %vm62_vm6 = vcmp.ge.f32.partialorder %v35_v6, 0.0  ;;  %v90_v17 = vmul.f32 0.2, %v36_v12 }
  0x15   :  { %v237_v14 = vpack.c.bf16 %v114_v9, %v113_v8  ;;  %v115_v15 = vsel %vm61_vm5, %v34_v5, %v88_v10  ;;  %v116_v16 = vsel %vm62_vm6, %v35_v6, %v89_v11  ;;  %v91_v18 = vmul.f32 0.2, %v37_v13 }
  0x16   :  { %vm63_vm7 = vcmp.ge.f32.partialorder %v36_v12, 0.0  ;;  %vm64_vm8 = vcmp.ge.f32.partialorder %v37_v13, 0.0  ;;  %v240_v21 = vpack.c.bf16 %v116_v16, %v115_v15  ;;  %v92_v24 = vmul.f32 0.2, %v38_v19 }
  0x17   :  { %223 = vmatpush1.bf16.msra.mxu0 %v222_v42  ;;  %v117_v22 = vsel %vm63_vm7, %v36_v12, %v90_v17  ;;  %v118_v23 = vsel %vm64_vm8, %v37_v13, %v91_v18  ;;  %v93_v25 = vmul.f32 0.2, %v39_v20  ;;  %vm65_vm9 = vcmp.ge.f32.partialorder %v38_v19, 0.0 }
  0x18   :  { %224 = vmatprep.subr.bf16.mxu0 %v250_v0  ;;  %vm66_vm10 = vcmp.ge.f32.partialorder %v39_v20, 0.0  ;;  %v243_v26 = vpack.c.bf16 %v118_v23, %v117_v22  ;;  %v119_v27 = vsel %vm65_vm9, %v38_v19, %v92_v24  ;;  %v94_v31 = vmul.f32 0.2, %v40_v29 }
  0x19   :  { %v120_v28 = vsel %vm66_vm10, %v39_v20, %v93_v25  ;;  %vm67_vm11 = vcmp.ge.f32.partialorder %v40_v29, 0.0  ;;  %v251_v32 = vmov 0.0   ;;  %vm202_vm13 = vcmask 64512  }
  0x1a   :  { %v246_v30 = vpack.c.bf16 %v120_v28, %v119_v27  ;;  %v121_v33 = vsel %vm67_vm11, %v40_v29, %v94_v31 }
  0x1b   :  { %226 = vmatpush1.bf16.msra.mxu0 %v225_v49 }
  0x1c   :  { %227 = vmatprep.subr.bf16.mxu0 %v250_v0 }
  0x1f   :  { %229 = vmatpush1.bf16.msra.mxu0 %v228_v56 }
  0x20   :  { %230 = vmatprep.subr.bf16.mxu0 %v250_v0 }
  0x23   :  { %232 = vmatpush1.bf16.msra.mxu0 %v231_v63 }
  0x24   :  { %233 = vmatprep.subr.bf16.mxu0 %v250_v0 }
  0x27   :  { %235 = vmatpush1.bf16.msra.mxu0 %v234_v7 }
  0x28   :  { %236 = vmatprep.subr.bf16.mxu0 %v250_v0 }
  0x2b   :  { %238 = vmatpush1.bf16.msra.mxu0 %v237_v14 }
  0x2c   :  { %239 = vmatprep.subr.bf16.mxu0 %v250_v0 }
  0x2f   :  { %241 = vmatpush1.bf16.msra.mxu0 %v240_v21 }
  0x30   :  { %242 = vmatprep.subr.bf16.mxu0 %v250_v0 }
  0x33   :  { %244 = vmatpush1.bf16.msra.mxu0 %v243_v26 }
  0x34   :  { %245 = vmatprep.subr.bf16.mxu0 %v250_v0 }
  0x37   :  { %247 = vmatpush1.bf16.msra.mxu0 %v246_v30 }
  0x38   :  { %181 = vmatprep.subr.mxu0 %v251_v32 }
  0x3b   :  { %182 = vmatpush1.msra.mxu0 %v121_v33 }
  0x3c   :  { %194 = vmatmul.mubr.f32.vlgmr.msra.gmra.mrb[0].mxu0 %v122_v34 }
 0x10f   :  { %v195_v36 = vpop.f32.mrb[0].mxu0 }
 0x110   :  { %v196_v37 = vadd.f32 %v195_v36, %v124_v35  ;;  %v197_v38 = vpop.f32.mrb[1].mxu0 }
 0x112   :  { %vm199_vm12 = vcmp.ge.f32.partialorder %v196_v37, 0.0  ;;  %v200_v0 = vmul.f32 0.2, %v196_v37 }
 0x114   :  { %v201_v39 = vsel %vm199_vm12, %v196_v37, %v200_v0 }
 0x115   :  { %203 = vst.msk [vmem:[%s381_s3] sm:$0xff] %vm202_vm13, %v201_v39 }

// kernel: wavlet_forward.36
= control target key start
LH: loop header
LB: loop body
LE: loop exit
PB: predicated region body
PF: predicated region fallthrough
CT: control target
= control target key end

     0   :  { %vm20_vm0 = vcmask 64512   ;;  %vm150_vm1 = vcmask 523264   ;;  %s278_s1 = inlined_call_operand.vmem [shape: f32[8,64], index: 1, kind: input, shape index: {}]   ;;  %s279_s0 = inlined_call_operand.vmem [shape: f32[64,8], index: 0, kind: input, shape index: {}]   ;;  %s280_s2 = inlined_call_operand.vmem [shape: f32[64,64], index: 2, kind: output, shape index: {}]  }
   0x1   :  { %v11_v0 = vld [vmem:[%s278_s1] sm:$0xff]  ;;  %v13_v3 = vld [vmem:[%s279_s0 + $0x8] sm:$0xff]  ;;  %v14_v5 = vld [vmem:[%s279_s0 + $0x10] sm:$0xff] }
   0x2   :  { %v12_v1 = vld [vmem:[%s279_s0] sm:$0xff]  ;;  %180 = vmatprep.subr.mxu0 %v11_v0  ;;  %194 = vmatprep.subr.mxu1 %v11_v0  ;;  %v17_v4 = vld [vmem:[%s279_s0 + $0x28] sm:$0xff]  ;;  %v18_v6 = vld [vmem:[%s279_s0 + $0x30] sm:$0xff] }
   0x3   :  { %v16_v2 = vld [vmem:[%s279_s0 + $0x20] sm:$0xff]  ;;  %181 = vmatpush3.msra.mxu0 %v11_v0  ;;  %195 = vmatpush3.msra.mxu1 %v11_v0  ;;  %v15_v7 = vld [vmem:[%s279_s0 + $0x18] sm:$0xff] }
   0x4   :  { %182 = vmatprep.mubr.msk.f32.mxu0 %vm20_vm0, %v12_v1  ;;  %188 = vmatprep.mubr.msk.f32.mxu1 %vm20_vm0, %v16_v2  ;;  %v19_v8 = vld [vmem:[%s279_s0 + $0x38] sm:$0xff] }
   0x5   :  { %183 = vmatmul.mubr.msk.f32.vlgmr.msra.gmra.mrb[0].mxu0 %vm20_vm0, %v13_v3  ;;  %189 = vmatmul.mubr.msk.f32.vlgmr.msra.gmra.mrb[0].mxu1 %vm20_vm0, %v17_v4 }
   0x6   :  { %185 = vmatprep.mubr.msk.f32.mxu0 %vm20_vm0, %v14_v5  ;;  %191 = vmatprep.mubr.msk.f32.mxu1 %vm20_vm0, %v18_v6 }
   0x9   :  { %186 = vmatmul.mubr.msk.f32.gmra.mrb[2].mxu0 %vm20_vm0, %v15_v7  ;;  %192 = vmatmul.mubr.msk.f32.gmra.mrb[2].mxu1 %vm20_vm0, %v19_v8 }
  0xd8   :  { %v184_v9 = vpop.f32.mrb[0].mxu0  ;;  %v190_v10 = vpop.f32.mrb[0].mxu1 }
  0xd9   :  { %152 = vst.msk [vmem:[%s280_s2 + $0x8] sm:$0xff] %vm150_vm1, %v184_v9  ;;  %156 = vst.msk [vmem:[%s280_s2 + $0x28] sm:$0xff] %vm150_vm1, %v190_v10  ;;  %v111_v11 = vpop.f32.mrb[1].mxu0  ;;  %v131_v12 = vpop.f32.mrb[1].mxu1 }
  0xda   :  { %151 = vst.msk [vmem:[%s280_s2] sm:$0xff] %vm150_vm1, %v111_v11  ;;  %155 = vst.msk [vmem:[%s280_s2 + $0x20] sm:$0xff] %vm150_vm1, %v131_v12 }
  0xdc   :  { %v187_v13 = vpop.f32.mrb[2].mxu0  ;;  %v193_v14 = vpop.f32.mrb[2].mxu1 }
  0xdd   :  { %154 = vst.msk [vmem:[%s280_s2 + $0x18] sm:$0xff] %vm150_vm1, %v187_v13  ;;  %158 = vst.msk [vmem:[%s280_s2 + $0x38] sm:$0xff] %vm150_vm1, %v193_v14  ;;  %v121_v15 = vpop.f32.mrb[3].mxu0  ;;  %v141_v16 = vpop.f32.mrb[3].mxu1 }
  0xde   :  { %153 = vst.msk [vmem:[%s280_s2 + $0x10] sm:$0xff] %vm150_vm1, %v121_v15  ;;  %157 = vst.msk [vmem:[%s280_s2 + $0x30] sm:$0xff] %vm150_vm1, %v141_v16 }

// kernel: wavlet_forward.37
= control target key start
LH: loop header
LB: loop body
LE: loop exit
PB: predicated region body
PF: predicated region fallthrough
CT: control target
= control target key end

     0   :  { %vm121_vm0 = vcmask 719872   ;;  %s740_s1 = inlined_call_operand.vmem [shape: f32[216,512], index: 1, kind: input, shape index: {}]   ;;  %s741_s0 = inlined_call_operand.vmem [shape: f32[8,216], index: 0, kind: input, shape index: {}]   ;;  %s742_s2 = inlined_call_operand.vmem [shape: f32[8,512], index: 2, kind: output, shape index: {}]  }
   0x1   :  { %v12_v0 = vld [vmem:[%s740_s1 + $0x8] sm:$0xff]  ;;  %v14_v2 = vld [vmem:[%s740_s1 + $0x18] sm:$0xff]  ;;  %v11_v5 = vld [vmem:[%s740_s1] sm:$0xff] }
   0x2   :  { %v16_v1 = vld [vmem:[%s740_s1 + $0x28] sm:$0xff]  ;;  %v18_v4 = vld [vmem:[%s740_s1 + $0x38] sm:$0xff]  ;;  %v15_v6 = vld [vmem:[%s740_s1 + $0x20] sm:$0xff] }
   0x3   :  { %v277_v3 = vpack.c.bf16 %v16_v1, %v12_v0  ;;  %v329_v7 = vpack.c.bf16 %v18_v4, %v14_v2  ;;  %v279_v8 = vpack.c.bf16 %v15_v6, %v11_v5  ;;  %v13_v9 = vld [vmem:[%s740_s1 + $0x10] sm:$0xff]  ;;  %v20_v11 = vld [vmem:[%s740_s1 + $0x48] sm:$0xff]  ;;  %v22_v14 = vld [vmem:[%s740_s1 + $0x58] sm:$0xff] }
   0x4   :  { %v17_v10 = vld [vmem:[%s740_s1 + $0x30] sm:$0xff]  ;;  %v24_v13 = vld [vmem:[%s740_s1 + $0x68] sm:$0xff]  ;;  %v26_v15 = vld [vmem:[%s740_s1 + $0x78] sm:$0xff] }
   0x5   :  { %278 = vmatprep.subr.bf16.mxu0 %v277_v3  ;;  %v331_v12 = vpack.c.bf16 %v17_v10, %v13_v9  ;;  %330 = vmatprep.subr.bf16.mxu1 %v329_v7  ;;  %v281_v16 = vpack.c.bf16 %v24_v13, %v20_v11  ;;  %v333_v17 = vpack.c.bf16 %v26_v15, %v22_v14  ;;  %v19_v18 = vld [vmem:[%s740_s1 + $0x40] sm:$0xff]  ;;  %v21_v20 = vld [vmem:[%s740_s1 + $0x50] sm:$0xff]  ;;  %v28_v23 = vld [vmem:[%s740_s1 + $0x88] sm:$0xff] }
   0x6   :  { %280 = vmatpush1.bf16.msra.mxu0 %v279_v8  ;;  %v23_v19 = vld [vmem:[%s740_s1 + $0x60] sm:$0xff]  ;;  %v25_v22 = vld [vmem:[%s740_s1 + $0x70] sm:$0xff]  ;;  %v32_v24 = vld [vmem:[%s740_s1 + $0xa8] sm:$0xff] }
   0x7   :  { %332 = vmatpush1.bf16.msra.mxu1 %v331_v12  ;;  %v283_v21 = vpack.c.bf16 %v23_v19, %v19_v18  ;;  %282 = vmatprep.subr.bf16.mxu0 %v281_v16  ;;  %v335_v25 = vpack.c.bf16 %v25_v22, %v21_v20  ;;  %v285_v26 = vpack.c.bf16 %v32_v24, %v28_v23  ;;  %v30_v27 = vld [vmem:[%s740_s1 + $0x98] sm:$0xff]  ;;  %v27_v29 = vld [vmem:[%s740_s1 + $0x80] sm:$0xff]  ;;  %v29_v32 = vld [vmem:[%s740_s1 + $0x90] sm:$0xff] }
   0x8   :  { %334 = vmatprep.subr.bf16.mxu1 %v333_v17  ;;  %v34_v28 = vld [vmem:[%s740_s1 + $0xb8] sm:$0xff]  ;;  %v31_v31 = vld [vmem:[%s740_s1 + $0xa0] sm:$0xff]  ;;  %v33_v33 = vld [vmem:[%s740_s1 + $0xb0] sm:$0xff] }
   0x9   :  { %v337_v30 = vpack.c.bf16 %v34_v28, %v30_v27  ;;  %v287_v34 = vpack.c.bf16 %v31_v31, %v27_v29  ;;  %v36_v35 = vld [vmem:[%s740_s1 + $0xc8] sm:$0xff]  ;;  %v38_v37 = vld [vmem:[%s740_s1 + $0xd8] sm:$0xff]  ;;  %v339_v38 = vpack.c.bf16 %v33_v33, %v29_v32  ;;  %v35_v41 = vld [vmem:[%s740_s1 + $0xc0] sm:$0xff] }
   0xa   :  { %284 = vmatpush1.bf16.msra.mxu0 %v283_v21  ;;  %v40_v36 = vld [vmem:[%s740_s1 + $0xe8] sm:$0xff]  ;;  %v42_v40 = vld [vmem:[%s740_s1 + $0xf8] sm:$0xff]  ;;  %v39_v42 = vld [vmem:[%s740_s1 + $0xe0] sm:$0xff] }
   0xb   :  { %336 = vmatpush1.bf16.msra.mxu1 %v335_v25  ;;  %286 = vmatprep.subr.bf16.mxu0 %v285_v26  ;;  %v289_v39 = vpack.c.bf16 %v40_v36, %v36_v35  ;;  %v341_v43 = vpack.c.bf16 %v42_v40, %v38_v37  ;;  %v37_v44 = vld [vmem:[%s740_s1 + $0xd0] sm:$0xff]  ;;  %v44_v46 = vld [vmem:[%s740_s1 + $0x108] sm:$0xff]  ;;  %v46_v48 = vld [vmem:[%s740_s1 + $0x118] sm:$0xff]  ;;  %v291_v50 = vpack.c.bf16 %v39_v42, %v35_v41 }
   0xc   :  { %338 = vmatprep.subr.bf16.mxu1 %v337_v30  ;;  %v41_v45 = vld [vmem:[%s740_s1 + $0xf0] sm:$0xff]  ;;  %v48_v47 = vld [vmem:[%s740_s1 + $0x128] sm:$0xff]  ;;  %v50_v49 = vld [vmem:[%s740_s1 + $0x138] sm:$0xff] }
   0xd   :  { %v343_v51 = vpack.c.bf16 %v41_v45, %v37_v44  ;;  %v293_v52 = vpack.c.bf16 %v48_v47, %v44_v46  ;;  %v43_v53 = vld [vmem:[%s740_s1 + $0x100] sm:$0xff]  ;;  %v45_v55 = vld [vmem:[%s740_s1 + $0x110] sm:$0xff]  ;;  %v345_v56 = vpack.c.bf16 %v50_v49, %v46_v48  ;;  %v52_v58 = vld [vmem:[%s740_s1 + $0x148] sm:$0xff] }
   0xe   :  { %288 = vmatpush1.bf16.msra.mxu0 %v287_v34  ;;  %v47_v54 = vld [vmem:[%s740_s1 + $0x120] sm:$0xff]  ;;  %v49_v57 = vld [vmem:[%s740_s1 + $0x130] sm:$0xff]  ;;  %v56_v59 = vld [vmem:[%s740_s1 + $0x168] sm:$0xff] }
   0xf   :  { %340 = vmatpush1.bf16.msra.mxu1 %v339_v38  ;;  %290 = vmatprep.subr.bf16.mxu0 %v289_v39  ;;  %v54_v60 = vld [vmem:[%s740_s1 + $0x158] sm:$0xff]  ;;  %v295_v62 = vpack.c.bf16 %v47_v54, %v43_v53  ;;  %v347_v63 = vpack.c.bf16 %v49_v57, %v45_v55  ;;  %v297_v0 = vpack.c.bf16 %v56_v59, %v52_v58  ;;  %v51_v1 = vld [vmem:[%s740_s1 + $0x140] sm:$0xff]  ;;  %v53_v3 = vld [vmem:[%s740_s1 + $0x150] sm:$0xff] }
  0x10   :  { %342 = vmatprep.subr.bf16.mxu1 %v341_v43  ;;  %v58_v61 = vld [vmem:[%s740_s1 + $0x178] sm:$0xff]  ;;  %v55_v2 = vld [vmem:[%s740_s1 + $0x160] sm:$0xff]  ;;  %v57_v5 = vld [vmem:[%s740_s1 + $0x170] sm:$0xff] }
  0x11   :  { %v349_v4 = vpack.c.bf16 %v58_v61, %v54_v60  ;;  %v60_v6 = vld [vmem:[%s740_s1 + $0x188] sm:$0xff]  ;;  %v62_v8 = vld [vmem:[%s740_s1 + $0x198] sm:$0xff]  ;;  %v299_v10 = vpack.c.bf16 %v55_v2, %v51_v1  ;;  %v351_v11 = vpack.c.bf16 %v57_v5, %v53_v3  ;;  %v59_v13 = vld [vmem:[%s740_s1 + $0x180] sm:$0xff] }
  0x12   :  { %292 = vmatpush1.bf16.msra.mxu0 %v291_v50  ;;  %v64_v7 = vld [vmem:[%s740_s1 + $0x1a8] sm:$0xff]  ;;  %v66_v9 = vld [vmem:[%s740_s1 + $0x1b8] sm:$0xff]  ;;  %v63_v14 = vld [vmem:[%s740_s1 + $0x1a0] sm:$0xff] }
  0x13   :  { %344 = vmatpush1.bf16.msra.mxu1 %v343_v51  ;;  %294 = vmatprep.subr.bf16.mxu0 %v293_v52  ;;  %v301_v12 = vpack.c.bf16 %v64_v7, %v60_v6  ;;  %v61_v15 = vld [vmem:[%s740_s1 + $0x190] sm:$0xff]  ;;  %v353_v16 = vpack.c.bf16 %v66_v9, %v62_v8  ;;  %v68_v18 = vld [vmem:[%s740_s1 + $0x1c8] sm:$0xff]  ;;  %v70_v20 = vld [vmem:[%s740_s1 + $0x1d8] sm:$0xff]  ;;  %v303_v22 = vpack.c.bf16 %v63_v14, %v59_v13 }
  0x14   :  { %346 = vmatprep.subr.bf16.mxu1 %v345_v56  ;;  %v65_v17 = vld [vmem:[%s740_s1 + $0x1b0] sm:$0xff]  ;;  %v72_v19 = vld [vmem:[%s740_s1 + $0x1e8] sm:$0xff]  ;;  %v74_v21 = vld [vmem:[%s740_s1 + $0x1f8] sm:$0xff] }
  0x15   :  { %v355_v23 = vpack.c.bf16 %v65_v17, %v61_v15  ;;  %v305_v24 = vpack.c.bf16 %v72_v19, %v68_v18  ;;  %v67_v25 = vld [vmem:[%s740_s1 + $0x1c0] sm:$0xff]  ;;  %v69_v27 = vld [vmem:[%s740_s1 + $0x1d0] sm:$0xff]  ;;  %v357_v28 = vpack.c.bf16 %v74_v21, %v70_v20  ;;  %v76_v30 = vld [vmem:[%s740_s1 + $0x208] sm:$0xff] }
  0x16   :  { %296 = vmatpush1.bf16.msra.mxu0 %v295_v62  ;;  %v71_v26 = vld [vmem:[%s740_s1 + $0x1e0] sm:$0xff]  ;;  %v73_v29 = vld [vmem:[%s740_s1 + $0x1f0] sm:$0xff]  ;;  %v80_v31 = vld [vmem:[%s740_s1 + $0x228] sm:$0xff] }
  0x17   :  { %348 = vmatpush1.bf16.msra.mxu1 %v347_v63  ;;  %298 = vmatprep.subr.bf16.mxu0 %v297_v0  ;;  %v78_v32 = vld [vmem:[%s740_s1 + $0x218] sm:$0xff]  ;;  %v307_v34 = vpack.c.bf16 %v71_v26, %v67_v25  ;;  %v359_v35 = vpack.c.bf16 %v73_v29, %v69_v27  ;;  %v309_v36 = vpack.c.bf16 %v80_v31, %v76_v30  ;;  %v75_v37 = vld [vmem:[%s740_s1 + $0x200] sm:$0xff]  ;;  %v77_v39 = vld [vmem:[%s740_s1 + $0x210] sm:$0xff] }
  0x18   :  { %350 = vmatprep.subr.bf16.mxu1 %v349_v4  ;;  %v82_v33 = vld [vmem:[%s740_s1 + $0x238] sm:$0xff]  ;;  %v79_v38 = vld [vmem:[%s740_s1 + $0x220] sm:$0xff]  ;;  %v81_v41 = vld [vmem:[%s740_s1 + $0x230] sm:$0xff] }
  0x19   :  { %v361_v40 = vpack.c.bf16 %v82_v33, %v78_v32  ;;  %v84_v42 = vld [vmem:[%s740_s1 + $0x248] sm:$0xff]  ;;  %v86_v44 = vld [vmem:[%s740_s1 + $0x258] sm:$0xff]  ;;  %v311_v46 = vpack.c.bf16 %v79_v38, %v75_v37  ;;  %v363_v47 = vpack.c.bf16 %v81_v41, %v77_v39  ;;  %v83_v49 = vld [vmem:[%s740_s1 + $0x240] sm:$0xff] }
  0x1a   :  { %300 = vmatpush1.bf16.msra.mxu0 %v299_v10  ;;  %v88_v43 = vld [vmem:[%s740_s1 + $0x268] sm:$0xff]  ;;  %v90_v45 = vld [vmem:[%s740_s1 + $0x278] sm:$0xff]  ;;  %v87_v50 = vld [vmem:[%s740_s1 + $0x260] sm:$0xff] }
  0x1b   :  { %352 = vmatpush1.bf16.msra.mxu1 %v351_v11  ;;  %302 = vmatprep.subr.bf16.mxu0 %v301_v12  ;;  %v313_v48 = vpack.c.bf16 %v88_v43, %v84_v42  ;;  %v85_v51 = vld [vmem:[%s740_s1 + $0x250] sm:$0xff]  ;;  %v365_v52 = vpack.c.bf16 %v90_v45, %v86_v44  ;;  %v92_v54 = vld [vmem:[%s740_s1 + $0x288] sm:$0xff]  ;;  %v94_v56 = vld [vmem:[%s740_s1 + $0x298] sm:$0xff]  ;;  %v315_v59 = vpack.c.bf16 %v87_v50, %v83_v49 }
  0x1c   :  { %354 = vmatprep.subr.bf16.mxu1 %v353_v16  ;;  %v89_v53 = vld [vmem:[%s740_s1 + $0x270] sm:$0xff]  ;;  %v96_v55 = vld [vmem:[%s740_s1 + $0x2a8] sm:$0xff]  ;;  %v98_v57 = vld [vmem:[%s740_s1 + $0x2b8] sm:$0xff] }
  0x1d   :  { %v120_v58 = vld [vmem:[%s741_s0 + $0x8] sm:$0xff]  ;;  %v367_v60 = vpack.c.bf16 %v89_v53, %v85_v51  ;;  %v317_v61 = vpack.c.bf16 %v96_v55, %v92_v54  ;;  %v91_v62 = vld [vmem:[%s740_s1 + $0x280] sm:$0xff]  ;;  %v93_v0 = vld [vmem:[%s740_s1 + $0x290] sm:$0xff]  ;;  %v369_v1 = vpack.c.bf16 %v98_v57, %v94_v56 }
  0x1e   :  { %304 = vmatpush1.bf16.msra.mxu0 %v303_v22  ;;  %275 = vmatprep.mubr.msk.f32.mxu0 %vm121_vm0, %v120_v58  ;;  %v95_v63 = vld [vmem:[%s740_s1 + $0x2a0] sm:$0xff]  ;;  %v97_v2 = vld [vmem:[%s740_s1 + $0x2b0] sm:$0xff]  ;;  %v100_v3 = vld [vmem:[%s740_s1 + $0x2c8] sm:$0xff] }
  0x1f   :  { %356 = vmatpush1.bf16.msra.mxu1 %v355_v23  ;;  %306 = vmatprep.subr.bf16.mxu0 %v305_v24  ;;  %v104_v4 = vld [vmem:[%s740_s1 + $0x2e8] sm:$0xff]  ;;  %v102_v5 = vld [vmem:[%s740_s1 + $0x2d8] sm:$0xff]  ;;  %v319_v7 = vpack.c.bf16 %v95_v63, %v91_v62  ;;  %v371_v8 = vpack.c.bf16 %v97_v2, %v93_v0  ;;  %v99_v10 = vld [vmem:[%s740_s1 + $0x2c0] sm:$0xff] }
  0x20   :  { %358 = vmatprep.subr.bf16.mxu1 %v357_v28  ;;  %276 = vmatprep.mubr.msk.f32.mxu1 %vm121_vm0, %v120_v58  ;;  %v106_v6 = vld [vmem:[%s740_s1 + $0x2f8] sm:$0xff]  ;;  %v321_v9 = vpack.c.bf16 %v104_v4, %v100_v3  ;;  %v103_v11 = vld [vmem:[%s740_s1 + $0x2e0] sm:$0xff]  ;;  %v101_v12 = vld [vmem:[%s740_s1 + $0x2d0] sm:$0xff] }
  0x21   :  { %v373_v13 = vpack.c.bf16 %v106_v6, %v102_v5  ;;  %v105_v14 = vld [vmem:[%s740_s1 + $0x2f0] sm:$0xff]  ;;  %v108_v15 = vld [vmem:[%s740_s1 + $0x308] sm:$0xff]  ;;  %v110_v17 = vld [vmem:[%s740_s1 + $0x318] sm:$0xff]  ;;  %v323_v19 = vpack.c.bf16 %v103_v11, %v99_v10 }
  0x22   :  { %308 = vmatpush1.bf16.msra.mxu0 %v307_v34  ;;  %v112_v16 = vld [vmem:[%s740_s1 + $0x328] sm:$0xff]  ;;  %v114_v18 = vld [vmem:[%s740_s1 + $0x338] sm:$0xff]  ;;  %v375_v20 = vpack.c.bf16 %v105_v14, %v101_v12  ;;  %v107_v22 = vld [vmem:[%s740_s1 + $0x300] sm:$0xff] }
  0x23   :  { %360 = vmatpush1.bf16.msra.mxu1 %v359_v35  ;;  %310 = vmatprep.subr.bf16.mxu0 %v309_v36  ;;  %v325_v21 = vpack.c.bf16 %v112_v16, %v108_v15  ;;  %v111_v23 = vld [vmem:[%s740_s1 + $0x320] sm:$0xff]  ;;  %v377_v24 = vpack.c.bf16 %v114_v18, %v110_v17  ;;  %v109_v25 = vld [vmem:[%s740_s1 + $0x310] sm:$0xff]  ;;  %v116_v29 = vld [vmem:[%s740_s1 + $0x348] sm:$0xff] }
  0x24   :  { %362 = vmatprep.subr.bf16.mxu1 %v361_v40  ;;  %v113_v26 = vld [vmem:[%s740_s1 + $0x330] sm:$0xff]  ;;  %v327_v27 = vpack.c.bf16 %v111_v23, %v107_v22  ;;  %v118_v30 = vld [vmem:[%s740_s1 + $0x358] sm:$0xff]  ;;  %v115_v31 = vld [vmem:[%s740_s1 + $0x340] sm:$0xff] }
  0x25   :  { %v379_v28 = vpack.c.bf16 %v113_v26, %v109_v25  ;;  %v117_v32 = vld [vmem:[%s740_s1 + $0x350] sm:$0xff]  ;;  %v119_v33 = vld [vmem:[%s741_s0] sm:$0xff] }
  0x26   :  { %312 = vmatpush1.bf16.msra.mxu0 %v311_v46 }
  0x27   :  { %364 = vmatpush1.bf16.msra.mxu1 %v363_v47  ;;  %314 = vmatprep.subr.bf16.mxu0 %v313_v48 }
  0x28   :  { %366 = vmatprep.subr.bf16.mxu1 %v365_v52 }
  0x2a   :  { %316 = vmatpush1.bf16.msra.mxu0 %v315_v59 }
  0x2b   :  { %368 = vmatpush1.bf16.msra.mxu1 %v367_v60  ;;  %318 = vmatprep.subr.bf16.mxu0 %v317_v61 }
  0x2c   :  { %370 = vmatprep.subr.bf16.mxu1 %v369_v1 }
  0x2e   :  { %320 = vmatpush1.bf16.msra.mxu0 %v319_v7 }
  0x2f   :  { %372 = vmatpush1.bf16.msra.mxu1 %v371_v8  ;;  %322 = vmatprep.subr.bf16.mxu0 %v321_v9 }
  0x30   :  { %374 = vmatprep.subr.bf16.mxu1 %v373_v13 }
  0x32   :  { %324 = vmatpush1.bf16.msra.mxu0 %v323_v19 }
  0x33   :  { %376 = vmatpush1.bf16.msra.mxu1 %v375_v20  ;;  %326 = vmatprep.subr.bf16.mxu0 %v325_v21 }
  0x34   :  { %378 = vmatprep.subr.bf16.mxu1 %v377_v24 }
  0x36   :  { %328 = vmatpush1.bf16.msra.mxu0 %v327_v27 }
  0x37   :  { %380 = vmatpush1.bf16.msra.mxu1 %v379_v28  ;;  %177 = vmatprep.subr.mxu0 %v116_v29 }
  0x38   :  { %248 = vmatprep.subr.mxu1 %v118_v30 }
  0x3a   :  { %178 = vmatpush1.msra.mxu0 %v115_v31 }
  0x3b   :  { %249 = vmatpush1.msra.mxu1 %v117_v32  ;;  %190 = vmatmul.mubr.f32.vlgmr.msra.gmra.mrb[0].mxu0 %v119_v33 }
  0x3c   :  { %261 = vmatmul.mubr.f32.vlgmr.msra.gmra.mrb[0].mxu1 %v119_v33 }
 0x10e   :  { %v191_v34 = vpop.f32.mrb[0].mxu0 }
 0x10f   :  { %267 = vst [vmem:[%s742_s2] sm:$0xff] %v191_v34  ;;  %v262_v35 = vpop.f32.mrb[0].mxu1  ;;  %v193_v36 = vpop.f32.mrb[1].mxu0 }
 0x110   :  { %269 = vst [vmem:[%s742_s2 + $0x10] sm:$0xff] %v262_v35  ;;  %268 = vst [vmem:[%s742_s2 + $0x8] sm:$0xff] %v193_v36  ;;  %v264_v37 = vpop.f32.mrb[1].mxu1 }
 0x111   :  { %270 = vst [vmem:[%s742_s2 + $0x18] sm:$0xff] %v264_v37 }

// kernel: wavlet_forward.39
= control target key start
LH: loop header
LB: loop body
LE: loop exit
PB: predicated region body
PF: predicated region fallthrough
CT: control target
= control target key end

     0   :  { %vm122_vm0 = vcmask 719872   ;;  %s772_s1 = inlined_call_operand.vmem [shape: f32[216,512], index: 1, kind: input, shape index: {}]   ;;  %s773_s0 = inlined_call_operand.vmem [shape: f32[3,216], index: 0, kind: input, shape index: {}]   ;;  %s774_s2 = inlined_call_operand.vmem [shape: f32[3,512], index: 2, kind: output, shape index: {}]  }
   0x1   :  { %v12_v0 = vld [vmem:[%s772_s1 + $0x8] sm:$0xff]  ;;  %v14_v2 = vld [vmem:[%s772_s1 + $0x18] sm:$0xff]  ;;  %v11_v5 = vld [vmem:[%s772_s1] sm:$0xff] }
   0x2   :  { %v16_v1 = vld [vmem:[%s772_s1 + $0x28] sm:$0xff]  ;;  %v18_v4 = vld [vmem:[%s772_s1 + $0x38] sm:$0xff]  ;;  %v15_v6 = vld [vmem:[%s772_s1 + $0x20] sm:$0xff] }
   0x3   :  { %v303_v3 = vpack.c.bf16 %v16_v1, %v12_v0  ;;  %v355_v7 = vpack.c.bf16 %v18_v4, %v14_v2  ;;  %v305_v8 = vpack.c.bf16 %v15_v6, %v11_v5  ;;  %v13_v9 = vld [vmem:[%s772_s1 + $0x10] sm:$0xff]  ;;  %v20_v11 = vld [vmem:[%s772_s1 + $0x48] sm:$0xff]  ;;  %v22_v14 = vld [vmem:[%s772_s1 + $0x58] sm:$0xff] }
   0x4   :  { %v17_v10 = vld [vmem:[%s772_s1 + $0x30] sm:$0xff]  ;;  %v24_v13 = vld [vmem:[%s772_s1 + $0x68] sm:$0xff]  ;;  %v26_v15 = vld [vmem:[%s772_s1 + $0x78] sm:$0xff] }
   0x5   :  { %304 = vmatprep.subr.bf16.mxu0 %v303_v3  ;;  %v357_v12 = vpack.c.bf16 %v17_v10, %v13_v9  ;;  %356 = vmatprep.subr.bf16.mxu1 %v355_v7  ;;  %v307_v16 = vpack.c.bf16 %v24_v13, %v20_v11  ;;  %v359_v17 = vpack.c.bf16 %v26_v15, %v22_v14  ;;  %v19_v18 = vld [vmem:[%s772_s1 + $0x40] sm:$0xff]  ;;  %v21_v20 = vld [vmem:[%s772_s1 + $0x50] sm:$0xff]  ;;  %v28_v23 = vld [vmem:[%s772_s1 + $0x88] sm:$0xff] }
   0x6   :  { %306 = vmatpush1.bf16.msra.mxu0 %v305_v8  ;;  %v23_v19 = vld [vmem:[%s772_s1 + $0x60] sm:$0xff]  ;;  %v25_v22 = vld [vmem:[%s772_s1 + $0x70] sm:$0xff]  ;;  %v32_v24 = vld [vmem:[%s772_s1 + $0xa8] sm:$0xff] }
   0x7   :  { %358 = vmatpush1.bf16.msra.mxu1 %v357_v12  ;;  %v309_v21 = vpack.c.bf16 %v23_v19, %v19_v18  ;;  %308 = vmatprep.subr.bf16.mxu0 %v307_v16  ;;  %v361_v25 = vpack.c.bf16 %v25_v22, %v21_v20  ;;  %v311_v26 = vpack.c.bf16 %v32_v24, %v28_v23  ;;  %v30_v27 = vld [vmem:[%s772_s1 + $0x98] sm:$0xff]  ;;  %v27_v29 = vld [vmem:[%s772_s1 + $0x80] sm:$0xff]  ;;  %v29_v32 = vld [vmem:[%s772_s1 + $0x90] sm:$0xff] }
   0x8   :  { %360 = vmatprep.subr.bf16.mxu1 %v359_v17  ;;  %v34_v28 = vld [vmem:[%s772_s1 + $0xb8] sm:$0xff]  ;;  %v31_v31 = vld [vmem:[%s772_s1 + $0xa0] sm:$0xff]  ;;  %v33_v33 = vld [vmem:[%s772_s1 + $0xb0] sm:$0xff] }
   0x9   :  { %v363_v30 = vpack.c.bf16 %v34_v28, %v30_v27  ;;  %v313_v34 = vpack.c.bf16 %v31_v31, %v27_v29  ;;  %v36_v35 = vld [vmem:[%s772_s1 + $0xc8] sm:$0xff]  ;;  %v38_v37 = vld [vmem:[%s772_s1 + $0xd8] sm:$0xff]  ;;  %v365_v38 = vpack.c.bf16 %v33_v33, %v29_v32  ;;  %v35_v41 = vld [vmem:[%s772_s1 + $0xc0] sm:$0xff] }
   0xa   :  { %310 = vmatpush1.bf16.msra.mxu0 %v309_v21  ;;  %v40_v36 = vld [vmem:[%s772_s1 + $0xe8] sm:$0xff]  ;;  %v42_v40 = vld [vmem:[%s772_s1 + $0xf8] sm:$0xff]  ;;  %v39_v42 = vld [vmem:[%s772_s1 + $0xe0] sm:$0xff] }
   0xb   :  { %362 = vmatpush1.bf16.msra.mxu1 %v361_v25  ;;  %312 = vmatprep.subr.bf16.mxu0 %v311_v26  ;;  %v315_v39 = vpack.c.bf16 %v40_v36, %v36_v35  ;;  %v367_v43 = vpack.c.bf16 %v42_v40, %v38_v37  ;;  %v37_v44 = vld [vmem:[%s772_s1 + $0xd0] sm:$0xff]  ;;  %v44_v46 = vld [vmem:[%s772_s1 + $0x108] sm:$0xff]  ;;  %v46_v48 = vld [vmem:[%s772_s1 + $0x118] sm:$0xff]  ;;  %v317_v50 = vpack.c.bf16 %v39_v42, %v35_v41 }
   0xc   :  { %364 = vmatprep.subr.bf16.mxu1 %v363_v30  ;;  %v41_v45 = vld [vmem:[%s772_s1 + $0xf0] sm:$0xff]  ;;  %v48_v47 = vld [vmem:[%s772_s1 + $0x128] sm:$0xff]  ;;  %v50_v49 = vld [vmem:[%s772_s1 + $0x138] sm:$0xff] }
   0xd   :  { %v369_v51 = vpack.c.bf16 %v41_v45, %v37_v44  ;;  %v319_v52 = vpack.c.bf16 %v48_v47, %v44_v46  ;;  %v43_v53 = vld [vmem:[%s772_s1 + $0x100] sm:$0xff]  ;;  %v45_v55 = vld [vmem:[%s772_s1 + $0x110] sm:$0xff]  ;;  %v371_v56 = vpack.c.bf16 %v50_v49, %v46_v48  ;;  %v52_v58 = vld [vmem:[%s772_s1 + $0x148] sm:$0xff] }
   0xe   :  { %314 = vmatpush1.bf16.msra.mxu0 %v313_v34  ;;  %v47_v54 = vld [vmem:[%s772_s1 + $0x120] sm:$0xff]  ;;  %v49_v57 = vld [vmem:[%s772_s1 + $0x130] sm:$0xff]  ;;  %v56_v59 = vld [vmem:[%s772_s1 + $0x168] sm:$0xff] }
   0xf   :  { %366 = vmatpush1.bf16.msra.mxu1 %v365_v38  ;;  %316 = vmatprep.subr.bf16.mxu0 %v315_v39  ;;  %v54_v60 = vld [vmem:[%s772_s1 + $0x158] sm:$0xff]  ;;  %v321_v62 = vpack.c.bf16 %v47_v54, %v43_v53  ;;  %v373_v63 = vpack.c.bf16 %v49_v57, %v45_v55  ;;  %v323_v0 = vpack.c.bf16 %v56_v59, %v52_v58  ;;  %v51_v1 = vld [vmem:[%s772_s1 + $0x140] sm:$0xff]  ;;  %v53_v3 = vld [vmem:[%s772_s1 + $0x150] sm:$0xff] }
  0x10   :  { %368 = vmatprep.subr.bf16.mxu1 %v367_v43  ;;  %v58_v61 = vld [vmem:[%s772_s1 + $0x178] sm:$0xff]  ;;  %v55_v2 = vld [vmem:[%s772_s1 + $0x160] sm:$0xff]  ;;  %v57_v5 = vld [vmem:[%s772_s1 + $0x170] sm:$0xff] }
  0x11   :  { %v375_v4 = vpack.c.bf16 %v58_v61, %v54_v60  ;;  %v60_v6 = vld [vmem:[%s772_s1 + $0x188] sm:$0xff]  ;;  %v62_v8 = vld [vmem:[%s772_s1 + $0x198] sm:$0xff]  ;;  %v325_v10 = vpack.c.bf16 %v55_v2, %v51_v1  ;;  %v377_v11 = vpack.c.bf16 %v57_v5, %v53_v3  ;;  %v59_v13 = vld [vmem:[%s772_s1 + $0x180] sm:$0xff] }
  0x12   :  { %318 = vmatpush1.bf16.msra.mxu0 %v317_v50  ;;  %v64_v7 = vld [vmem:[%s772_s1 + $0x1a8] sm:$0xff]  ;;  %v66_v9 = vld [vmem:[%s772_s1 + $0x1b8] sm:$0xff]  ;;  %v63_v14 = vld [vmem:[%s772_s1 + $0x1a0] sm:$0xff] }
  0x13   :  { %370 = vmatpush1.bf16.msra.mxu1 %v369_v51  ;;  %320 = vmatprep.subr.bf16.mxu0 %v319_v52  ;;  %v327_v12 = vpack.c.bf16 %v64_v7, %v60_v6  ;;  %v61_v15 = vld [vmem:[%s772_s1 + $0x190] sm:$0xff]  ;;  %v379_v16 = vpack.c.bf16 %v66_v9, %v62_v8  ;;  %v68_v18 = vld [vmem:[%s772_s1 + $0x1c8] sm:$0xff]  ;;  %v70_v20 = vld [vmem:[%s772_s1 + $0x1d8] sm:$0xff]  ;;  %v329_v22 = vpack.c.bf16 %v63_v14, %v59_v13 }
  0x14   :  { %372 = vmatprep.subr.bf16.mxu1 %v371_v56  ;;  %v65_v17 = vld [vmem:[%s772_s1 + $0x1b0] sm:$0xff]  ;;  %v72_v19 = vld [vmem:[%s772_s1 + $0x1e8] sm:$0xff]  ;;  %v74_v21 = vld [vmem:[%s772_s1 + $0x1f8] sm:$0xff] }
  0x15   :  { %v381_v23 = vpack.c.bf16 %v65_v17, %v61_v15  ;;  %v331_v24 = vpack.c.bf16 %v72_v19, %v68_v18  ;;  %v67_v25 = vld [vmem:[%s772_s1 + $0x1c0] sm:$0xff]  ;;  %v69_v27 = vld [vmem:[%s772_s1 + $0x1d0] sm:$0xff]  ;;  %v383_v28 = vpack.c.bf16 %v74_v21, %v70_v20  ;;  %v76_v30 = vld [vmem:[%s772_s1 + $0x208] sm:$0xff] }
  0x16   :  { %322 = vmatpush1.bf16.msra.mxu0 %v321_v62  ;;  %v71_v26 = vld [vmem:[%s772_s1 + $0x1e0] sm:$0xff]  ;;  %v73_v29 = vld [vmem:[%s772_s1 + $0x1f0] sm:$0xff]  ;;  %v80_v31 = vld [vmem:[%s772_s1 + $0x228] sm:$0xff] }
  0x17   :  { %374 = vmatpush1.bf16.msra.mxu1 %v373_v63  ;;  %324 = vmatprep.subr.bf16.mxu0 %v323_v0  ;;  %v78_v32 = vld [vmem:[%s772_s1 + $0x218] sm:$0xff]  ;;  %v333_v34 = vpack.c.bf16 %v71_v26, %v67_v25  ;;  %v385_v35 = vpack.c.bf16 %v73_v29, %v69_v27  ;;  %v335_v36 = vpack.c.bf16 %v80_v31, %v76_v30  ;;  %v75_v37 = vld [vmem:[%s772_s1 + $0x200] sm:$0xff]  ;;  %v77_v39 = vld [vmem:[%s772_s1 + $0x210] sm:$0xff] }
  0x18   :  { %376 = vmatprep.subr.bf16.mxu1 %v375_v4  ;;  %v82_v33 = vld [vmem:[%s772_s1 + $0x238] sm:$0xff]  ;;  %v79_v38 = vld [vmem:[%s772_s1 + $0x220] sm:$0xff]  ;;  %v81_v41 = vld [vmem:[%s772_s1 + $0x230] sm:$0xff] }
  0x19   :  { %v387_v40 = vpack.c.bf16 %v82_v33, %v78_v32  ;;  %v84_v42 = vld [vmem:[%s772_s1 + $0x248] sm:$0xff]  ;;  %v86_v44 = vld [vmem:[%s772_s1 + $0x258] sm:$0xff]  ;;  %v337_v46 = vpack.c.bf16 %v79_v38, %v75_v37  ;;  %v389_v47 = vpack.c.bf16 %v81_v41, %v77_v39  ;;  %v83_v49 = vld [vmem:[%s772_s1 + $0x240] sm:$0xff] }
  0x1a   :  { %326 = vmatpush1.bf16.msra.mxu0 %v325_v10  ;;  %v88_v43 = vld [vmem:[%s772_s1 + $0x268] sm:$0xff]  ;;  %v90_v45 = vld [vmem:[%s772_s1 + $0x278] sm:$0xff]  ;;  %v87_v50 = vld [vmem:[%s772_s1 + $0x260] sm:$0xff] }
  0x1b   :  { %378 = vmatpush1.bf16.msra.mxu1 %v377_v11  ;;  %328 = vmatprep.subr.bf16.mxu0 %v327_v12  ;;  %v339_v48 = vpack.c.bf16 %v88_v43, %v84_v42  ;;  %v85_v51 = vld [vmem:[%s772_s1 + $0x250] sm:$0xff]  ;;  %v391_v52 = vpack.c.bf16 %v90_v45, %v86_v44  ;;  %v92_v54 = vld [vmem:[%s772_s1 + $0x288] sm:$0xff]  ;;  %v94_v56 = vld [vmem:[%s772_s1 + $0x298] sm:$0xff]  ;;  %v341_v59 = vpack.c.bf16 %v87_v50, %v83_v49 }
  0x1c   :  { %380 = vmatprep.subr.bf16.mxu1 %v379_v16  ;;  %v89_v53 = vld [vmem:[%s772_s1 + $0x270] sm:$0xff]  ;;  %v96_v55 = vld [vmem:[%s772_s1 + $0x2a8] sm:$0xff]  ;;  %v98_v57 = vld [vmem:[%s772_s1 + $0x2b8] sm:$0xff] }
  0x1d   :  { %v686_v58 = vld [vmem:[%s773_s0] sm:$0x77]  ;;  %v393_v61 = vpack.c.bf16 %v89_v53, %v85_v51  ;;  %v343_v62 = vpack.c.bf16 %v96_v55, %v92_v54  ;;  %v93_v1 = vld [vmem:[%s772_s1 + $0x290] sm:$0xff]  ;;  %v395_v2 = vpack.c.bf16 %v98_v57, %v94_v56  ;;  %v100_v4 = vld [vmem:[%s772_s1 + $0x2c8] sm:$0xff] }
  0x1e   :  { %330 = vmatpush1.bf16.msra.mxu0 %v329_v22  ;;  %v121_v60 = vcombine.high %v686_v58, %v686_v58  ;;  %v91_v63 = vld [vmem:[%s772_s1 + $0x280] sm:$0xff]  ;;  %v97_v3 = vld [vmem:[%s772_s1 + $0x2b0] sm:$0xff]  ;;  %v104_v5 = vld [vmem:[%s772_s1 + $0x2e8] sm:$0xff] }
  0x1f   :  { %382 = vmatpush1.bf16.msra.mxu1 %v381_v23  ;;  %332 = vmatprep.subr.bf16.mxu0 %v331_v24  ;;  %v95_v0 = vld [vmem:[%s772_s1 + $0x2a0] sm:$0xff]  ;;  %v102_v6 = vld [vmem:[%s772_s1 + $0x2d8] sm:$0xff]  ;;  %v397_v9 = vpack.c.bf16 %v97_v3, %v93_v1  ;;  %v347_v10 = vpack.c.bf16 %v104_v5, %v100_v4  ;;  %v101_v13 = vld [vmem:[%s772_s1 + $0x2d0] sm:$0xff] }
  0x20   :  { %384 = vmatprep.subr.bf16.mxu1 %v383_v28  ;;  %301 = vmatprep.mubr.msk.f32.mxu0 %vm122_vm0, %v121_v60  ;;  %v106_v7 = vld [vmem:[%s772_s1 + $0x2f8] sm:$0xff]  ;;  %v345_v8 = vpack.c.bf16 %v95_v0, %v91_v63  ;;  %v99_v11 = vld [vmem:[%s772_s1 + $0x2c0] sm:$0xff]  ;;  %v105_v15 = vld [vmem:[%s772_s1 + $0x2f0] sm:$0xff] }
  0x21   :  { %302 = vmatprep.mubr.msk.f32.mxu1 %vm122_vm0, %v121_v60  ;;  %v103_v12 = vld [vmem:[%s772_s1 + $0x2e0] sm:$0xff]  ;;  %v399_v14 = vpack.c.bf16 %v106_v7, %v102_v6  ;;  %v108_v16 = vld [vmem:[%s772_s1 + $0x308] sm:$0xff]  ;;  %v110_v18 = vld [vmem:[%s772_s1 + $0x318] sm:$0xff]  ;;  %v401_v21 = vpack.c.bf16 %v105_v15, %v101_v13 }
  0x22   :  { %334 = vmatpush1.bf16.msra.mxu0 %v333_v34  ;;  %v112_v17 = vld [vmem:[%s772_s1 + $0x328] sm:$0xff]  ;;  %v114_v19 = vld [vmem:[%s772_s1 + $0x338] sm:$0xff]  ;;  %v349_v20 = vpack.c.bf16 %v103_v12, %v99_v11  ;;  %v107_v23 = vld [vmem:[%s772_s1 + $0x300] sm:$0xff] }
  0x23   :  { %386 = vmatpush1.bf16.msra.mxu1 %v385_v35  ;;  %336 = vmatprep.subr.bf16.mxu0 %v335_v36  ;;  %v351_v22 = vpack.c.bf16 %v112_v17, %v108_v16  ;;  %v111_v24 = vld [vmem:[%s772_s1 + $0x320] sm:$0xff]  ;;  %v403_v25 = vpack.c.bf16 %v114_v19, %v110_v18  ;;  %v109_v26 = vld [vmem:[%s772_s1 + $0x310] sm:$0xff]  ;;  %v116_v30 = vld [vmem:[%s772_s1 + $0x348] sm:$0xff] }
  0x24   :  { %388 = vmatprep.subr.bf16.mxu1 %v387_v40  ;;  %v113_v27 = vld [vmem:[%s772_s1 + $0x330] sm:$0xff]  ;;  %v353_v28 = vpack.c.bf16 %v111_v24, %v107_v23  ;;  %v118_v31 = vld [vmem:[%s772_s1 + $0x358] sm:$0xff]  ;;  %v115_v32 = vld [vmem:[%s772_s1 + $0x340] sm:$0xff] }
  0x25   :  { %v405_v29 = vpack.c.bf16 %v113_v27, %v109_v26  ;;  %v117_v33 = vld [vmem:[%s772_s1 + $0x350] sm:$0xff] }
  0x26   :  { %338 = vmatpush1.bf16.msra.mxu0 %v337_v46 }
  0x27   :  { %390 = vmatpush1.bf16.msra.mxu1 %v389_v47  ;;  %340 = vmatprep.subr.bf16.mxu0 %v339_v48 }
  0x28   :  { %392 = vmatprep.subr.bf16.mxu1 %v391_v52 }
  0x2a   :  { %342 = vmatpush1.bf16.msra.mxu0 %v341_v59 }
  0x2b   :  { %394 = vmatpush1.bf16.msra.mxu1 %v393_v61  ;;  %344 = vmatprep.subr.bf16.mxu0 %v343_v62 }
  0x2c   :  { %396 = vmatprep.subr.bf16.mxu1 %v395_v2 }
  0x2e   :  { %346 = vmatpush1.bf16.msra.mxu0 %v345_v8 }
  0x2f   :  { %398 = vmatpush1.bf16.msra.mxu1 %v397_v9  ;;  %348 = vmatprep.subr.bf16.mxu0 %v347_v10 }
  0x30   :  { %400 = vmatprep.subr.bf16.mxu1 %v399_v14 }
  0x32   :  { %350 = vmatpush1.bf16.msra.mxu0 %v349_v20 }
  0x33   :  { %402 = vmatpush1.bf16.msra.mxu1 %v401_v21  ;;  %352 = vmatprep.subr.bf16.mxu0 %v351_v22 }
  0x34   :  { %404 = vmatprep.subr.bf16.mxu1 %v403_v25 }
  0x36   :  { %354 = vmatpush1.bf16.msra.mxu0 %v353_v28 }
  0x37   :  { %406 = vmatpush1.bf16.msra.mxu1 %v405_v29  ;;  %177 = vmatprep.subr.mxu0 %v116_v30 }
  0x38   :  { %248 = vmatprep.subr.mxu1 %v118_v31 }
  0x3a   :  { %178 = vmatpush1.msra.mxu0 %v115_v32 }
  0x3b   :  { %249 = vmatpush1.msra.mxu1 %v117_v33  ;;  %190 = vmatmul.mubr.f32.vlgmr.msra.gmra.mrb[0].mxu0 %v686_v58 }
  0x3c   :  { %261 = vmatmul.mubr.f32.vlgmr.msra.gmra.mrb[0].mxu1 %v686_v58 }
 0x10e   :  { %v191_v34 = vpop.f32.mrb[0].mxu0 }
 0x10f   :  { %v267_v35 = vand.u32 2147483647, %v191_v34  ;;  %v262_v36 = vpop.f32.mrb[0].mxu1  ;;  %v193_v37 = vpop.f32.mrb[1].mxu0 }
 0x110   :  { %v269_v38 = vand.u32 2147483647, %v262_v36  ;;  %v268_v39 = vand.u32 2147483647, %v193_v37  ;;  %v264_v40 = vpop.f32.mrb[1].mxu1 }
 0x111   :  { %v271_v41 = vadd.f32 1.0, %v267_v35  ;;  %v270_v42 = vand.u32 2147483647, %v264_v40 }
 0x112   :  { %v273_v43 = vadd.f32 1.0, %v269_v38  ;;  %v272_v44 = vadd.f32 1.0, %v268_v39 }
 0x113   :  { %408 = vrcp.f32 %v271_v41  ;;  %v274_v45 = vadd.f32 1.0, %v270_v42 }
 0x114   :  { %410 = vrcp.f32 %v273_v43 }
 0x115   :  { %412 = vrcp.f32 %v272_v44 }
 0x116   :  { %414 = vrcp.f32 %v274_v45 }
 0x11d   :  { %v409_v46 = vpop.eup %408 }
 0x11e   :  { %v411_v47 = vpop.eup %410  ;;  %v276_v48 = vmul.f32 %v409_v46, %v191_v34 }
 0x11f   :  { %v413_v49 = vpop.eup %412  ;;  %v280_v50 = vmul.f32 %v411_v47, %v262_v36 }
 0x120   :  { %v415_v51 = vpop.eup %414  ;;  %v283_v52 = vmul.f32 0.4, %v276_v48  ;;  %v278_v53 = vmul.f32 %v413_v49, %v193_v37 }
 0x121   :  { %v285_v54 = vmul.f32 0.4, %v280_v50  ;;  %v282_v55 = vmul.f32 %v415_v51, %v264_v40 }
 0x122   :  { %v284_v56 = vmul.f32 0.4, %v278_v53 }
 0x123   :  { %v286_v57 = vmul.f32 0.4, %v282_v55 }
 0x124   :  { %v291_v58 = vcombine.low %v283_v52, %v284_v56 }
 0x125   :  { %v292_v59 = vcombine.low %v285_v54, %v286_v57 }
 0x126   :  { %295 = vst [vmem:[%s774_s2] sm:$0x77] %v291_v58 }
 0x127   :  { %296 = vst [vmem:[%s774_s2 + $0x8] sm:$0x77] %v292_v59 }

// kernel: wavlet_forward.38
= control target key start
LH: loop header
LB: loop body
LE: loop exit
PB: predicated region body
PF: predicated region fallthrough
CT: control target
= control target key end

     0   :  { %vm231_vm0 = vcmask 392192   ;;  %s1450_s1 = inlined_call_operand.vmem [shape: f32[432,512], index: 1, kind: input, shape index: {}]   ;;  %s1451_s0 = inlined_call_operand.vmem [shape: f32[8,432], index: 0, kind: input, shape index: {}]   ;;  %s1452_s2 = inlined_call_operand.vmem [shape: f32[8,512], index: 2, kind: output, shape index: {}]  }
   0x1   :  { %v12_v0 = vld [vmem:[%s1450_s1 + $0x8] sm:$0xff]  ;;  %v14_v2 = vld [vmem:[%s1450_s1 + $0x18] sm:$0xff]  ;;  %v11_v5 = vld [vmem:[%s1450_s1] sm:$0xff] }
   0x2   :  { %v16_v1 = vld [vmem:[%s1450_s1 + $0x28] sm:$0xff]  ;;  %v18_v4 = vld [vmem:[%s1450_s1 + $0x38] sm:$0xff]  ;;  %v15_v6 = vld [vmem:[%s1450_s1 + $0x20] sm:$0xff] }
   0x3   :  { %v541_v3 = vpack.c.bf16 %v16_v1, %v12_v0  ;;  %v649_v7 = vpack.c.bf16 %v18_v4, %v14_v2  ;;  %v543_v8 = vpack.c.bf16 %v15_v6, %v11_v5  ;;  %v13_v9 = vld [vmem:[%s1450_s1 + $0x10] sm:$0xff]  ;;  %v20_v11 = vld [vmem:[%s1450_s1 + $0x48] sm:$0xff]  ;;  %v22_v14 = vld [vmem:[%s1450_s1 + $0x58] sm:$0xff] }
   0x4   :  { %v17_v10 = vld [vmem:[%s1450_s1 + $0x30] sm:$0xff]  ;;  %v24_v13 = vld [vmem:[%s1450_s1 + $0x68] sm:$0xff]  ;;  %v26_v15 = vld [vmem:[%s1450_s1 + $0x78] sm:$0xff] }
   0x5   :  { %542 = vmatprep.subr.bf16.mxu0 %v541_v3  ;;  %v651_v12 = vpack.c.bf16 %v17_v10, %v13_v9  ;;  %650 = vmatprep.subr.bf16.mxu1 %v649_v7  ;;  %v545_v16 = vpack.c.bf16 %v24_v13, %v20_v11  ;;  %v653_v17 = vpack.c.bf16 %v26_v15, %v22_v14  ;;  %v19_v18 = vld [vmem:[%s1450_s1 + $0x40] sm:$0xff]  ;;  %v21_v20 = vld [vmem:[%s1450_s1 + $0x50] sm:$0xff]  ;;  %v28_v23 = vld [vmem:[%s1450_s1 + $0x88] sm:$0xff] }
   0x6   :  { %544 = vmatpush1.bf16.msra.mxu0 %v543_v8  ;;  %v23_v19 = vld [vmem:[%s1450_s1 + $0x60] sm:$0xff]  ;;  %v25_v22 = vld [vmem:[%s1450_s1 + $0x70] sm:$0xff]  ;;  %v32_v24 = vld [vmem:[%s1450_s1 + $0xa8] sm:$0xff] }
   0x7   :  { %652 = vmatpush1.bf16.msra.mxu1 %v651_v12  ;;  %v547_v21 = vpack.c.bf16 %v23_v19, %v19_v18  ;;  %546 = vmatprep.subr.bf16.mxu0 %v545_v16  ;;  %v655_v25 = vpack.c.bf16 %v25_v22, %v21_v20  ;;  %v549_v26 = vpack.c.bf16 %v32_v24, %v28_v23  ;;  %v30_v27 = vld [vmem:[%s1450_s1 + $0x98] sm:$0xff]  ;;  %v27_v29 = vld [vmem:[%s1450_s1 + $0x80] sm:$0xff]  ;;  %v29_v32 = vld [vmem:[%s1450_s1 + $0x90] sm:$0xff] }
   0x8   :  { %654 = vmatprep.subr.bf16.mxu1 %v653_v17  ;;  %v34_v28 = vld [vmem:[%s1450_s1 + $0xb8] sm:$0xff]  ;;  %v31_v31 = vld [vmem:[%s1450_s1 + $0xa0] sm:$0xff]  ;;  %v33_v33 = vld [vmem:[%s1450_s1 + $0xb0] sm:$0xff] }
   0x9   :  { %v657_v30 = vpack.c.bf16 %v34_v28, %v30_v27  ;;  %v551_v34 = vpack.c.bf16 %v31_v31, %v27_v29  ;;  %v36_v35 = vld [vmem:[%s1450_s1 + $0xc8] sm:$0xff]  ;;  %v38_v37 = vld [vmem:[%s1450_s1 + $0xd8] sm:$0xff]  ;;  %v659_v38 = vpack.c.bf16 %v33_v33, %v29_v32  ;;  %v35_v41 = vld [vmem:[%s1450_s1 + $0xc0] sm:$0xff] }
   0xa   :  { %548 = vmatpush1.bf16.msra.mxu0 %v547_v21  ;;  %v40_v36 = vld [vmem:[%s1450_s1 + $0xe8] sm:$0xff]  ;;  %v42_v40 = vld [vmem:[%s1450_s1 + $0xf8] sm:$0xff]  ;;  %v39_v42 = vld [vmem:[%s1450_s1 + $0xe0] sm:$0xff] }
   0xb   :  { %656 = vmatpush1.bf16.msra.mxu1 %v655_v25  ;;  %550 = vmatprep.subr.bf16.mxu0 %v549_v26  ;;  %v553_v39 = vpack.c.bf16 %v40_v36, %v36_v35  ;;  %v661_v43 = vpack.c.bf16 %v42_v40, %v38_v37  ;;  %v37_v44 = vld [vmem:[%s1450_s1 + $0xd0] sm:$0xff]  ;;  %v44_v46 = vld [vmem:[%s1450_s1 + $0x108] sm:$0xff]  ;;  %v46_v48 = vld [vmem:[%s1450_s1 + $0x118] sm:$0xff]  ;;  %v555_v50 = vpack.c.bf16 %v39_v42, %v35_v41 }
   0xc   :  { %658 = vmatprep.subr.bf16.mxu1 %v657_v30  ;;  %v41_v45 = vld [vmem:[%s1450_s1 + $0xf0] sm:$0xff]  ;;  %v48_v47 = vld [vmem:[%s1450_s1 + $0x128] sm:$0xff]  ;;  %v50_v49 = vld [vmem:[%s1450_s1 + $0x138] sm:$0xff] }
   0xd   :  { %v663_v51 = vpack.c.bf16 %v41_v45, %v37_v44  ;;  %v557_v52 = vpack.c.bf16 %v48_v47, %v44_v46  ;;  %v43_v53 = vld [vmem:[%s1450_s1 + $0x100] sm:$0xff]  ;;  %v45_v55 = vld [vmem:[%s1450_s1 + $0x110] sm:$0xff]  ;;  %v665_v56 = vpack.c.bf16 %v50_v49, %v46_v48  ;;  %v52_v58 = vld [vmem:[%s1450_s1 + $0x148] sm:$0xff] }
   0xe   :  { %552 = vmatpush1.bf16.msra.mxu0 %v551_v34  ;;  %v47_v54 = vld [vmem:[%s1450_s1 + $0x120] sm:$0xff]  ;;  %v49_v57 = vld [vmem:[%s1450_s1 + $0x130] sm:$0xff]  ;;  %v56_v59 = vld [vmem:[%s1450_s1 + $0x168] sm:$0xff] }
   0xf   :  { %660 = vmatpush1.bf16.msra.mxu1 %v659_v38  ;;  %554 = vmatprep.subr.bf16.mxu0 %v553_v39  ;;  %v54_v60 = vld [vmem:[%s1450_s1 + $0x158] sm:$0xff]  ;;  %v559_v62 = vpack.c.bf16 %v47_v54, %v43_v53  ;;  %v667_v63 = vpack.c.bf16 %v49_v57, %v45_v55  ;;  %v561_v0 = vpack.c.bf16 %v56_v59, %v52_v58  ;;  %v51_v1 = vld [vmem:[%s1450_s1 + $0x140] sm:$0xff]  ;;  %v53_v3 = vld [vmem:[%s1450_s1 + $0x150] sm:$0xff] }
  0x10   :  { %662 = vmatprep.subr.bf16.mxu1 %v661_v43  ;;  %v58_v61 = vld [vmem:[%s1450_s1 + $0x178] sm:$0xff]  ;;  %v55_v2 = vld [vmem:[%s1450_s1 + $0x160] sm:$0xff]  ;;  %v57_v5 = vld [vmem:[%s1450_s1 + $0x170] sm:$0xff] }
  0x11   :  { %v669_v4 = vpack.c.bf16 %v58_v61, %v54_v60  ;;  %v60_v6 = vld [vmem:[%s1450_s1 + $0x188] sm:$0xff]  ;;  %v62_v8 = vld [vmem:[%s1450_s1 + $0x198] sm:$0xff]  ;;  %v563_v10 = vpack.c.bf16 %v55_v2, %v51_v1  ;;  %v671_v11 = vpack.c.bf16 %v57_v5, %v53_v3  ;;  %v59_v13 = vld [vmem:[%s1450_s1 + $0x180] sm:$0xff] }
  0x12   :  { %556 = vmatpush1.bf16.msra.mxu0 %v555_v50  ;;  %v64_v7 = vld [vmem:[%s1450_s1 + $0x1a8] sm:$0xff]  ;;  %v66_v9 = vld [vmem:[%s1450_s1 + $0x1b8] sm:$0xff]  ;;  %v63_v14 = vld [vmem:[%s1450_s1 + $0x1a0] sm:$0xff] }
  0x13   :  { %664 = vmatpush1.bf16.msra.mxu1 %v663_v51  ;;  %558 = vmatprep.subr.bf16.mxu0 %v557_v52  ;;  %v565_v12 = vpack.c.bf16 %v64_v7, %v60_v6  ;;  %v61_v15 = vld [vmem:[%s1450_s1 + $0x190] sm:$0xff]  ;;  %v673_v16 = vpack.c.bf16 %v66_v9, %v62_v8  ;;  %v68_v18 = vld [vmem:[%s1450_s1 + $0x1c8] sm:$0xff]  ;;  %v70_v20 = vld [vmem:[%s1450_s1 + $0x1d8] sm:$0xff]  ;;  %v567_v22 = vpack.c.bf16 %v63_v14, %v59_v13 }
  0x14   :  { %666 = vmatprep.subr.bf16.mxu1 %v665_v56  ;;  %v65_v17 = vld [vmem:[%s1450_s1 + $0x1b0] sm:$0xff]  ;;  %v72_v19 = vld [vmem:[%s1450_s1 + $0x1e8] sm:$0xff]  ;;  %v74_v21 = vld [vmem:[%s1450_s1 + $0x1f8] sm:$0xff] }
  0x15   :  { %v675_v23 = vpack.c.bf16 %v65_v17, %v61_v15  ;;  %v569_v24 = vpack.c.bf16 %v72_v19, %v68_v18  ;;  %v67_v25 = vld [vmem:[%s1450_s1 + $0x1c0] sm:$0xff]  ;;  %v69_v27 = vld [vmem:[%s1450_s1 + $0x1d0] sm:$0xff]  ;;  %v677_v28 = vpack.c.bf16 %v74_v21, %v70_v20  ;;  %v76_v30 = vld [vmem:[%s1450_s1 + $0x208] sm:$0xff] }
  0x16   :  { %560 = vmatpush1.bf16.msra.mxu0 %v559_v62  ;;  %v71_v26 = vld [vmem:[%s1450_s1 + $0x1e0] sm:$0xff]  ;;  %v73_v29 = vld [vmem:[%s1450_s1 + $0x1f0] sm:$0xff]  ;;  %v80_v31 = vld [vmem:[%s1450_s1 + $0x228] sm:$0xff] }
  0x17   :  { %668 = vmatpush1.bf16.msra.mxu1 %v667_v63  ;;  %562 = vmatprep.subr.bf16.mxu0 %v561_v0  ;;  %v78_v32 = vld [vmem:[%s1450_s1 + $0x218] sm:$0xff]  ;;  %v571_v34 = vpack.c.bf16 %v71_v26, %v67_v25  ;;  %v679_v35 = vpack.c.bf16 %v73_v29, %v69_v27  ;;  %v573_v36 = vpack.c.bf16 %v80_v31, %v76_v30  ;;  %v75_v37 = vld [vmem:[%s1450_s1 + $0x200] sm:$0xff]  ;;  %v77_v39 = vld [vmem:[%s1450_s1 + $0x210] sm:$0xff] }
  0x18   :  { %670 = vmatprep.subr.bf16.mxu1 %v669_v4  ;;  %v82_v33 = vld [vmem:[%s1450_s1 + $0x238] sm:$0xff]  ;;  %v79_v38 = vld [vmem:[%s1450_s1 + $0x220] sm:$0xff]  ;;  %v81_v41 = vld [vmem:[%s1450_s1 + $0x230] sm:$0xff] }
  0x19   :  { %v681_v40 = vpack.c.bf16 %v82_v33, %v78_v32  ;;  %v84_v42 = vld [vmem:[%s1450_s1 + $0x248] sm:$0xff]  ;;  %v86_v44 = vld [vmem:[%s1450_s1 + $0x258] sm:$0xff]  ;;  %v575_v46 = vpack.c.bf16 %v79_v38, %v75_v37  ;;  %v683_v47 = vpack.c.bf16 %v81_v41, %v77_v39  ;;  %v83_v49 = vld [vmem:[%s1450_s1 + $0x240] sm:$0xff] }
  0x1a   :  { %564 = vmatpush1.bf16.msra.mxu0 %v563_v10  ;;  %v88_v43 = vld [vmem:[%s1450_s1 + $0x268] sm:$0xff]  ;;  %v90_v45 = vld [vmem:[%s1450_s1 + $0x278] sm:$0xff]  ;;  %v87_v50 = vld [vmem:[%s1450_s1 + $0x260] sm:$0xff] }
  0x1b   :  { %672 = vmatpush1.bf16.msra.mxu1 %v671_v11  ;;  %566 = vmatprep.subr.bf16.mxu0 %v565_v12  ;;  %v577_v48 = vpack.c.bf16 %v88_v43, %v84_v42  ;;  %v85_v51 = vld [vmem:[%s1450_s1 + $0x250] sm:$0xff]  ;;  %v685_v52 = vpack.c.bf16 %v90_v45, %v86_v44  ;;  %v92_v54 = vld [vmem:[%s1450_s1 + $0x288] sm:$0xff]  ;;  %v94_v56 = vld [vmem:[%s1450_s1 + $0x298] sm:$0xff]  ;;  %v579_v58 = vpack.c.bf16 %v87_v50, %v83_v49 }
  0x1c   :  { %674 = vmatprep.subr.bf16.mxu1 %v673_v16  ;;  %v89_v53 = vld [vmem:[%s1450_s1 + $0x270] sm:$0xff]  ;;  %v96_v55 = vld [vmem:[%s1450_s1 + $0x2a8] sm:$0xff]  ;;  %v98_v57 = vld [vmem:[%s1450_s1 + $0x2b8] sm:$0xff] }
  0x1d   :  { %v687_v59 = vpack.c.bf16 %v89_v53, %v85_v51  ;;  %v581_v60 = vpack.c.bf16 %v96_v55, %v92_v54  ;;  %v91_v61 = vld [vmem:[%s1450_s1 + $0x280] sm:$0xff]  ;;  %v93_v63 = vld [vmem:[%s1450_s1 + $0x290] sm:$0xff]  ;;  %v689_v0 = vpack.c.bf16 %v98_v57, %v94_v56  ;;  %v100_v2 = vld [vmem:[%s1450_s1 + $0x2c8] sm:$0xff] }
  0x1e   :  { %568 = vmatpush1.bf16.msra.mxu0 %v567_v22  ;;  %v95_v62 = vld [vmem:[%s1450_s1 + $0x2a0] sm:$0xff]  ;;  %v97_v1 = vld [vmem:[%s1450_s1 + $0x2b0] sm:$0xff]  ;;  %v104_v3 = vld [vmem:[%s1450_s1 + $0x2e8] sm:$0xff] }
  0x1f   :  { %676 = vmatpush1.bf16.msra.mxu1 %v675_v23  ;;  %570 = vmatprep.subr.bf16.mxu0 %v569_v24  ;;  %v102_v4 = vld [vmem:[%s1450_s1 + $0x2d8] sm:$0xff]  ;;  %v583_v6 = vpack.c.bf16 %v95_v62, %v91_v61  ;;  %v99_v7 = vld [vmem:[%s1450_s1 + $0x2c0] sm:$0xff]  ;;  %v691_v8 = vpack.c.bf16 %v97_v1, %v93_v63  ;;  %v585_v9 = vpack.c.bf16 %v104_v3, %v100_v2  ;;  %v101_v11 = vld [vmem:[%s1450_s1 + $0x2d0] sm:$0xff] }
  0x20   :  { %678 = vmatprep.subr.bf16.mxu1 %v677_v28  ;;  %v106_v5 = vld [vmem:[%s1450_s1 + $0x2f8] sm:$0xff]  ;;  %v103_v10 = vld [vmem:[%s1450_s1 + $0x2e0] sm:$0xff]  ;;  %v105_v12 = vld [vmem:[%s1450_s1 + $0x2f0] sm:$0xff] }
  0x21   :  { %v693_v13 = vpack.c.bf16 %v106_v5, %v102_v4  ;;  %v108_v14 = vld [vmem:[%s1450_s1 + $0x308] sm:$0xff]  ;;  %v110_v17 = vld [vmem:[%s1450_s1 + $0x318] sm:$0xff]  ;;  %v587_v19 = vpack.c.bf16 %v103_v10, %v99_v7  ;;  %v695_v20 = vpack.c.bf16 %v105_v12, %v101_v11  ;;  %v107_v22 = vld [vmem:[%s1450_s1 + $0x300] sm:$0xff] }
  0x22   :  { %572 = vmatpush1.bf16.msra.mxu0 %v571_v34  ;;  %v112_v15 = vld [vmem:[%s1450_s1 + $0x328] sm:$0xff]  ;;  %v114_v18 = vld [vmem:[%s1450_s1 + $0x338] sm:$0xff]  ;;  %v111_v23 = vld [vmem:[%s1450_s1 + $0x320] sm:$0xff] }
  0x23   :  { %680 = vmatpush1.bf16.msra.mxu1 %v679_v35  ;;  %574 = vmatprep.subr.bf16.mxu0 %v573_v36  ;;  %v228_v16 = vld [vmem:[%s1451_s0 + $0x8] sm:$0xff]  ;;  %v589_v21 = vpack.c.bf16 %v112_v15, %v108_v14  ;;  %v109_v24 = vld [vmem:[%s1450_s1 + $0x310] sm:$0xff]  ;;  %v697_v25 = vpack.c.bf16 %v114_v18, %v110_v17  ;;  %v118_v29 = vld [vmem:[%s1450_s1 + $0x358] sm:$0xff]  ;;  %v591_v31 = vpack.c.bf16 %v111_v23, %v107_v22 }
  0x24   :  { %682 = vmatprep.subr.bf16.mxu1 %v681_v40  ;;  %299 = vmatprep.mubr.f32.mxu0 %v228_v16  ;;  %v113_v26 = vld [vmem:[%s1450_s1 + $0x330] sm:$0xff]  ;;  %v116_v27 = vld [vmem:[%s1450_s1 + $0x348] sm:$0xff]  ;;  %v122_v30 = vld [vmem:[%s1450_s1 + $0x378] sm:$0xff] }
  0x25   :  { %441 = vmatprep.mubr.f32.mxu1 %v228_v16  ;;  %v120_v28 = vld [vmem:[%s1450_s1 + $0x368] sm:$0xff]  ;;  %v699_v32 = vpack.c.bf16 %v113_v26, %v109_v24  ;;  %v115_v34 = vld [vmem:[%s1450_s1 + $0x340] sm:$0xff]  ;;  %v117_v36 = vld [vmem:[%s1450_s1 + $0x350] sm:$0xff]  ;;  %v701_v37 = vpack.c.bf16 %v122_v30, %v118_v29 }
  0x26   :  { %576 = vmatpush1.bf16.msra.mxu0 %v575_v46  ;;  %v593_v33 = vpack.c.bf16 %v120_v28, %v116_v27  ;;  %v119_v35 = vld [vmem:[%s1450_s1 + $0x360] sm:$0xff]  ;;  %v121_v38 = vld [vmem:[%s1450_s1 + $0x370] sm:$0xff]  ;;  %v124_v39 = vld [vmem:[%s1450_s1 + $0x388] sm:$0xff] }
  0x27   :  { %684 = vmatpush1.bf16.msra.mxu1 %v683_v47  ;;  %578 = vmatprep.subr.bf16.mxu0 %v577_v48  ;;  %v128_v40 = vld [vmem:[%s1450_s1 + $0x3a8] sm:$0xff]  ;;  %v126_v41 = vld [vmem:[%s1450_s1 + $0x398] sm:$0xff]  ;;  %v595_v43 = vpack.c.bf16 %v119_v35, %v115_v34  ;;  %v703_v44 = vpack.c.bf16 %v121_v38, %v117_v36  ;;  %v123_v46 = vld [vmem:[%s1450_s1 + $0x380] sm:$0xff] }
  0x28   :  { %686 = vmatprep.subr.bf16.mxu1 %v685_v52  ;;  %v130_v42 = vld [vmem:[%s1450_s1 + $0x3b8] sm:$0xff]  ;;  %v597_v45 = vpack.c.bf16 %v128_v40, %v124_v39  ;;  %v127_v47 = vld [vmem:[%s1450_s1 + $0x3a0] sm:$0xff]  ;;  %v125_v48 = vld [vmem:[%s1450_s1 + $0x390] sm:$0xff] }
  0x29   :  { %v705_v49 = vpack.c.bf16 %v130_v42, %v126_v41  ;;  %v129_v50 = vld [vmem:[%s1450_s1 + $0x3b0] sm:$0xff]  ;;  %v132_v51 = vld [vmem:[%s1450_s1 + $0x3c8] sm:$0xff]  ;;  %v134_v53 = vld [vmem:[%s1450_s1 + $0x3d8] sm:$0xff]  ;;  %v599_v55 = vpack.c.bf16 %v127_v47, %v123_v46 }
  0x2a   :  { %580 = vmatpush1.bf16.msra.mxu0 %v579_v58  ;;  %v136_v52 = vld [vmem:[%s1450_s1 + $0x3e8] sm:$0xff]  ;;  %v138_v54 = vld [vmem:[%s1450_s1 + $0x3f8] sm:$0xff]  ;;  %v707_v56 = vpack.c.bf16 %v129_v50, %v125_v48  ;;  %v131_v58 = vld [vmem:[%s1450_s1 + $0x3c0] sm:$0xff] }
  0x2b   :  { %688 = vmatpush1.bf16.msra.mxu1 %v687_v59  ;;  %582 = vmatprep.subr.bf16.mxu0 %v581_v60  ;;  %v601_v57 = vpack.c.bf16 %v136_v52, %v132_v51  ;;  %v135_v59 = vld [vmem:[%s1450_s1 + $0x3e0] sm:$0xff]  ;;  %v133_v60 = vld [vmem:[%s1450_s1 + $0x3d0] sm:$0xff]  ;;  %v709_v61 = vpack.c.bf16 %v138_v54, %v134_v53  ;;  %v140_v63 = vld [vmem:[%s1450_s1 + $0x408] sm:$0xff] }
  0x2c   :  { %690 = vmatprep.subr.bf16.mxu1 %v689_v0  ;;  %v137_v62 = vld [vmem:[%s1450_s1 + $0x3f0] sm:$0xff]  ;;  %v144_v0 = vld [vmem:[%s1450_s1 + $0x428] sm:$0xff]  ;;  %v142_v1 = vld [vmem:[%s1450_s1 + $0x418] sm:$0xff]  ;;  %v603_v3 = vpack.c.bf16 %v135_v59, %v131_v58 }
  0x2d   :  { %v146_v2 = vld [vmem:[%s1450_s1 + $0x438] sm:$0xff]  ;;  %v711_v4 = vpack.c.bf16 %v137_v62, %v133_v60  ;;  %v605_v5 = vpack.c.bf16 %v144_v0, %v140_v63  ;;  %v143_v7 = vld [vmem:[%s1450_s1 + $0x420] sm:$0xff]  ;;  %v145_v10 = vld [vmem:[%s1450_s1 + $0x430] sm:$0xff] }
  0x2e   :  { %584 = vmatpush1.bf16.msra.mxu0 %v583_v6  ;;  %v139_v6 = vld [vmem:[%s1450_s1 + $0x400] sm:$0xff]  ;;  %v148_v11 = vld [vmem:[%s1450_s1 + $0x448] sm:$0xff]  ;;  %v154_v14 = vld [vmem:[%s1450_s1 + $0x478] sm:$0xff] }
  0x2f   :  { %692 = vmatpush1.bf16.msra.mxu1 %v691_v8  ;;  %586 = vmatprep.subr.bf16.mxu0 %v585_v9  ;;  %v141_v8 = vld [vmem:[%s1450_s1 + $0x410] sm:$0xff]  ;;  %v713_v9 = vpack.c.bf16 %v146_v2, %v142_v1  ;;  %v152_v12 = vld [vmem:[%s1450_s1 + $0x468] sm:$0xff]  ;;  %v227_v15 = vld [vmem:[%s1451_s0] sm:$0xff]  ;;  %v607_v16 = vpack.c.bf16 %v143_v7, %v139_v6 }
  0x30   :  { %694 = vmatprep.subr.bf16.mxu1 %v693_v13  ;;  %v150_v13 = vld [vmem:[%s1450_s1 + $0x458] sm:$0xff]  ;;  %v715_v17 = vpack.c.bf16 %v145_v10, %v141_v8  ;;  %v609_v18 = vpack.c.bf16 %v152_v12, %v148_v11  ;;  %v153_v23 = vld [vmem:[%s1450_s1 + $0x470] sm:$0xff]  ;;  %v156_v24 = vld [vmem:[%s1450_s1 + $0x488] sm:$0xff] }
  0x31   :  { %v717_v22 = vpack.c.bf16 %v154_v14, %v150_v13  ;;  %v158_v26 = vld [vmem:[%s1450_s1 + $0x498] sm:$0xff]  ;;  %v161_v35 = vld [vmem:[%s1450_s1 + $0x4b0] sm:$0xff]  ;;  %v164_v36 = vld [vmem:[%s1450_s1 + $0x4c8] sm:$0xff] }
  0x32   :  { %588 = vmatpush1.bf16.msra.mxu0 %v587_v19  ;;  %v147_v19 = vld [vmem:[%s1450_s1 + $0x440] sm:$0xff]  ;;  %v162_v27 = vld [vmem:[%s1450_s1 + $0x4b8] sm:$0xff]  ;;  %v165_v46 = vld [vmem:[%s1450_s1 + $0x4d0] sm:$0xff] }
  0x33   :  { %696 = vmatpush1.bf16.msra.mxu1 %v695_v20  ;;  %590 = vmatprep.subr.bf16.mxu0 %v589_v21  ;;  %v151_v20 = vld [vmem:[%s1450_s1 + $0x460] sm:$0xff]  ;;  %v149_v21 = vld [vmem:[%s1450_s1 + $0x450] sm:$0xff]  ;;  %v721_v34 = vpack.c.bf16 %v162_v27, %v158_v26  ;;  %v166_v38 = vld [vmem:[%s1450_s1 + $0x4d8] sm:$0xff] }
  0x34   :  { %698 = vmatprep.subr.bf16.mxu1 %v697_v25  ;;  %v160_v25 = vld [vmem:[%s1450_s1 + $0x4a8] sm:$0xff]  ;;  %v611_v28 = vpack.c.bf16 %v151_v20, %v147_v19  ;;  %v719_v29 = vpack.c.bf16 %v153_v23, %v149_v21  ;;  %v170_v39 = vld [vmem:[%s1450_s1 + $0x4f8] sm:$0xff]  ;;  %v169_v48 = vld [vmem:[%s1450_s1 + $0x4f0] sm:$0xff] }
  0x35   :  { %v613_v30 = vpack.c.bf16 %v160_v25, %v156_v24  ;;  %v230_v41 = vld [vmem:[%s1451_s0 + $0x18] sm:$0xff]  ;;  %v725_v47 = vpack.c.bf16 %v170_v39, %v166_v38  ;;  %v176_v50 = vld [vmem:[%s1450_s1 + $0x528] sm:$0xff]  ;;  %v727_v54 = vpack.c.bf16 %v169_v48, %v165_v46  ;;  %v173_v58 = vld [vmem:[%s1450_s1 + $0x510] sm:$0xff] }
  0x36   :  { %592 = vmatpush1.bf16.msra.mxu0 %v591_v31  ;;  %v155_v31 = vld [vmem:[%s1450_s1 + $0x480] sm:$0xff]  ;;  %v174_v51 = vld [vmem:[%s1450_s1 + $0x518] sm:$0xff]  ;;  %v177_v60 = vld [vmem:[%s1450_s1 + $0x530] sm:$0xff] }
  0x37   :  { %700 = vmatpush1.bf16.msra.mxu1 %v699_v32  ;;  %594 = vmatprep.subr.bf16.mxu0 %v593_v33  ;;  %v159_v32 = vld [vmem:[%s1450_s1 + $0x4a0] sm:$0xff]  ;;  %v157_v33 = vld [vmem:[%s1450_s1 + $0x490] sm:$0xff]  ;;  %v178_v52 = vld [vmem:[%s1450_s1 + $0x538] sm:$0xff]  ;;  %v731_v2 = vpack.c.bf16 %v177_v60, %v173_v58 }
  0x38   :  { %702 = vmatprep.subr.bf16.mxu1 %v701_v37  ;;  %v168_v37 = vld [vmem:[%s1450_s1 + $0x4e8] sm:$0xff]  ;;  %v615_v40 = vpack.c.bf16 %v159_v32, %v155_v31  ;;  %v723_v42 = vpack.c.bf16 %v161_v35, %v157_v33  ;;  %v729_v59 = vpack.c.bf16 %v178_v52, %v174_v51  ;;  %v182_v63 = vld [vmem:[%s1450_s1 + $0x558] sm:$0xff]  ;;  %v181_v6 = vld [vmem:[%s1450_s1 + $0x550] sm:$0xff] }
  0x39   :  { %v184_v62 = vld [vmem:[%s1450_s1 + $0x568] sm:$0xff]  ;;  %v186_v0 = vld [vmem:[%s1450_s1 + $0x578] sm:$0xff]  ;;  %v185_v8 = vld [vmem:[%s1450_s1 + $0x570] sm:$0xff] }
  0x3a   :  { %596 = vmatpush1.bf16.msra.mxu0 %v595_v43  ;;  %v617_v43 = vpack.c.bf16 %v168_v37, %v164_v36  ;;  %v733_v7 = vpack.c.bf16 %v186_v0, %v182_v63  ;;  %v192_v10 = vld [vmem:[%s1450_s1 + $0x5a8] sm:$0xff]  ;;  %v190_v11 = vld [vmem:[%s1450_s1 + $0x598] sm:$0xff]  ;;  %v735_v14 = vpack.c.bf16 %v185_v8, %v181_v6  ;;  %v193_v20 = vld [vmem:[%s1450_s1 + $0x5b0] sm:$0xff] }
  0x3b   :  { %704 = vmatpush1.bf16.msra.mxu1 %v703_v44  ;;  %598 = vmatprep.subr.bf16.mxu0 %v597_v45  ;;  %v163_v44 = vld [vmem:[%s1450_s1 + $0x4c0] sm:$0xff]  ;;  %v194_v12 = vld [vmem:[%s1450_s1 + $0x5b8] sm:$0xff]  ;;  %v196_v21 = vld [vmem:[%s1450_s1 + $0x5c8] sm:$0xff] }
  0x3c   :  { %706 = vmatprep.subr.bf16.mxu1 %v705_v49  ;;  %v167_v45 = vld [vmem:[%s1450_s1 + $0x4e0] sm:$0xff]  ;;  %v172_v49 = vld [vmem:[%s1450_s1 + $0x508] sm:$0xff]  ;;  %v737_v19 = vpack.c.bf16 %v194_v12, %v190_v11  ;;  %v198_v23 = vld [vmem:[%s1450_s1 + $0x5d8] sm:$0xff] }
  0x3d   :  { %v619_v53 = vpack.c.bf16 %v167_v45, %v163_v44  ;;  %v202_v24 = vld [vmem:[%s1450_s1 + $0x5f8] sm:$0xff]  ;;  %v201_v32 = vld [vmem:[%s1450_s1 + $0x5f0] sm:$0xff]  ;;  %v204_v33 = vld [vmem:[%s1450_s1 + $0x608] sm:$0xff] }
  0x3e   :  { %600 = vmatpush1.bf16.msra.mxu0 %v599_v55  ;;  %v621_v55 = vpack.c.bf16 %v176_v50, %v172_v49  ;;  %v741_v31 = vpack.c.bf16 %v202_v24, %v198_v23  ;;  %v206_v35 = vld [vmem:[%s1450_s1 + $0x618] sm:$0xff]  ;;  %v209_v44 = vld [vmem:[%s1450_s1 + $0x630] sm:$0xff]  ;;  %v212_v45 = vld [vmem:[%s1450_s1 + $0x648] sm:$0xff] }
  0x3f   :  { %708 = vmatpush1.bf16.msra.mxu1 %v707_v56  ;;  %602 = vmatprep.subr.bf16.mxu0 %v601_v57  ;;  %v171_v56 = vld [vmem:[%s1450_s1 + $0x500] sm:$0xff]  ;;  %v210_v36 = vld [vmem:[%s1450_s1 + $0x638] sm:$0xff]  ;;  %v216_v46 = vld [vmem:[%s1450_s1 + $0x668] sm:$0xff] }
  0x40   :  { %710 = vmatprep.subr.bf16.mxu1 %v709_v61  ;;  %v175_v57 = vld [vmem:[%s1450_s1 + $0x520] sm:$0xff]  ;;  %v180_v61 = vld [vmem:[%s1450_s1 + $0x548] sm:$0xff]  ;;  %v218_v48 = vld [vmem:[%s1450_s1 + $0x678] sm:$0xff]  ;;  %v641_v51 = vpack.c.bf16 %v216_v46, %v212_v45 }
  0x41   :  { %v623_v1 = vpack.c.bf16 %v175_v57, %v171_v56  ;;  %v211_v52 = vld [vmem:[%s1450_s1 + $0x640] sm:$0xff]  ;;  %v217_v56 = vld [vmem:[%s1450_s1 + $0x670] sm:$0xff]  ;;  %v220_v57 = vld [vmem:[%s1450_s1 + $0x688] sm:$0xff] }
  0x42   :  { %604 = vmatpush1.bf16.msra.mxu0 %v603_v3  ;;  %v625_v3 = vpack.c.bf16 %v184_v62, %v180_v61  ;;  %v224_v58 = vld [vmem:[%s1450_s1 + $0x6a8] sm:$0xff]  ;;  %v226_v60 = vld [vmem:[%s1450_s1 + $0x6b8] sm:$0xff]  ;;  %v219_v0 = vld [vmem:[%s1450_s1 + $0x680] sm:$0xff] }
  0x43   :  { %712 = vmatpush1.bf16.msra.mxu1 %v711_v4  ;;  %606 = vmatprep.subr.bf16.mxu0 %v605_v5  ;;  %v179_v4 = vld [vmem:[%s1450_s1 + $0x540] sm:$0xff]  ;;  %v645_v63 = vpack.c.bf16 %v224_v58, %v220_v57 }
  0x44   :  { %714 = vmatprep.subr.bf16.mxu1 %v713_v9  ;;  %v183_v5 = vld [vmem:[%s1450_s1 + $0x560] sm:$0xff]  ;;  %v188_v9 = vld [vmem:[%s1450_s1 + $0x588] sm:$0xff] }
  0x45   :  { %300 = vmatmul.mubr.f32.vlgmr.msra.gmra.mrb[0].mxu0 %v227_v15  ;;  %v627_v13 = vpack.c.bf16 %v183_v5, %v179_v4  ;;  %v225_v4 = vld [vmem:[%s1450_s1 + $0x6b0] sm:$0xff] }
  0x46   :  { %608 = vmatpush1.bf16.msra.mxu0 %v607_v16  ;;  %442 = vmatmul.mubr.f32.vlgmr.msra.gmra.mrb[0].mxu1 %v227_v15  ;;  %v629_v15 = vpack.c.bf16 %v192_v10, %v188_v9  ;;  %v187_v16 = vld [vmem:[%s1450_s1 + $0x580] sm:$0xff] }
  0x47   :  { %716 = vmatpush1.bf16.msra.mxu1 %v715_v17  ;;  %610 = vmatprep.subr.bf16.mxu0 %v609_v18  ;;  %v191_v17 = vld [vmem:[%s1450_s1 + $0x5a0] sm:$0xff]  ;;  %v189_v18 = vld [vmem:[%s1450_s1 + $0x590] sm:$0xff] }
  0x48   :  { %718 = vmatprep.subr.bf16.mxu1 %v717_v22  ;;  %539 = vmatprep.mubr.msk.f32.mxu0 %vm231_vm0, %v230_v41  ;;  %v200_v22 = vld [vmem:[%s1450_s1 + $0x5e8] sm:$0xff]  ;;  %v631_v25 = vpack.c.bf16 %v191_v17, %v187_v16  ;;  %v739_v26 = vpack.c.bf16 %v193_v20, %v189_v18 }
  0x49   :  { %540 = vmatprep.mubr.msk.f32.mxu1 %vm231_vm0, %v230_v41  ;;  %v633_v27 = vpack.c.bf16 %v200_v22, %v196_v21  ;;  %v207_v41 = vld [vmem:[%s1450_s1 + $0x620] sm:$0xff] }
  0x4a   :  { %612 = vmatpush1.bf16.msra.mxu0 %v611_v28  ;;  %v195_v28 = vld [vmem:[%s1450_s1 + $0x5c0] sm:$0xff] }
  0x4b   :  { %720 = vmatpush1.bf16.msra.mxu1 %v719_v29  ;;  %614 = vmatprep.subr.bf16.mxu0 %v613_v30  ;;  %v199_v29 = vld [vmem:[%s1450_s1 + $0x5e0] sm:$0xff]  ;;  %v197_v30 = vld [vmem:[%s1450_s1 + $0x5d0] sm:$0xff] }
  0x4c   :  { %722 = vmatprep.subr.bf16.mxu1 %v721_v34  ;;  %v208_v34 = vld [vmem:[%s1450_s1 + $0x628] sm:$0xff]  ;;  %v635_v37 = vpack.c.bf16 %v199_v29, %v195_v28  ;;  %v743_v38 = vpack.c.bf16 %v201_v32, %v197_v30 }
  0x4d   :  { %v637_v39 = vpack.c.bf16 %v208_v34, %v204_v33 }
  0x4e   :  { %616 = vmatpush1.bf16.msra.mxu0 %v615_v40  ;;  %v203_v40 = vld [vmem:[%s1450_s1 + $0x600] sm:$0xff] }
  0x4f   :  { %724 = vmatpush1.bf16.msra.mxu1 %v723_v42  ;;  %618 = vmatprep.subr.bf16.mxu0 %v617_v43  ;;  %v205_v42 = vld [vmem:[%s1450_s1 + $0x610] sm:$0xff]  ;;  %v745_v43 = vpack.c.bf16 %v210_v36, %v206_v35  ;;  %v639_v49 = vpack.c.bf16 %v207_v41, %v203_v40 }
  0x50   :  { %726 = vmatprep.subr.bf16.mxu1 %v725_v47  ;;  %v214_v47 = vld [vmem:[%s1450_s1 + $0x658] sm:$0xff]  ;;  %v747_v50 = vpack.c.bf16 %v209_v44, %v205_v42 }
  0x52   :  { %620 = vmatpush1.bf16.msra.mxu0 %v619_v53  ;;  %v215_v53 = vld [vmem:[%s1450_s1 + $0x660] sm:$0xff] }
  0x53   :  { %728 = vmatpush1.bf16.msra.mxu1 %v727_v54  ;;  %622 = vmatprep.subr.bf16.mxu0 %v621_v55  ;;  %v213_v54 = vld [vmem:[%s1450_s1 + $0x650] sm:$0xff]  ;;  %v749_v55 = vpack.c.bf16 %v218_v48, %v214_v47  ;;  %v643_v61 = vpack.c.bf16 %v215_v53, %v211_v52 }
  0x54   :  { %730 = vmatprep.subr.bf16.mxu1 %v729_v59  ;;  %v222_v59 = vld [vmem:[%s1450_s1 + $0x698] sm:$0xff]  ;;  %v751_v62 = vpack.c.bf16 %v217_v56, %v213_v54 }
  0x56   :  { %624 = vmatpush1.bf16.msra.mxu0 %v623_v1  ;;  %v223_v1 = vld [vmem:[%s1450_s1 + $0x6a0] sm:$0xff] }
  0x57   :  { %732 = vmatpush1.bf16.msra.mxu1 %v731_v2  ;;  %626 = vmatprep.subr.bf16.mxu0 %v625_v3  ;;  %v753_v2 = vpack.c.bf16 %v226_v60, %v222_v59  ;;  %v221_v3 = vld [vmem:[%s1450_s1 + $0x690] sm:$0xff]  ;;  %v647_v5 = vpack.c.bf16 %v223_v1, %v219_v0 }
  0x58   :  { %734 = vmatprep.subr.bf16.mxu1 %v733_v7  ;;  %v755_v6 = vpack.c.bf16 %v225_v4, %v221_v3  ;;  %v229_v7 = vld [vmem:[%s1451_s0 + $0x10] sm:$0xff] }
  0x5a   :  { %628 = vmatpush1.bf16.msra.mxu0 %v627_v13 }
  0x5b   :  { %736 = vmatpush1.bf16.msra.mxu1 %v735_v14  ;;  %630 = vmatprep.subr.bf16.mxu0 %v629_v15 }
  0x5c   :  { %738 = vmatprep.subr.bf16.mxu1 %v737_v19 }
  0x5e   :  { %632 = vmatpush1.bf16.msra.mxu0 %v631_v25 }
  0x5f   :  { %740 = vmatpush1.bf16.msra.mxu1 %v739_v26  ;;  %634 = vmatprep.subr.bf16.mxu0 %v633_v27 }
  0x60   :  { %742 = vmatprep.subr.bf16.mxu1 %v741_v31 }
  0x62   :  { %636 = vmatpush1.bf16.msra.mxu0 %v635_v37 }
  0x63   :  { %744 = vmatpush1.bf16.msra.mxu1 %v743_v38  ;;  %638 = vmatprep.subr.bf16.mxu0 %v637_v39 }
  0x64   :  { %746 = vmatprep.subr.bf16.mxu1 %v745_v43 }
  0x66   :  { %640 = vmatpush1.bf16.msra.mxu0 %v639_v49 }
  0x67   :  { %748 = vmatpush1.bf16.msra.mxu1 %v747_v50  ;;  %642 = vmatprep.subr.bf16.mxu0 %v641_v51 }
  0x68   :  { %750 = vmatprep.subr.bf16.mxu1 %v749_v55 }
  0x6a   :  { %644 = vmatpush1.bf16.msra.mxu0 %v643_v61 }
  0x6b   :  { %752 = vmatpush1.bf16.msra.mxu1 %v751_v62  ;;  %646 = vmatprep.subr.bf16.mxu0 %v645_v63 }
  0x6c   :  { %754 = vmatprep.subr.bf16.mxu1 %v753_v2 }
  0x6e   :  { %648 = vmatpush1.bf16.msra.mxu0 %v647_v5 }
  0x6f   :  { %756 = vmatpush1.bf16.msra.mxu1 %v755_v6 }
  0x71   :  { %371 = vmatmul.mubr.f32.vlgmr.msra.gmra.mrb[0].mxu0 %v229_v7 }
  0x72   :  { %513 = vmatmul.mubr.f32.vlgmr.msra.gmra.mrb[0].mxu1 %v229_v7 }
 0x144   :  { %v372_v8 = vpop.f32.mrb[0].mxu0 }
 0x145   :  { %vm519_vm1 = vcmp.ge.f32.partialorder %v372_v8, 0.0  ;;  %v523_v9 = vmul.f32 0.2, %v372_v8  ;;  %v514_v10 = vpop.f32.mrb[0].mxu1  ;;  %v374_v11 = vpop.f32.mrb[1].mxu0 }
 0x146   :  { %vm521_vm2 = vcmp.ge.f32.partialorder %v514_v10, 0.0  ;;  %v525_v12 = vmul.f32 0.2, %v514_v10  ;;  %vm520_vm3 = vcmp.ge.f32.partialorder %v374_v11, 0.0  ;;  %v524_v13 = vmul.f32 0.2, %v374_v11 }
 0x147   :  { %v527_v14 = vsel %vm519_vm1, %v372_v8, %v523_v9  ;;  %v516_v15 = vpop.f32.mrb[1].mxu1 }
 0x148   :  { %531 = vst [vmem:[%s1452_s2] sm:$0xff] %v527_v14  ;;  %v529_v16 = vsel %vm521_vm2, %v514_v10, %v525_v12  ;;  %v528_v17 = vsel %vm520_vm3, %v374_v11, %v524_v13  ;;  %vm522_vm4 = vcmp.ge.f32.partialorder %v516_v15, 0.0  ;;  %v526_v18 = vmul.f32 0.2, %v516_v15 }
 0x149   :  { %533 = vst [vmem:[%s1452_s2 + $0x10] sm:$0xff] %v529_v16  ;;  %532 = vst [vmem:[%s1452_s2 + $0x8] sm:$0xff] %v528_v17 }
 0x14a   :  { %v530_v19 = vsel %vm522_vm4, %v516_v15, %v526_v18 }
 0x14b   :  { %534 = vst [vmem:[%s1452_s2 + $0x18] sm:$0xff] %v530_v19 }

</bundles_post_ra>
